<compile_context>
chip_gen: v5e
topology: v5e:2x2
jax: 0.10.0
libtpu: 0.0.40
codegen_flags: <defaults>
</compile_context>

<pallas_src>
import jax
import jax.numpy as jnp
from jax import lax
from jax.experimental import pallas as pl
from jax.experimental.pallas import tpu as pltpu

F32 = jnp.float32
EPS = 1e-8
OUT_LANES = 128  # lane-dense output slab width


def _vmem_spec():
    return pl.BlockSpec(memory_space=pltpu.MemorySpace.VMEM)


# ------------------------------ fused Pallas kernel ------------------------- #

def _egnn_fused_kernel(h0_ref, x_ref, ea_ref, srow_ref, scol_ref,
                       pack_h_ref, pack_x_ref,
                       w_in_ref, b_in_ref, w_out_ref, b_out_ref,
                       wsrc_ref, wtgt_ref, wrad_ref, wea_ref, be1_ref,
                       we2_ref, be2_ref,
                       wc1_ref, bc1_ref, wc2_ref,
                       wn1h_ref, wn1a_ref, bn1_ref, wn2_ref, bn2_ref,
                       out_ref):
    f32 = jnp.float32
    # contract the E axis of both operands (scatter-add as transposed matmul,
    # transpose folded into the MXU contraction -> no srowT buffer needed)
    dn_scatter = (((0,), (0,)), ((), ()))
    n_layers = wsrc_ref.shape[0]

    srow = srow_ref[...]                      # (E, N) one-hot row-selection
    scol = scol_ref[...]                      # (E, N) one-hot col-selection
    ea = ea_ref[...]                          # (E, A)
    x = x_ref[...]                            # (N, 3)

    # loop-invariant: fold coords_agg='mean' (divide by in-degree, clamp >= 1)
    # into a pre-scaled scatter matrix, computed once for all layers.
    deg = jnp.sum(srow, axis=0, keepdims=True)            # (1, N)
    srow_mean = srow * (1.0 / jnp.maximum(deg, 1.0))       # (E, N)

    # ---- input embedding ----
    h = jnp.dot(h0_ref[...], w_in_ref[...], preferred_element_type=f32) + b_in_ref[...]
    h1 = h

    # ---- E_GCL layers, unrolled; h/x stay in VMEM/vregs across the loop ----
    for l in range(n_layers):
        # coord2radial (normalize=True)
        x_row = jnp.dot(srow, x, preferred_element_type=f32)        # (E, 3)
        x_col = jnp.dot(scol, x, preferred_element_type=f32)
        coord_diff = x_row - x_col
        radial = jnp.sum(coord_diff * coord_diff, axis=1, keepdims=True)  # (E, 1)
        coord_diff = coord_diff / (jnp.sqrt(radial) + EPS)

        # edge model: cat([h_row, h_col, radial, edge_attr]) via split weights
        h_row = jnp.dot(srow, h, preferred_element_type=f32)        # (E, H)
        h_col = jnp.dot(scol, h, preferred_element_type=f32)
        e_pre = (jnp.dot(h_row, wsrc_ref[l], preferred_element_type=f32)
                 + jnp.dot(h_col, wtgt_ref[l], preferred_element_type=f32)
                 + radial * wrad_ref[l]                               # (E,1)*(1,H)
                 + jnp.dot(ea, wea_ref[l], preferred_element_type=f32)
                 + be1_ref[l])
        e_hid = jnp.maximum(e_pre, 0.0)                               # ReLU
        edge_feat = jnp.maximum(
            jnp.dot(e_hid, we2_ref[l], preferred_element_type=f32) + be2_ref[l], 0.0)

        # coord model (mean aggregation folded into srow_mean)
        c_hid = jnp.maximum(
            jnp.dot(edge_feat, wc1_ref[l], preferred_element_type=f32) + bc1_ref[l], 0.0)
        phi_x = jnp.sum(c_hid * wc2_ref[l], axis=1, keepdims=True)    # (E, 1), no bias
        trans = coord_diff * phi_x                                    # (E, 3)
        x = x + lax.dot_general(srow_mean, trans, dn_scatter,
                                preferred_element_type=f32)           # (N, 3)

        # node model (residual=True)
        agg = lax.dot_general(srow, edge_feat, dn_scatter,
                              preferred_element_type=f32)             # (N, H)
        n_hid = jnp.maximum(
            jnp.dot(h, wn1h_ref[l], preferred_element_type=f32)
            + jnp.dot(agg, wn1a_ref[l], preferred_element_type=f32)
            + bn1_ref[l], 0.0)
        h = h + jnp.dot(n_hid, wn2_ref[l], preferred_element_type=f32) + bn2_ref[l]

    # ---- output head: sigmoid((h + h1) @ W_out + b_out) ----
    h_head = jax.nn.sigmoid(
        jnp.dot(h + h1, w_out_ref[...], preferred_element_type=f32) + b_out_ref[...])

    # ---- lane-dense single-slab store: [head | coords | zero pad] ----
    out_ref[...] = (jnp.dot(h_head, pack_h_ref[...], preferred_element_type=f32)
                    + jnp.dot(x, pack_x_ref[...], preferred_element_type=f32)
                    ).astype(out_ref.dtype)


# --------------------------------- wrapper ---------------------------------- #

def egnn_pallas(params, h0, x0, rows, cols, edge_attr):
    n = h0.shape[0]
    H = params["w_in"].shape[1]
    out_nf = params["w_out"].shape[1]

    # one-hot selection matrices (built under the same jit as the kernel call)
    srow = jax.nn.one_hot(rows, n, dtype=F32)              # (E, N)
    scol = jax.nn.one_hot(cols, n, dtype=F32)              # (E, N)

    # packing matrices for the lane-dense output slab
    pack_h = jnp.zeros((out_nf, OUT_LANES), F32).at[:, :out_nf].set(jnp.eye(out_nf, dtype=F32))
    pack_x = jnp.zeros((3, OUT_LANES), F32).at[:, out_nf:out_nf + 3].set(jnp.eye(3, dtype=F32))

    # stack per-layer weights along a leading layer axis; split we1/wn1 once here
    def stack(key):
        return jnp.stack([lp[key] for lp in params["layers"]])

    we1 = stack("we1")                       # (L, 2H+1+A, H)
    wsrc, wtgt = we1[:, :H], we1[:, H:2 * H]
    wrad, wea = we1[:, 2 * H:2 * H + 1], we1[:, 2 * H + 1:]
    wn1 = stack("wn1")                       # (L, 2H, H)
    wn1h, wn1a = wn1[:, :H], wn1[:, H:]
    be1, we2, be2 = stack("be1"), stack("we2"), stack("be2")
    wc1, bc1, wc2 = stack("wc1"), stack("bc1"), stack("wc2")
    bn1, wn2, bn2 = stack("bn1"), stack("wn2"), stack("bn2")

    args = (h0, x0, edge_attr, srow, scol, pack_h, pack_x,
            params["w_in"], params["b_in"], params["w_out"], params["b_out"],
            wsrc, wtgt, wrad, wea, be1, we2, be2,
            wc1, bc1, wc2,
            wn1h, wn1a, bn1, wn2, bn2)

    slab = pl.pallas_call(
        _egnn_fused_kernel,
        out_shape=jax.ShapeDtypeStruct((n, OUT_LANES), F32),
        in_specs=[_vmem_spec()] * len(args),
        out_specs=_vmem_spec(),
    )(*args)

    h_out = slab[:, :out_nf]
    x_out = slab[:, out_nf:out_nf + 3]
    # TODO(synk): EGNN.__init__ defines self.norm = BatchNorm1d but forward() never uses it.
    return h_out, x_out


egnn_forward = jax.jit(egnn_pallas)


# ------------------------------ pure-JAX reference -------------------------- #

def _segment_sum(data, ids, n):
    return jnp.zeros((n, data.shape[1]), data.dtype).at[ids].add(data)


def egnn_reference(params, h0, x0, rows, cols, edge_attr):
    n = h0.shape[0]
    h = h0 @ params["w_in"] + params["b_in"]
    h1 = h
    x = x0
    for lp in params["layers"]:
        coord_diff = x[rows] - x[cols]
        radial = jnp.sum(coord_diff ** 2, axis=1, keepdims=True)
        coord_diff = coord_diff / (jnp.sqrt(radial) + EPS)
        e_in = jnp.concatenate([h[rows], h[cols], radial, edge_attr], axis=1)
        e = jax.nn.relu(e_in @ lp["we1"] + lp["be1"])
        e = jax.nn.relu(e @ lp["we2"] + lp["be2"])
        c = jax.nn.relu(e @ lp["wc1"] + lp["bc1"])
        phi = jnp.sum(c * lp["wc2"], axis=1, keepdims=True)
        trans = coord_diff * phi
        cnt = jnp.maximum(_segment_sum(jnp.ones_like(trans), rows, n), 1.0)
        x = x + _segment_sum(trans, rows, n) / cnt
        agg = _segment_sum(e, rows, n)
        nh = jax.nn.relu(jnp.concatenate([h, agg], axis=1) @ lp["wn1"] + lp["bn1"])
        h = h + (nh @ lp["wn2"] + lp["bn2"])
    h = h + h1
    h = jax.nn.sigmoid(h @ params["w_out"] + params["b_out"])
    return h, x


# ------------------------------ param init ---------------------------------- #

def _init_linear(key, fan_in, fan_out, bound=None, bias=True):
    kw, kb = jax.random.split(key)
    if bound is None:
        bound = fan_in ** -0.5
    w = jax.random.uniform(kw, (fan_in, fan_out), F32, -bound, bound)
    if not bias:
        return w
    b = jax.random.uniform(kb, (1, fan_out), F32, -bound, bound)
    return w, b


def init_params(key, in_nf, H, out_nf, A, n_layers):
    ks = jax.random.split(key, 2 + n_layers)
    w_in, b_in = _init_linear(ks[0], in_nf, H)
    w_out, b_out = _init_linear(ks[1], H, out_nf)
    layers = []
    for i in range(n_layers):
        lk = jax.random.split(ks[2 + i], 6)
        we1, be1 = _init_linear(lk[0], 2 * H + 1 + A, H)   # edge_mlp linear 1
        we2, be2 = _init_linear(lk[1], H, H)               # edge_mlp linear 2
        wn1, bn1 = _init_linear(lk[2], 2 * H, H)           # node_mlp linear 1
        wn2, bn2 = _init_linear(lk[3], H, H)               # node_mlp linear 2
        wc1, bc1 = _init_linear(lk[4], H, H)               # coord_mlp linear 1
        xav = 0.001 * (6.0 / (H + 1)) ** 0.5               # xavier_uniform, gain=0.001
        wc2 = jax.random.uniform(lk[5], (1, H), F32, -xav, xav)  # stored transposed, no bias
        layers.append(dict(we1=we1, be1=be1, we2=we2, be2=be2,
                           wn1=wn1, bn1=bn1, wn2=wn2, bn2=bn2,
                           wc1=wc1, bc1=bc1, wc2=wc2))
    return dict(w_in=w_in, b_in=b_in, w_out=w_out, b_out=b_out, layers=layers)


# ------------------------------------ main ----------------------------------- #

if __name__ == "__main__":
    N, HIDDEN, IN_NF, OUT_NF, EDGE_NF, N_LAYERS = 8, 32, 4, 4, 2, 4

    # fully connected graph without self loops
    rows_l, cols_l = [], []
    for i in range(N):
        for j in range(N):
            if i != j:
                rows_l.append(i)
                cols_l.append(j)
    rows = jnp.array(rows_l, jnp.int32)
    cols = jnp.array(cols_l, jnp.int32)
    E = rows.shape[0]

    key = jax.random.PRNGKey(0)
    k_h, k_x, k_e, k_p = jax.random.split(key, 4)
    h0 = jax.random.normal(k_h, (N, IN_NF), F32)
    x0 = jax.random.normal(k_x, (N, 3), F32)
    edge_attr = jax.random.normal(k_e, (E, EDGE_NF), F32)
    params = init_params(k_p, IN_NF, HIDDEN, OUT_NF, EDGE_NF, N_LAYERS)

    h_out, x_out = egnn_forward(params, h0, x0, rows, cols, edge_attr)
    jax.block_until_ready((h_out, x_out))

    h_ref, x_ref = egnn_reference(params, h0, x0, rows, cols, edge_attr)
    assert h_out.shape == (N, OUT_NF) and x_out.shape == (N, 3)
    assert jnp.allclose(h_out, h_ref, atol=1e-3, rtol=1e-3)
    assert jnp.allclose(x_out, x_ref, atol=1e-3, rtol=1e-3)

    print("KERNEL_OK")
</pallas_src>

<mosaic_0001>
module attributes {stable_mosaic.version = 11 : i64} {
  func.func @_egnn_fused_kernel(%arg0: memref<8x4xf32, #tpu.memory_space<vmem>>, %arg1: memref<8x3xf32, #tpu.memory_space<vmem>>, %arg2: memref<56x2xf32, #tpu.memory_space<vmem>>, %arg3: memref<56x8xf32, #tpu.memory_space<vmem>>, %arg4: memref<56x8xf32, #tpu.memory_space<vmem>>, %arg5: memref<4x128xf32, #tpu.memory_space<vmem>>, %arg6: memref<3x128xf32, #tpu.memory_space<vmem>>, %arg7: memref<4x32xf32, #tpu.memory_space<vmem>>, %arg8: memref<1x32xf32, #tpu.memory_space<vmem>>, %arg9: memref<32x4xf32, #tpu.memory_space<vmem>>, %arg10: memref<1x4xf32, #tpu.memory_space<vmem>>, %arg11: memref<4x32x32xf32, #tpu.memory_space<vmem>>, %arg12: memref<4x32x32xf32, #tpu.memory_space<vmem>>, %arg13: memref<4x1x32xf32, #tpu.memory_space<vmem>>, %arg14: memref<4x2x32xf32, #tpu.memory_space<vmem>>, %arg15: memref<4x1x32xf32, #tpu.memory_space<vmem>>, %arg16: memref<4x32x32xf32, #tpu.memory_space<vmem>>, %arg17: memref<4x1x32xf32, #tpu.memory_space<vmem>>, %arg18: memref<4x32x32xf32, #tpu.memory_space<vmem>>, %arg19: memref<4x1x32xf32, #tpu.memory_space<vmem>>, %arg20: memref<4x1x32xf32, #tpu.memory_space<vmem>>, %arg21: memref<4x32x32xf32, #tpu.memory_space<vmem>>, %arg22: memref<4x32x32xf32, #tpu.memory_space<vmem>>, %arg23: memref<4x1x32xf32, #tpu.memory_space<vmem>>, %arg24: memref<4x32x32xf32, #tpu.memory_space<vmem>>, %arg25: memref<4x1x32xf32, #tpu.memory_space<vmem>>, %arg26: memref<8x128xf32, #tpu.memory_space<vmem>>) attributes {dimension_semantics = [], scalar_prefetch = 0 : i64, scratch_operands = 0 : i64, tpu.core_type = #tpu.core_type<tc>} {
    %c0 = arith.constant 0 : index
    %c0_0 = arith.constant 0 : index
    %0 = vector.load %arg3[%c0, %c0_0] : memref<56x8xf32, #tpu.memory_space<vmem>>, vector<56x8xf32>
    %c0_1 = arith.constant 0 : index
    %c0_2 = arith.constant 0 : index
    %1 = vector.load %arg4[%c0_1, %c0_2] : memref<56x8xf32, #tpu.memory_space<vmem>>, vector<56x8xf32>
    %c0_3 = arith.constant 0 : index
    %c0_4 = arith.constant 0 : index
    %2 = vector.load %arg2[%c0_3, %c0_4] : memref<56x2xf32, #tpu.memory_space<vmem>>, vector<56x2xf32>
    %c0_5 = arith.constant 0 : index
    %c0_6 = arith.constant 0 : index
    %3 = vector.load %arg1[%c0_5, %c0_6] : memref<8x3xf32, #tpu.memory_space<vmem>>, vector<8x3xf32>
    %cst = arith.constant dense<0.000000e+00> : vector<8xf32>
    %4 = vector.multi_reduction <add>, %0, %cst [0] : vector<56x8xf32> to vector<8xf32>
    %5 = vector.shape_cast %4 : vector<8xf32> to vector<1x8xf32>
    %cst_7 = arith.constant 1.000000e+00 : f32
    %6 = vector.broadcast %cst_7 : f32 to vector<1x8xf32>
    %7 = arith.maximumf %5, %6 : vector<1x8xf32>
    %cst_8 = arith.constant 1.000000e+00 : f32
    %8 = vector.broadcast %cst_8 : f32 to vector<1x8xf32>
    %9 = arith.divf %8, %7 : vector<1x8xf32>
    %10 = vector.broadcast %9 : vector<1x8xf32> to vector<56x8xf32>
    %11 = arith.mulf %0, %10 : vector<56x8xf32>
    %c0_9 = arith.constant 0 : index
    %c0_10 = arith.constant 0 : index
    %12 = vector.load %arg0[%c0_9, %c0_10] : memref<8x4xf32, #tpu.memory_space<vmem>>, vector<8x4xf32>
    %c0_11 = arith.constant 0 : index
    %c0_12 = arith.constant 0 : index
    %13 = vector.load %arg7[%c0_11, %c0_12] : memref<4x32xf32, #tpu.memory_space<vmem>>, vector<4x32xf32>
    %cst_13 = arith.constant dense<0.000000e+00> : vector<8x32xf32>
    %14 = tpu.matmul %12, %13, %cst_13 {dimension_numbers = #tpu.dot_dimension_numbers<[1], [0], [0], [1], [0, 0, 1, 1], [], []>} : vector<8x4xf32>, vector<4x32xf32>, vector<8x32xf32> -> vector<8x32xf32>
    %c0_14 = arith.constant 0 : index
    %c0_15 = arith.constant 0 : index
    %15 = vector.load %arg8[%c0_14, %c0_15] : memref<1x32xf32, #tpu.memory_space<vmem>>, vector<1x32xf32>
    %16 = vector.broadcast %15 : vector<1x32xf32> to vector<8x32xf32>
    %17 = arith.addf %14, %16 : vector<8x32xf32>
    %cst_16 = arith.constant dense<0.000000e+00> : vector<56x3xf32>
    %18 = tpu.matmul %0, %3, %cst_16 {dimension_numbers = #tpu.dot_dimension_numbers<[1], [0], [0], [1], [0, 0, 1, 1], [], []>} : vector<56x8xf32>, vector<8x3xf32>, vector<56x3xf32> -> vector<56x3xf32>
    %cst_17 = arith.constant dense<0.000000e+00> : vector<56x3xf32>
    %19 = tpu.matmul %1, %3, %cst_17 {dimension_numbers = #tpu.dot_dimension_numbers<[1], [0], [0], [1], [0, 0, 1, 1], [], []>} : vector<56x8xf32>, vector<8x3xf32>, vector<56x3xf32> -> vector<56x3xf32>
    %20 = arith.subf %18, %19 : vector<56x3xf32>
    %21 = arith.mulf %20, %20 : vector<56x3xf32>
    %cst_18 = arith.constant dense<0.000000e+00> : vector<56xf32>
    %22 = vector.multi_reduction <add>, %21, %cst_18 [1] : vector<56x3xf32> to vector<56xf32>
    %23 = vector.shape_cast %22 : vector<56xf32> to vector<56x1xf32>
    %24 = math.sqrt %23 : vector<56x1xf32>
    %cst_19 = arith.constant 9.99999993E-9 : f32
    %25 = vector.broadcast %cst_19 : f32 to vector<56x1xf32>
    %26 = arith.addf %24, %25 : vector<56x1xf32>
    %27 = vector.broadcast %26 : vector<56x1xf32> to vector<56x3xf32>
    %28 = arith.divf %20, %27 : vector<56x3xf32>
    %cst_20 = arith.constant dense<0.000000e+00> : vector<56x32xf32>
    %29 = tpu.matmul %0, %17, %cst_20 {dimension_numbers = #tpu.dot_dimension_numbers<[1], [0], [0], [1], [0, 0, 1, 1], [], []>} : vector<56x8xf32>, vector<8x32xf32>, vector<56x32xf32> -> vector<56x32xf32>
    %cst_21 = arith.constant dense<0.000000e+00> : vector<56x32xf32>
    %30 = tpu.matmul %1, %17, %cst_21 {dimension_numbers = #tpu.dot_dimension_numbers<[1], [0], [0], [1], [0, 0, 1, 1], [], []>} : vector<56x8xf32>, vector<8x32xf32>, vector<56x32xf32> -> vector<56x32xf32>
    %c0_22 = arith.constant 0 : index
    %c0_23 = arith.constant 0 : index
    %c0_24 = arith.constant 0 : index
    %31 = vector.load %arg11[%c0_22, %c0_23, %c0_24] : memref<4x32x32xf32, #tpu.memory_space<vmem>>, vector<1x32x32xf32>
    %32 = vector.shape_cast %31 : vector<1x32x32xf32> to vector<32x32xf32>
    %cst_25 = arith.constant dense<0.000000e+00> : vector<56x32xf32>
    %33 = tpu.matmul %29, %32, %cst_25 {dimension_numbers = #tpu.dot_dimension_numbers<[1], [0], [0], [1], [0, 0, 1, 1], [], []>} : vector<56x32xf32>, vector<32x32xf32>, vector<56x32xf32> -> vector<56x32xf32>
    %c0_26 = arith.constant 0 : index
    %c0_27 = arith.constant 0 : index
    %c0_28 = arith.constant 0 : index
    %34 = vector.load %arg12[%c0_26, %c0_27, %c0_28] : memref<4x32x32xf32, #tpu.memory_space<vmem>>, vector<1x32x32xf32>
    %35 = vector.shape_cast %34 : vector<1x32x32xf32> to vector<32x32xf32>
    %cst_29 = arith.constant dense<0.000000e+00> : vector<56x32xf32>
    %36 = tpu.matmul %30, %35, %cst_29 {dimension_numbers = #tpu.dot_dimension_numbers<[1], [0], [0], [1], [0, 0, 1, 1], [], []>} : vector<56x32xf32>, vector<32x32xf32>, vector<56x32xf32> -> vector<56x32xf32>
    %37 = arith.addf %33, %36 : vector<56x32xf32>
    %c0_30 = arith.constant 0 : index
    %c0_31 = arith.constant 0 : index
    %c0_32 = arith.constant 0 : index
    %38 = vector.load %arg13[%c0_30, %c0_31, %c0_32] : memref<4x1x32xf32, #tpu.memory_space<vmem>>, vector<1x1x32xf32>
    %39 = vector.shape_cast %38 : vector<1x1x32xf32> to vector<1x32xf32>
    %40 = vector.broadcast %23 : vector<56x1xf32> to vector<56x32xf32>
    %41 = vector.broadcast %39 : vector<1x32xf32> to vector<56x32xf32>
    %42 = arith.mulf %40, %41 : vector<56x32xf32>
    %43 = arith.addf %37, %42 : vector<56x32xf32>
    %c0_33 = arith.constant 0 : index
    %c0_34 = arith.constant 0 : index
    %c0_35 = arith.constant 0 : index
    %44 = vector.load %arg14[%c0_33, %c0_34, %c0_35] : memref<4x2x32xf32, #tpu.memory_space<vmem>>, vector<1x2x32xf32>
    %45 = vector.shape_cast %44 : vector<1x2x32xf32> to vector<2x32xf32>
    %cst_36 = arith.constant dense<0.000000e+00> : vector<56x32xf32>
    %46 = tpu.matmul %2, %45, %cst_36 {dimension_numbers = #tpu.dot_dimension_numbers<[1], [0], [0], [1], [0, 0, 1, 1], [], []>} : vector<56x2xf32>, vector<2x32xf32>, vector<56x32xf32> -> vector<56x32xf32>
    %47 = arith.addf %43, %46 : vector<56x32xf32>
    %c0_37 = arith.constant 0 : index
    %c0_38 = arith.constant 0 : index
    %c0_39 = arith.constant 0 : index
    %48 = vector.load %arg15[%c0_37, %c0_38, %c0_39] : memref<4x1x32xf32, #tpu.memory_space<vmem>>, vector<1x1x32xf32>
    %49 = vector.shape_cast %48 : vector<1x1x32xf32> to vector<1x32xf32>
    %50 = vector.broadcast %49 : vector<1x32xf32> to vector<56x32xf32>
    %51 = arith.addf %47, %50 : vector<56x32xf32>
    %cst_40 = arith.constant 0.000000e+00 : f32
    %52 = vector.broadcast %cst_40 : f32 to vector<56x32xf32>
    %53 = arith.maximumf %51, %52 : vector<56x32xf32>
    %c0_41 = arith.constant 0 : index
    %c0_42 = arith.constant 0 : index
    %c0_43 = arith.constant 0 : index
    %54 = vector.load %arg16[%c0_41, %c0_42, %c0_43] : memref<4x32x32xf32, #tpu.memory_space<vmem>>, vector<1x32x32xf32>
    %55 = vector.shape_cast %54 : vector<1x32x32xf32> to vector<32x32xf32>
    %cst_44 = arith.constant dense<0.000000e+00> : vector<56x32xf32>
    %56 = tpu.matmul %53, %55, %cst_44 {dimension_numbers = #tpu.dot_dimension_numbers<[1], [0], [0], [1], [0, 0, 1, 1], [], []>} : vector<56x32xf32>, vector<32x32xf32>, vector<56x32xf32> -> vector<56x32xf32>
    %c0_45 = arith.constant 0 : index
    %c0_46 = arith.constant 0 : index
    %c0_47 = arith.constant 0 : index
    %57 = vector.load %arg17[%c0_45, %c0_46, %c0_47] : memref<4x1x32xf32, #tpu.memory_space<vmem>>, vector<1x1x32xf32>
    %58 = vector.shape_cast %57 : vector<1x1x32xf32> to vector<1x32xf32>
    %59 = vector.broadcast %58 : vector<1x32xf32> to vector<56x32xf32>
    %60 = arith.addf %56, %59 : vector<56x32xf32>
    %cst_48 = arith.constant 0.000000e+00 : f32
    %61 = vector.broadcast %cst_48 : f32 to vector<56x32xf32>
    %62 = arith.maximumf %60, %61 : vector<56x32xf32>
    %c0_49 = arith.constant 0 : index
    %c0_50 = arith.constant 0 : index
    %c0_51 = arith.constant 0 : index
    %63 = vector.load %arg18[%c0_49, %c0_50, %c0_51] : memref<4x32x32xf32, #tpu.memory_space<vmem>>, vector<1x32x32xf32>
    %64 = vector.shape_cast %63 : vector<1x32x32xf32> to vector<32x32xf32>
    %cst_52 = arith.constant dense<0.000000e+00> : vector<56x32xf32>
    %65 = tpu.matmul %62, %64, %cst_52 {dimension_numbers = #tpu.dot_dimension_numbers<[1], [0], [0], [1], [0, 0, 1, 1], [], []>} : vector<56x32xf32>, vector<32x32xf32>, vector<56x32xf32> -> vector<56x32xf32>
    %c0_53 = arith.constant 0 : index
    %c0_54 = arith.constant 0 : index
    %c0_55 = arith.constant 0 : index
    %66 = vector.load %arg19[%c0_53, %c0_54, %c0_55] : memref<4x1x32xf32, #tpu.memory_space<vmem>>, vector<1x1x32xf32>
    %67 = vector.shape_cast %66 : vector<1x1x32xf32> to vector<1x32xf32>
    %68 = vector.broadcast %67 : vector<1x32xf32> to vector<56x32xf32>
    %69 = arith.addf %65, %68 : vector<56x32xf32>
    %cst_56 = arith.constant 0.000000e+00 : f32
    %70 = vector.broadcast %cst_56 : f32 to vector<56x32xf32>
    %71 = arith.maximumf %69, %70 : vector<56x32xf32>
    %c0_57 = arith.constant 0 : index
    %c0_58 = arith.constant 0 : index
    %c0_59 = arith.constant 0 : index
    %72 = vector.load %arg20[%c0_57, %c0_58, %c0_59] : memref<4x1x32xf32, #tpu.memory_space<vmem>>, vector<1x1x32xf32>
    %73 = vector.shape_cast %72 : vector<1x1x32xf32> to vector<1x32xf32>
    %74 = vector.broadcast %73 : vector<1x32xf32> to vector<56x32xf32>
    %75 = arith.mulf %71, %74 : vector<56x32xf32>
    %cst_60 = arith.constant dense<0.000000e+00> : vector<56xf32>
    %76 = vector.multi_reduction <add>, %75, %cst_60 [1] : vector<56x32xf32> to vector<56xf32>
    %77 = vector.shape_cast %76 : vector<56xf32> to vector<56x1xf32>
    %78 = vector.broadcast %77 : vector<56x1xf32> to vector<56x3xf32>
    %79 = arith.mulf %28, %78 : vector<56x3xf32>
    %cst_61 = arith.constant dense<0.000000e+00> : vector<8x3xf32>
    %80 = tpu.matmul %11, %79, %cst_61 {dimension_numbers = #tpu.dot_dimension_numbers<[0], [0], [1], [1], [0, 1, 1, 1], [], []>} : vector<56x8xf32>, vector<56x3xf32>, vector<8x3xf32> -> vector<8x3xf32>
    %81 = arith.addf %3, %80 : vector<8x3xf32>
    %cst_62 = arith.constant dense<0.000000e+00> : vector<8x32xf32>
    %82 = tpu.matmul %0, %62, %cst_62 {dimension_numbers = #tpu.dot_dimension_numbers<[0], [0], [1], [1], [0, 1, 1, 1], [], []>} : vector<56x8xf32>, vector<56x32xf32>, vector<8x32xf32> -> vector<8x32xf32>
    %c0_63 = arith.constant 0 : index
    %c0_64 = arith.constant 0 : index
    %c0_65 = arith.constant 0 : index
    %83 = vector.load %arg21[%c0_63, %c0_64, %c0_65] : memref<4x32x32xf32, #tpu.memory_space<vmem>>, vector<1x32x32xf32>
    %84 = vector.shape_cast %83 : vector<1x32x32xf32> to vector<32x32xf32>
    %cst_66 = arith.constant dense<0.000000e+00> : vector<8x32xf32>
    %85 = tpu.matmul %17, %84, %cst_66 {dimension_numbers = #tpu.dot_dimension_numbers<[1], [0], [0], [1], [0, 0, 1, 1], [], []>} : vector<8x32xf32>, vector<32x32xf32>, vector<8x32xf32> -> vector<8x32xf32>
    %c0_67 = arith.constant 0 : index
    %c0_68 = arith.constant 0 : index
    %c0_69 = arith.constant 0 : index
    %86 = vector.load %arg22[%c0_67, %c0_68, %c0_69] : memref<4x32x32xf32, #tpu.memory_space<vmem>>, vector<1x32x32xf32>
    %87 = vector.shape_cast %86 : vector<1x32x32xf32> to vector<32x32xf32>
    %cst_70 = arith.constant dense<0.000000e+00> : vector<8x32xf32>
    %88 = tpu.matmul %82, %87, %cst_70 {dimension_numbers = #tpu.dot_dimension_numbers<[1], [0], [0], [1], [0, 0, 1, 1], [], []>} : vector<8x32xf32>, vector<32x32xf32>, vector<8x32xf32> -> vector<8x32xf32>
    %89 = arith.addf %85, %88 : vector<8x32xf32>
    %c0_71 = arith.constant 0 : index
    %c0_72 = arith.constant 0 : index
    %c0_73 = arith.constant 0 : index
    %90 = vector.load %arg23[%c0_71, %c0_72, %c0_73] : memref<4x1x32xf32, #tpu.memory_space<vmem>>, vector<1x1x32xf32>
    %91 = vector.shape_cast %90 : vector<1x1x32xf32> to vector<1x32xf32>
    %92 = vector.broadcast %91 : vector<1x32xf32> to vector<8x32xf32>
    %93 = arith.addf %89, %92 : vector<8x32xf32>
    %cst_74 = arith.constant 0.000000e+00 : f32
    %94 = vector.broadcast %cst_74 : f32 to vector<8x32xf32>
    %95 = arith.maximumf %93, %94 : vector<8x32xf32>
    %c0_75 = arith.constant 0 : index
    %c0_76 = arith.constant 0 : index
    %c0_77 = arith.constant 0 : index
    %96 = vector.load %arg24[%c0_75, %c0_76, %c0_77] : memref<4x32x32xf32, #tpu.memory_space<vmem>>, vector<1x32x32xf32>
    %97 = vector.shape_cast %96 : vector<1x32x32xf32> to vector<32x32xf32>
    %cst_78 = arith.constant dense<0.000000e+00> : vector<8x32xf32>
    %98 = tpu.matmul %95, %97, %cst_78 {dimension_numbers = #tpu.dot_dimension_numbers<[1], [0], [0], [1], [0, 0, 1, 1], [], []>} : vector<8x32xf32>, vector<32x32xf32>, vector<8x32xf32> -> vector<8x32xf32>
    %99 = arith.addf %17, %98 : vector<8x32xf32>
    %c0_79 = arith.constant 0 : index
    %c0_80 = arith.constant 0 : index
    %c0_81 = arith.constant 0 : index
    %100 = vector.load %arg25[%c0_79, %c0_80, %c0_81] : memref<4x1x32xf32, #tpu.memory_space<vmem>>, vector<1x1x32xf32>
    %101 = vector.shape_cast %100 : vector<1x1x32xf32> to vector<1x32xf32>
    %102 = vector.broadcast %101 : vector<1x32xf32> to vector<8x32xf32>
    %103 = arith.addf %99, %102 : vector<8x32xf32>
    %cst_82 = arith.constant dense<0.000000e+00> : vector<56x3xf32>
    %104 = tpu.matmul %0, %81, %cst_82 {dimension_numbers = #tpu.dot_dimension_numbers<[1], [0], [0], [1], [0, 0, 1, 1], [], []>} : vector<56x8xf32>, vector<8x3xf32>, vector<56x3xf32> -> vector<56x3xf32>
    %cst_83 = arith.constant dense<0.000000e+00> : vector<56x3xf32>
    %105 = tpu.matmul %1, %81, %cst_83 {dimension_numbers = #tpu.dot_dimension_numbers<[1], [0], [0], [1], [0, 0, 1, 1], [], []>} : vector<56x8xf32>, vector<8x3xf32>, vector<56x3xf32> -> vector<56x3xf32>
    %106 = arith.subf %104, %105 : vector<56x3xf32>
    %107 = arith.mulf %106, %106 : vector<56x3xf32>
    %cst_84 = arith.constant dense<0.000000e+00> : vector<56xf32>
    %108 = vector.multi_reduction <add>, %107, %cst_84 [1] : vector<56x3xf32> to vector<56xf32>
    %109 = vector.shape_cast %108 : vector<56xf32> to vector<56x1xf32>
    %110 = math.sqrt %109 : vector<56x1xf32>
    %cst_85 = arith.constant 9.99999993E-9 : f32
    %111 = vector.broadcast %cst_85 : f32 to vector<56x1xf32>
    %112 = arith.addf %110, %111 : vector<56x1xf32>
    %113 = vector.broadcast %112 : vector<56x1xf32> to vector<56x3xf32>
    %114 = arith.divf %106, %113 : vector<56x3xf32>
    %cst_86 = arith.constant dense<0.000000e+00> : vector<56x32xf32>
    %115 = tpu.matmul %0, %103, %cst_86 {dimension_numbers = #tpu.dot_dimension_numbers<[1], [0], [0], [1], [0, 0, 1, 1], [], []>} : vector<56x8xf32>, vector<8x32xf32>, vector<56x32xf32> -> vector<56x32xf32>
    %cst_87 = arith.constant dense<0.000000e+00> : vector<56x32xf32>
    %116 = tpu.matmul %1, %103, %cst_87 {dimension_numbers = #tpu.dot_dimension_numbers<[1], [0], [0], [1], [0, 0, 1, 1], [], []>} : vector<56x8xf32>, vector<8x32xf32>, vector<56x32xf32> -> vector<56x32xf32>
    %c1 = arith.constant 1 : index
    %c0_88 = arith.constant 0 : index
    %c0_89 = arith.constant 0 : index
    %117 = vector.load %arg11[%c1, %c0_88, %c0_89] : memref<4x32x32xf32, #tpu.memory_space<vmem>>, vector<1x32x32xf32>
    %118 = vector.shape_cast %117 : vector<1x32x32xf32> to vector<32x32xf32>
    %cst_90 = arith.constant dense<0.000000e+00> : vector<56x32xf32>
    %119 = tpu.matmul %115, %118, %cst_90 {dimension_numbers = #tpu.dot_dimension_numbers<[1], [0], [0], [1], [0, 0, 1, 1], [], []>} : vector<56x32xf32>, vector<32x32xf32>, vector<56x32xf32> -> vector<56x32xf32>
    %c1_91 = arith.constant 1 : index
    %c0_92 = arith.constant 0 : index
    %c0_93 = arith.constant 0 : index
    %120 = vector.load %arg12[%c1_91, %c0_92, %c0_93] : memref<4x32x32xf32, #tpu.memory_space<vmem>>, vector<1x32x32xf32>
    %121 = vector.shape_cast %120 : vector<1x32x32xf32> to vector<32x32xf32>
    %cst_94 = arith.constant dense<0.000000e+00> : vector<56x32xf32>
    %122 = tpu.matmul %116, %121, %cst_94 {dimension_numbers = #tpu.dot_dimension_numbers<[1], [0], [0], [1], [0, 0, 1, 1], [], []>} : vector<56x32xf32>, vector<32x32xf32>, vector<56x32xf32> -> vector<56x32xf32>
    %123 = arith.addf %119, %122 : vector<56x32xf32>
    %c1_95 = arith.constant 1 : index
    %c0_96 = arith.constant 0 : index
    %c0_97 = arith.constant 0 : index
    %124 = vector.load %arg13[%c1_95, %c0_96, %c0_97] : memref<4x1x32xf32, #tpu.memory_space<vmem>>, vector<1x1x32xf32>
    %125 = vector.shape_cast %124 : vector<1x1x32xf32> to vector<1x32xf32>
    %126 = vector.broadcast %109 : vector<56x1xf32> to vector<56x32xf32>
    %127 = vector.broadcast %125 : vector<1x32xf32> to vector<56x32xf32>
    %128 = arith.mulf %126, %127 : vector<56x32xf32>
    %129 = arith.addf %123, %128 : vector<56x32xf32>
    %c1_98 = arith.constant 1 : index
    %c0_99 = arith.constant 0 : index
    %c0_100 = arith.constant 0 : index
    %130 = vector.load %arg14[%c1_98, %c0_99, %c0_100] : memref<4x2x32xf32, #tpu.memory_space<vmem>>, vector<1x2x32xf32>
    %131 = vector.shape_cast %130 : vector<1x2x32xf32> to vector<2x32xf32>
    %cst_101 = arith.constant dense<0.000000e+00> : vector<56x32xf32>
    %132 = tpu.matmul %2, %131, %cst_101 {dimension_numbers = #tpu.dot_dimension_numbers<[1], [0], [0], [1], [0, 0, 1, 1], [], []>} : vector<56x2xf32>, vector<2x32xf32>, vector<56x32xf32> -> vector<56x32xf32>
    %133 = arith.addf %129, %132 : vector<56x32xf32>
    %c1_102 = arith.constant 1 : index
    %c0_103 = arith.constant 0 : index
    %c0_104 = arith.constant 0 : index
    %134 = vector.load %arg15[%c1_102, %c0_103, %c0_104] : memref<4x1x32xf32, #tpu.memory_space<vmem>>, vector<1x1x32xf32>
    %135 = vector.shape_cast %134 : vector<1x1x32xf32> to vector<1x32xf32>
    %136 = vector.broadcast %135 : vector<1x32xf32> to vector<56x32xf32>
    %137 = arith.addf %133, %136 : vector<56x32xf32>
    %cst_105 = arith.constant 0.000000e+00 : f32
    %138 = vector.broadcast %cst_105 : f32 to vector<56x32xf32>
    %139 = arith.maximumf %137, %138 : vector<56x32xf32>
    %c1_106 = arith.constant 1 : index
    %c0_107 = arith.constant 0 : index
    %c0_108 = arith.constant 0 : index
    %140 = vector.load %arg16[%c1_106, %c0_107, %c0_108] : memref<4x32x32xf32, #tpu.memory_space<vmem>>, vector<1x32x32xf32>
    %141 = vector.shape_cast %140 : vector<1x32x32xf32> to vector<32x32xf32>
    %cst_109 = arith.constant dense<0.000000e+00> : vector<56x32xf32>
    %142 = tpu.matmul %139, %141, %cst_109 {dimension_numbers = #tpu.dot_dimension_numbers<[1], [0], [0], [1], [0, 0, 1, 1], [], []>} : vector<56x32xf32>, vector<32x32xf32>, vector<56x32xf32> -> vector<56x32xf32>
    %c1_110 = arith.constant 1 : index
    %c0_111 = arith.constant 0 : index
    %c0_112 = arith.constant 0 : index
    %143 = vector.load %arg17[%c1_110, %c0_111, %c0_112] : memref<4x1x32xf32, #tpu.memory_space<vmem>>, vector<1x1x32xf32>
    %144 = vector.shape_cast %143 : vector<1x1x32xf32> to vector<1x32xf32>
    %145 = vector.broadcast %144 : vector<1x32xf32> to vector<56x32xf32>
    %146 = arith.addf %142, %145 : vector<56x32xf32>
    %cst_113 = arith.constant 0.000000e+00 : f32
    %147 = vector.broadcast %cst_113 : f32 to vector<56x32xf32>
    %148 = arith.maximumf %146, %147 : vector<56x32xf32>
    %c1_114 = arith.constant 1 : index
    %c0_115 = arith.constant 0 : index
    %c0_116 = arith.constant 0 : index
    %149 = vector.load %arg18[%c1_114, %c0_115, %c0_116] : memref<4x32x32xf32, #tpu.memory_space<vmem>>, vector<1x32x32xf32>
    %150 = vector.shape_cast %149 : vector<1x32x32xf32> to vector<32x32xf32>
    %cst_117 = arith.constant dense<0.000000e+00> : vector<56x32xf32>
    %151 = tpu.matmul %148, %150, %cst_117 {dimension_numbers = #tpu.dot_dimension_numbers<[1], [0], [0], [1], [0, 0, 1, 1], [], []>} : vector<56x32xf32>, vector<32x32xf32>, vector<56x32xf32> -> vector<56x32xf32>
    %c1_118 = arith.constant 1 : index
    %c0_119 = arith.constant 0 : index
    %c0_120 = arith.constant 0 : index
    %152 = vector.load %arg19[%c1_118, %c0_119, %c0_120] : memref<4x1x32xf32, #tpu.memory_space<vmem>>, vector<1x1x32xf32>
    %153 = vector.shape_cast %152 : vector<1x1x32xf32> to vector<1x32xf32>
    %154 = vector.broadcast %153 : vector<1x32xf32> to vector<56x32xf32>
    %155 = arith.addf %151, %154 : vector<56x32xf32>
    %cst_121 = arith.constant 0.000000e+00 : f32
    %156 = vector.broadcast %cst_121 : f32 to vector<56x32xf32>
    %157 = arith.maximumf %155, %156 : vector<56x32xf32>
    %c1_122 = arith.constant 1 : index
    %c0_123 = arith.constant 0 : index
    %c0_124 = arith.constant 0 : index
    %158 = vector.load %arg20[%c1_122, %c0_123, %c0_124] : memref<4x1x32xf32, #tpu.memory_space<vmem>>, vector<1x1x32xf32>
    %159 = vector.shape_cast %158 : vector<1x1x32xf32> to vector<1x32xf32>
    %160 = vector.broadcast %159 : vector<1x32xf32> to vector<56x32xf32>
    %161 = arith.mulf %157, %160 : vector<56x32xf32>
    %cst_125 = arith.constant dense<0.000000e+00> : vector<56xf32>
    %162 = vector.multi_reduction <add>, %161, %cst_125 [1] : vector<56x32xf32> to vector<56xf32>
    %163 = vector.shape_cast %162 : vector<56xf32> to vector<56x1xf32>
    %164 = vector.broadcast %163 : vector<56x1xf32> to vector<56x3xf32>
    %165 = arith.mulf %114, %164 : vector<56x3xf32>
    %cst_126 = arith.constant dense<0.000000e+00> : vector<8x3xf32>
    %166 = tpu.matmul %11, %165, %cst_126 {dimension_numbers = #tpu.dot_dimension_numbers<[0], [0], [1], [1], [0, 1, 1, 1], [], []>} : vector<56x8xf32>, vector<56x3xf32>, vector<8x3xf32> -> vector<8x3xf32>
    %167 = arith.addf %81, %166 : vector<8x3xf32>
    %cst_127 = arith.constant dense<0.000000e+00> : vector<8x32xf32>
    %168 = tpu.matmul %0, %148, %cst_127 {dimension_numbers = #tpu.dot_dimension_numbers<[0], [0], [1], [1], [0, 1, 1, 1], [], []>} : vector<56x8xf32>, vector<56x32xf32>, vector<8x32xf32> -> vector<8x32xf32>
    %c1_128 = arith.constant 1 : index
    %c0_129 = arith.constant 0 : index
    %c0_130 = arith.constant 0 : index
    %169 = vector.load %arg21[%c1_128, %c0_129, %c0_130] : memref<4x32x32xf32, #tpu.memory_space<vmem>>, vector<1x32x32xf32>
    %170 = vector.shape_cast %169 : vector<1x32x32xf32> to vector<32x32xf32>
    %cst_131 = arith.constant dense<0.000000e+00> : vector<8x32xf32>
    %171 = tpu.matmul %103, %170, %cst_131 {dimension_numbers = #tpu.dot_dimension_numbers<[1], [0], [0], [1], [0, 0, 1, 1], [], []>} : vector<8x32xf32>, vector<32x32xf32>, vector<8x32xf32> -> vector<8x32xf32>
    %c1_132 = arith.constant 1 : index
    %c0_133 = arith.constant 0 : index
    %c0_134 = arith.constant 0 : index
    %172 = vector.load %arg22[%c1_132, %c0_133, %c0_134] : memref<4x32x32xf32, #tpu.memory_space<vmem>>, vector<1x32x32xf32>
    %173 = vector.shape_cast %172 : vector<1x32x32xf32> to vector<32x32xf32>
    %cst_135 = arith.constant dense<0.000000e+00> : vector<8x32xf32>
    %174 = tpu.matmul %168, %173, %cst_135 {dimension_numbers = #tpu.dot_dimension_numbers<[1], [0], [0], [1], [0, 0, 1, 1], [], []>} : vector<8x32xf32>, vector<32x32xf32>, vector<8x32xf32> -> vector<8x32xf32>
    %175 = arith.addf %171, %174 : vector<8x32xf32>
    %c1_136 = arith.constant 1 : index
    %c0_137 = arith.constant 0 : index
    %c0_138 = arith.constant 0 : index
    %176 = vector.load %arg23[%c1_136, %c0_137, %c0_138] : memref<4x1x32xf32, #tpu.memory_space<vmem>>, vector<1x1x32xf32>
    %177 = vector.shape_cast %176 : vector<1x1x32xf32> to vector<1x32xf32>
    %178 = vector.broadcast %177 : vector<1x32xf32> to vector<8x32xf32>
    %179 = arith.addf %175, %178 : vector<8x32xf32>
    %cst_139 = arith.constant 0.000000e+00 : f32
    %180 = vector.broadcast %cst_139 : f32 to vector<8x32xf32>
    %181 = arith.maximumf %179, %180 : vector<8x32xf32>
    %c1_140 = arith.constant 1 : index
    %c0_141 = arith.constant 0 : index
    %c0_142 = arith.constant 0 : index
    %182 = vector.load %arg24[%c1_140, %c0_141, %c0_142] : memref<4x32x32xf32, #tpu.memory_space<vmem>>, vector<1x32x32xf32>
    %183 = vector.shape_cast %182 : vector<1x32x32xf32> to vector<32x32xf32>
    %cst_143 = arith.constant dense<0.000000e+00> : vector<8x32xf32>
    %184 = tpu.matmul %181, %183, %cst_143 {dimension_numbers = #tpu.dot_dimension_numbers<[1], [0], [0], [1], [0, 0, 1, 1], [], []>} : vector<8x32xf32>, vector<32x32xf32>, vector<8x32xf32> -> vector<8x32xf32>
    %185 = arith.addf %103, %184 : vector<8x32xf32>
    %c1_144 = arith.constant 1 : index
    %c0_145 = arith.constant 0 : index
    %c0_146 = arith.constant 0 : index
    %186 = vector.load %arg25[%c1_144, %c0_145, %c0_146] : memref<4x1x32xf32, #tpu.memory_space<vmem>>, vector<1x1x32xf32>
    %187 = vector.shape_cast %186 : vector<1x1x32xf32> to vector<1x32xf32>
    %188 = vector.broadcast %187 : vector<1x32xf32> to vector<8x32xf32>
    %189 = arith.addf %185, %188 : vector<8x32xf32>
    %cst_147 = arith.constant dense<0.000000e+00> : vector<56x3xf32>
    %190 = tpu.matmul %0, %167, %cst_147 {dimension_numbers = #tpu.dot_dimension_numbers<[1], [0], [0], [1], [0, 0, 1, 1], [], []>} : vector<56x8xf32>, vector<8x3xf32>, vector<56x3xf32> -> vector<56x3xf32>
    %cst_148 = arith.constant dense<0.000000e+00> : vector<56x3xf32>
    %191 = tpu.matmul %1, %167, %cst_148 {dimension_numbers = #tpu.dot_dimension_numbers<[1], [0], [0], [1], [0, 0, 1, 1], [], []>} : vector<56x8xf32>, vector<8x3xf32>, vector<56x3xf32> -> vector<56x3xf32>
    %192 = arith.subf %190, %191 : vector<56x3xf32>
    %193 = arith.mulf %192, %192 : vector<56x3xf32>
    %cst_149 = arith.constant dense<0.000000e+00> : vector<56xf32>
    %194 = vector.multi_reduction <add>, %193, %cst_149 [1] : vector<56x3xf32> to vector<56xf32>
    %195 = vector.shape_cast %194 : vector<56xf32> to vector<56x1xf32>
    %196 = math.sqrt %195 : vector<56x1xf32>
    %cst_150 = arith.constant 9.99999993E-9 : f32
    %197 = vector.broadcast %cst_150 : f32 to vector<56x1xf32>
    %198 = arith.addf %196, %197 : vector<56x1xf32>
    %199 = vector.broadcast %198 : vector<56x1xf32> to vector<56x3xf32>
    %200 = arith.divf %192, %199 : vector<56x3xf32>
    %cst_151 = arith.constant dense<0.000000e+00> : vector<56x32xf32>
    %201 = tpu.matmul %0, %189, %cst_151 {dimension_numbers = #tpu.dot_dimension_numbers<[1], [0], [0], [1], [0, 0, 1, 1], [], []>} : vector<56x8xf32>, vector<8x32xf32>, vector<56x32xf32> -> vector<56x32xf32>
    %cst_152 = arith.constant dense<0.000000e+00> : vector<56x32xf32>
    %202 = tpu.matmul %1, %189, %cst_152 {dimension_numbers = #tpu.dot_dimension_numbers<[1], [0], [0], [1], [0, 0, 1, 1], [], []>} : vector<56x8xf32>, vector<8x32xf32>, vector<56x32xf32> -> vector<56x32xf32>
    %c2 = arith.constant 2 : index
    %c0_153 = arith.constant 0 : index
    %c0_154 = arith.constant 0 : index
    %203 = vector.load %arg11[%c2, %c0_153, %c0_154] : memref<4x32x32xf32, #tpu.memory_space<vmem>>, vector<1x32x32xf32>
    %204 = vector.shape_cast %203 : vector<1x32x32xf32> to vector<32x32xf32>
    %cst_155 = arith.constant dense<0.000000e+00> : vector<56x32xf32>
    %205 = tpu.matmul %201, %204, %cst_155 {dimension_numbers = #tpu.dot_dimension_numbers<[1], [0], [0], [1], [0, 0, 1, 1], [], []>} : vector<56x32xf32>, vector<32x32xf32>, vector<56x32xf32> -> vector<56x32xf32>
    %c2_156 = arith.constant 2 : index
    %c0_157 = arith.constant 0 : index
    %c0_158 = arith.constant 0 : index
    %206 = vector.load %arg12[%c2_156, %c0_157, %c0_158] : memref<4x32x32xf32, #tpu.memory_space<vmem>>, vector<1x32x32xf32>
    %207 = vector.shape_cast %206 : vector<1x32x32xf32> to vector<32x32xf32>
    %cst_159 = arith.constant dense<0.000000e+00> : vector<56x32xf32>
    %208 = tpu.matmul %202, %207, %cst_159 {dimension_numbers = #tpu.dot_dimension_numbers<[1], [0], [0], [1], [0, 0, 1, 1], [], []>} : vector<56x32xf32>, vector<32x32xf32>, vector<56x32xf32> -> vector<56x32xf32>
    %209 = arith.addf %205, %208 : vector<56x32xf32>
    %c2_160 = arith.constant 2 : index
    %c0_161 = arith.constant 0 : index
    %c0_162 = arith.constant 0 : index
    %210 = vector.load %arg13[%c2_160, %c0_161, %c0_162] : memref<4x1x32xf32, #tpu.memory_space<vmem>>, vector<1x1x32xf32>
    %211 = vector.shape_cast %210 : vector<1x1x32xf32> to vector<1x32xf32>
    %212 = vector.broadcast %195 : vector<56x1xf32> to vector<56x32xf32>
    %213 = vector.broadcast %211 : vector<1x32xf32> to vector<56x32xf32>
    %214 = arith.mulf %212, %213 : vector<56x32xf32>
    %215 = arith.addf %209, %214 : vector<56x32xf32>
    %c2_163 = arith.constant 2 : index
    %c0_164 = arith.constant 0 : index
    %c0_165 = arith.constant 0 : index
    %216 = vector.load %arg14[%c2_163, %c0_164, %c0_165] : memref<4x2x32xf32, #tpu.memory_space<vmem>>, vector<1x2x32xf32>
    %217 = vector.shape_cast %216 : vector<1x2x32xf32> to vector<2x32xf32>
    %cst_166 = arith.constant dense<0.000000e+00> : vector<56x32xf32>
    %218 = tpu.matmul %2, %217, %cst_166 {dimension_numbers = #tpu.dot_dimension_numbers<[1], [0], [0], [1], [0, 0, 1, 1], [], []>} : vector<56x2xf32>, vector<2x32xf32>, vector<56x32xf32> -> vector<56x32xf32>
    %219 = arith.addf %215, %218 : vector<56x32xf32>
    %c2_167 = arith.constant 2 : index
    %c0_168 = arith.constant 0 : index
    %c0_169 = arith.constant 0 : index
    %220 = vector.load %arg15[%c2_167, %c0_168, %c0_169] : memref<4x1x32xf32, #tpu.memory_space<vmem>>, vector<1x1x32xf32>
    %221 = vector.shape_cast %220 : vector<1x1x32xf32> to vector<1x32xf32>
    %222 = vector.broadcast %221 : vector<1x32xf32> to vector<56x32xf32>
    %223 = arith.addf %219, %222 : vector<56x32xf32>
    %cst_170 = arith.constant 0.000000e+00 : f32
    %224 = vector.broadcast %cst_170 : f32 to vector<56x32xf32>
    %225 = arith.maximumf %223, %224 : vector<56x32xf32>
    %c2_171 = arith.constant 2 : index
    %c0_172 = arith.constant 0 : index
    %c0_173 = arith.constant 0 : index
    %226 = vector.load %arg16[%c2_171, %c0_172, %c0_173] : memref<4x32x32xf32, #tpu.memory_space<vmem>>, vector<1x32x32xf32>
    %227 = vector.shape_cast %226 : vector<1x32x32xf32> to vector<32x32xf32>
    %cst_174 = arith.constant dense<0.000000e+00> : vector<56x32xf32>
    %228 = tpu.matmul %225, %227, %cst_174 {dimension_numbers = #tpu.dot_dimension_numbers<[1], [0], [0], [1], [0, 0, 1, 1], [], []>} : vector<56x32xf32>, vector<32x32xf32>, vector<56x32xf32> -> vector<56x32xf32>
    %c2_175 = arith.constant 2 : index
    %c0_176 = arith.constant 0 : index
    %c0_177 = arith.constant 0 : index
    %229 = vector.load %arg17[%c2_175, %c0_176, %c0_177] : memref<4x1x32xf32, #tpu.memory_space<vmem>>, vector<1x1x32xf32>
    %230 = vector.shape_cast %229 : vector<1x1x32xf32> to vector<1x32xf32>
    %231 = vector.broadcast %230 : vector<1x32xf32> to vector<56x32xf32>
    %232 = arith.addf %228, %231 : vector<56x32xf32>
    %cst_178 = arith.constant 0.000000e+00 : f32
    %233 = vector.broadcast %cst_178 : f32 to vector<56x32xf32>
    %234 = arith.maximumf %232, %233 : vector<56x32xf32>
    %c2_179 = arith.constant 2 : index
    %c0_180 = arith.constant 0 : index
    %c0_181 = arith.constant 0 : index
    %235 = vector.load %arg18[%c2_179, %c0_180, %c0_181] : memref<4x32x32xf32, #tpu.memory_space<vmem>>, vector<1x32x32xf32>
    %236 = vector.shape_cast %235 : vector<1x32x32xf32> to vector<32x32xf32>
    %cst_182 = arith.constant dense<0.000000e+00> : vector<56x32xf32>
    %237 = tpu.matmul %234, %236, %cst_182 {dimension_numbers = #tpu.dot_dimension_numbers<[1], [0], [0], [1], [0, 0, 1, 1], [], []>} : vector<56x32xf32>, vector<32x32xf32>, vector<56x32xf32> -> vector<56x32xf32>
    %c2_183 = arith.constant 2 : index
    %c0_184 = arith.constant 0 : index
    %c0_185 = arith.constant 0 : index
    %238 = vector.load %arg19[%c2_183, %c0_184, %c0_185] : memref<4x1x32xf32, #tpu.memory_space<vmem>>, vector<1x1x32xf32>
    %239 = vector.shape_cast %238 : vector<1x1x32xf32> to vector<1x32xf32>
    %240 = vector.broadcast %239 : vector<1x32xf32> to vector<56x32xf32>
    %241 = arith.addf %237, %240 : vector<56x32xf32>
    %cst_186 = arith.constant 0.000000e+00 : f32
    %242 = vector.broadcast %cst_186 : f32 to vector<56x32xf32>
    %243 = arith.maximumf %241, %242 : vector<56x32xf32>
    %c2_187 = arith.constant 2 : index
    %c0_188 = arith.constant 0 : index
    %c0_189 = arith.constant 0 : index
    %244 = vector.load %arg20[%c2_187, %c0_188, %c0_189] : memref<4x1x32xf32, #tpu.memory_space<vmem>>, vector<1x1x32xf32>
    %245 = vector.shape_cast %244 : vector<1x1x32xf32> to vector<1x32xf32>
    %246 = vector.broadcast %245 : vector<1x32xf32> to vector<56x32xf32>
    %247 = arith.mulf %243, %246 : vector<56x32xf32>
    %cst_190 = arith.constant dense<0.000000e+00> : vector<56xf32>
    %248 = vector.multi_reduction <add>, %247, %cst_190 [1] : vector<56x32xf32> to vector<56xf32>
    %249 = vector.shape_cast %248 : vector<56xf32> to vector<56x1xf32>
    %250 = vector.broadcast %249 : vector<56x1xf32> to vector<56x3xf32>
    %251 = arith.mulf %200, %250 : vector<56x3xf32>
    %cst_191 = arith.constant dense<0.000000e+00> : vector<8x3xf32>
    %252 = tpu.matmul %11, %251, %cst_191 {dimension_numbers = #tpu.dot_dimension_numbers<[0], [0], [1], [1], [0, 1, 1, 1], [], []>} : vector<56x8xf32>, vector<56x3xf32>, vector<8x3xf32> -> vector<8x3xf32>
    %253 = arith.addf %167, %252 : vector<8x3xf32>
    %cst_192 = arith.constant dense<0.000000e+00> : vector<8x32xf32>
    %254 = tpu.matmul %0, %234, %cst_192 {dimension_numbers = #tpu.dot_dimension_numbers<[0], [0], [1], [1], [0, 1, 1, 1], [], []>} : vector<56x8xf32>, vector<56x32xf32>, vector<8x32xf32> -> vector<8x32xf32>
    %c2_193 = arith.constant 2 : index
    %c0_194 = arith.constant 0 : index
    %c0_195 = arith.constant 0 : index
    %255 = vector.load %arg21[%c2_193, %c0_194, %c0_195] : memref<4x32x32xf32, #tpu.memory_space<vmem>>, vector<1x32x32xf32>
    %256 = vector.shape_cast %255 : vector<1x32x32xf32> to vector<32x32xf32>
    %cst_196 = arith.constant dense<0.000000e+00> : vector<8x32xf32>
    %257 = tpu.matmul %189, %256, %cst_196 {dimension_numbers = #tpu.dot_dimension_numbers<[1], [0], [0], [1], [0, 0, 1, 1], [], []>} : vector<8x32xf32>, vector<32x32xf32>, vector<8x32xf32> -> vector<8x32xf32>
    %c2_197 = arith.constant 2 : index
    %c0_198 = arith.constant 0 : index
    %c0_199 = arith.constant 0 : index
    %258 = vector.load %arg22[%c2_197, %c0_198, %c0_199] : memref<4x32x32xf32, #tpu.memory_space<vmem>>, vector<1x32x32xf32>
    %259 = vector.shape_cast %258 : vector<1x32x32xf32> to vector<32x32xf32>
    %cst_200 = arith.constant dense<0.000000e+00> : vector<8x32xf32>
    %260 = tpu.matmul %254, %259, %cst_200 {dimension_numbers = #tpu.dot_dimension_numbers<[1], [0], [0], [1], [0, 0, 1, 1], [], []>} : vector<8x32xf32>, vector<32x32xf32>, vector<8x32xf32> -> vector<8x32xf32>
    %261 = arith.addf %257, %260 : vector<8x32xf32>
    %c2_201 = arith.constant 2 : index
    %c0_202 = arith.constant 0 : index
    %c0_203 = arith.constant 0 : index
    %262 = vector.load %arg23[%c2_201, %c0_202, %c0_203] : memref<4x1x32xf32, #tpu.memory_space<vmem>>, vector<1x1x32xf32>
    %263 = vector.shape_cast %262 : vector<1x1x32xf32> to vector<1x32xf32>
    %264 = vector.broadcast %263 : vector<1x32xf32> to vector<8x32xf32>
    %265 = arith.addf %261, %264 : vector<8x32xf32>
    %cst_204 = arith.constant 0.000000e+00 : f32
    %266 = vector.broadcast %cst_204 : f32 to vector<8x32xf32>
    %267 = arith.maximumf %265, %266 : vector<8x32xf32>
    %c2_205 = arith.constant 2 : index
    %c0_206 = arith.constant 0 : index
    %c0_207 = arith.constant 0 : index
    %268 = vector.load %arg24[%c2_205, %c0_206, %c0_207] : memref<4x32x32xf32, #tpu.memory_space<vmem>>, vector<1x32x32xf32>
    %269 = vector.shape_cast %268 : vector<1x32x32xf32> to vector<32x32xf32>
    %cst_208 = arith.constant dense<0.000000e+00> : vector<8x32xf32>
    %270 = tpu.matmul %267, %269, %cst_208 {dimension_numbers = #tpu.dot_dimension_numbers<[1], [0], [0], [1], [0, 0, 1, 1], [], []>} : vector<8x32xf32>, vector<32x32xf32>, vector<8x32xf32> -> vector<8x32xf32>
    %271 = arith.addf %189, %270 : vector<8x32xf32>
    %c2_209 = arith.constant 2 : index
    %c0_210 = arith.constant 0 : index
    %c0_211 = arith.constant 0 : index
    %272 = vector.load %arg25[%c2_209, %c0_210, %c0_211] : memref<4x1x32xf32, #tpu.memory_space<vmem>>, vector<1x1x32xf32>
    %273 = vector.shape_cast %272 : vector<1x1x32xf32> to vector<1x32xf32>
    %274 = vector.broadcast %273 : vector<1x32xf32> to vector<8x32xf32>
    %275 = arith.addf %271, %274 : vector<8x32xf32>
    %cst_212 = arith.constant dense<0.000000e+00> : vector<56x3xf32>
    %276 = tpu.matmul %0, %253, %cst_212 {dimension_numbers = #tpu.dot_dimension_numbers<[1], [0], [0], [1], [0, 0, 1, 1], [], []>} : vector<56x8xf32>, vector<8x3xf32>, vector<56x3xf32> -> vector<56x3xf32>
    %cst_213 = arith.constant dense<0.000000e+00> : vector<56x3xf32>
    %277 = tpu.matmul %1, %253, %cst_213 {dimension_numbers = #tpu.dot_dimension_numbers<[1], [0], [0], [1], [0, 0, 1, 1], [], []>} : vector<56x8xf32>, vector<8x3xf32>, vector<56x3xf32> -> vector<56x3xf32>
    %278 = arith.subf %276, %277 : vector<56x3xf32>
    %279 = arith.mulf %278, %278 : vector<56x3xf32>
    %cst_214 = arith.constant dense<0.000000e+00> : vector<56xf32>
    %280 = vector.multi_reduction <add>, %279, %cst_214 [1] : vector<56x3xf32> to vector<56xf32>
    %281 = vector.shape_cast %280 : vector<56xf32> to vector<56x1xf32>
    %282 = math.sqrt %281 : vector<56x1xf32>
    %cst_215 = arith.constant 9.99999993E-9 : f32
    %283 = vector.broadcast %cst_215 : f32 to vector<56x1xf32>
    %284 = arith.addf %282, %283 : vector<56x1xf32>
    %285 = vector.broadcast %284 : vector<56x1xf32> to vector<56x3xf32>
    %286 = arith.divf %278, %285 : vector<56x3xf32>
    %cst_216 = arith.constant dense<0.000000e+00> : vector<56x32xf32>
    %287 = tpu.matmul %0, %275, %cst_216 {dimension_numbers = #tpu.dot_dimension_numbers<[1], [0], [0], [1], [0, 0, 1, 1], [], []>} : vector<56x8xf32>, vector<8x32xf32>, vector<56x32xf32> -> vector<56x32xf32>
    %cst_217 = arith.constant dense<0.000000e+00> : vector<56x32xf32>
    %288 = tpu.matmul %1, %275, %cst_217 {dimension_numbers = #tpu.dot_dimension_numbers<[1], [0], [0], [1], [0, 0, 1, 1], [], []>} : vector<56x8xf32>, vector<8x32xf32>, vector<56x32xf32> -> vector<56x32xf32>
    %c3 = arith.constant 3 : index
    %c0_218 = arith.constant 0 : index
    %c0_219 = arith.constant 0 : index
    %289 = vector.load %arg11[%c3, %c0_218, %c0_219] : memref<4x32x32xf32, #tpu.memory_space<vmem>>, vector<1x32x32xf32>
    %290 = vector.shape_cast %289 : vector<1x32x32xf32> to vector<32x32xf32>
    %cst_220 = arith.constant dense<0.000000e+00> : vector<56x32xf32>
    %291 = tpu.matmul %287, %290, %cst_220 {dimension_numbers = #tpu.dot_dimension_numbers<[1], [0], [0], [1], [0, 0, 1, 1], [], []>} : vector<56x32xf32>, vector<32x32xf32>, vector<56x32xf32> -> vector<56x32xf32>
    %c3_221 = arith.constant 3 : index
    %c0_222 = arith.constant 0 : index
    %c0_223 = arith.constant 0 : index
    %292 = vector.load %arg12[%c3_221, %c0_222, %c0_223] : memref<4x32x32xf32, #tpu.memory_space<vmem>>, vector<1x32x32xf32>
    %293 = vector.shape_cast %292 : vector<1x32x32xf32> to vector<32x32xf32>
    %cst_224 = arith.constant dense<0.000000e+00> : vector<56x32xf32>
    %294 = tpu.matmul %288, %293, %cst_224 {dimension_numbers = #tpu.dot_dimension_numbers<[1], [0], [0], [1], [0, 0, 1, 1], [], []>} : vector<56x32xf32>, vector<32x32xf32>, vector<56x32xf32> -> vector<56x32xf32>
    %295 = arith.addf %291, %294 : vector<56x32xf32>
    %c3_225 = arith.constant 3 : index
    %c0_226 = arith.constant 0 : index
    %c0_227 = arith.constant 0 : index
    %296 = vector.load %arg13[%c3_225, %c0_226, %c0_227] : memref<4x1x32xf32, #tpu.memory_space<vmem>>, vector<1x1x32xf32>
    %297 = vector.shape_cast %296 : vector<1x1x32xf32> to vector<1x32xf32>
    %298 = vector.broadcast %281 : vector<56x1xf32> to vector<56x32xf32>
    %299 = vector.broadcast %297 : vector<1x32xf32> to vector<56x32xf32>
    %300 = arith.mulf %298, %299 : vector<56x32xf32>
    %301 = arith.addf %295, %300 : vector<56x32xf32>
    %c3_228 = arith.constant 3 : index
    %c0_229 = arith.constant 0 : index
    %c0_230 = arith.constant 0 : index
    %302 = vector.load %arg14[%c3_228, %c0_229, %c0_230] : memref<4x2x32xf32, #tpu.memory_space<vmem>>, vector<1x2x32xf32>
    %303 = vector.shape_cast %302 : vector<1x2x32xf32> to vector<2x32xf32>
    %cst_231 = arith.constant dense<0.000000e+00> : vector<56x32xf32>
    %304 = tpu.matmul %2, %303, %cst_231 {dimension_numbers = #tpu.dot_dimension_numbers<[1], [0], [0], [1], [0, 0, 1, 1], [], []>} : vector<56x2xf32>, vector<2x32xf32>, vector<56x32xf32> -> vector<56x32xf32>
    %305 = arith.addf %301, %304 : vector<56x32xf32>
    %c3_232 = arith.constant 3 : index
    %c0_233 = arith.constant 0 : index
    %c0_234 = arith.constant 0 : index
    %306 = vector.load %arg15[%c3_232, %c0_233, %c0_234] : memref<4x1x32xf32, #tpu.memory_space<vmem>>, vector<1x1x32xf32>
    %307 = vector.shape_cast %306 : vector<1x1x32xf32> to vector<1x32xf32>
    %308 = vector.broadcast %307 : vector<1x32xf32> to vector<56x32xf32>
    %309 = arith.addf %305, %308 : vector<56x32xf32>
    %cst_235 = arith.constant 0.000000e+00 : f32
    %310 = vector.broadcast %cst_235 : f32 to vector<56x32xf32>
    %311 = arith.maximumf %309, %310 : vector<56x32xf32>
    %c3_236 = arith.constant 3 : index
    %c0_237 = arith.constant 0 : index
    %c0_238 = arith.constant 0 : index
    %312 = vector.load %arg16[%c3_236, %c0_237, %c0_238] : memref<4x32x32xf32, #tpu.memory_space<vmem>>, vector<1x32x32xf32>
    %313 = vector.shape_cast %312 : vector<1x32x32xf32> to vector<32x32xf32>
    %cst_239 = arith.constant dense<0.000000e+00> : vector<56x32xf32>
    %314 = tpu.matmul %311, %313, %cst_239 {dimension_numbers = #tpu.dot_dimension_numbers<[1], [0], [0], [1], [0, 0, 1, 1], [], []>} : vector<56x32xf32>, vector<32x32xf32>, vector<56x32xf32> -> vector<56x32xf32>
    %c3_240 = arith.constant 3 : index
    %c0_241 = arith.constant 0 : index
    %c0_242 = arith.constant 0 : index
    %315 = vector.load %arg17[%c3_240, %c0_241, %c0_242] : memref<4x1x32xf32, #tpu.memory_space<vmem>>, vector<1x1x32xf32>
    %316 = vector.shape_cast %315 : vector<1x1x32xf32> to vector<1x32xf32>
    %317 = vector.broadcast %316 : vector<1x32xf32> to vector<56x32xf32>
    %318 = arith.addf %314, %317 : vector<56x32xf32>
    %cst_243 = arith.constant 0.000000e+00 : f32
    %319 = vector.broadcast %cst_243 : f32 to vector<56x32xf32>
    %320 = arith.maximumf %318, %319 : vector<56x32xf32>
    %c3_244 = arith.constant 3 : index
    %c0_245 = arith.constant 0 : index
    %c0_246 = arith.constant 0 : index
    %321 = vector.load %arg18[%c3_244, %c0_245, %c0_246] : memref<4x32x32xf32, #tpu.memory_space<vmem>>, vector<1x32x32xf32>
    %322 = vector.shape_cast %321 : vector<1x32x32xf32> to vector<32x32xf32>
    %cst_247 = arith.constant dense<0.000000e+00> : vector<56x32xf32>
    %323 = tpu.matmul %320, %322, %cst_247 {dimension_numbers = #tpu.dot_dimension_numbers<[1], [0], [0], [1], [0, 0, 1, 1], [], []>} : vector<56x32xf32>, vector<32x32xf32>, vector<56x32xf32> -> vector<56x32xf32>
    %c3_248 = arith.constant 3 : index
    %c0_249 = arith.constant 0 : index
    %c0_250 = arith.constant 0 : index
    %324 = vector.load %arg19[%c3_248, %c0_249, %c0_250] : memref<4x1x32xf32, #tpu.memory_space<vmem>>, vector<1x1x32xf32>
    %325 = vector.shape_cast %324 : vector<1x1x32xf32> to vector<1x32xf32>
    %326 = vector.broadcast %325 : vector<1x32xf32> to vector<56x32xf32>
    %327 = arith.addf %323, %326 : vector<56x32xf32>
    %cst_251 = arith.constant 0.000000e+00 : f32
    %328 = vector.broadcast %cst_251 : f32 to vector<56x32xf32>
    %329 = arith.maximumf %327, %328 : vector<56x32xf32>
    %c3_252 = arith.constant 3 : index
    %c0_253 = arith.constant 0 : index
    %c0_254 = arith.constant 0 : index
    %330 = vector.load %arg20[%c3_252, %c0_253, %c0_254] : memref<4x1x32xf32, #tpu.memory_space<vmem>>, vector<1x1x32xf32>
    %331 = vector.shape_cast %330 : vector<1x1x32xf32> to vector<1x32xf32>
    %332 = vector.broadcast %331 : vector<1x32xf32> to vector<56x32xf32>
    %333 = arith.mulf %329, %332 : vector<56x32xf32>
    %cst_255 = arith.constant dense<0.000000e+00> : vector<56xf32>
    %334 = vector.multi_reduction <add>, %333, %cst_255 [1] : vector<56x32xf32> to vector<56xf32>
    %335 = vector.shape_cast %334 : vector<56xf32> to vector<56x1xf32>
    %336 = vector.broadcast %335 : vector<56x1xf32> to vector<56x3xf32>
    %337 = arith.mulf %286, %336 : vector<56x3xf32>
    %cst_256 = arith.constant dense<0.000000e+00> : vector<8x3xf32>
    %338 = tpu.matmul %11, %337, %cst_256 {dimension_numbers = #tpu.dot_dimension_numbers<[0], [0], [1], [1], [0, 1, 1, 1], [], []>} : vector<56x8xf32>, vector<56x3xf32>, vector<8x3xf32> -> vector<8x3xf32>
    %339 = arith.addf %253, %338 : vector<8x3xf32>
    %cst_257 = arith.constant dense<0.000000e+00> : vector<8x32xf32>
    %340 = tpu.matmul %0, %320, %cst_257 {dimension_numbers = #tpu.dot_dimension_numbers<[0], [0], [1], [1], [0, 1, 1, 1], [], []>} : vector<56x8xf32>, vector<56x32xf32>, vector<8x32xf32> -> vector<8x32xf32>
    %c3_258 = arith.constant 3 : index
    %c0_259 = arith.constant 0 : index
    %c0_260 = arith.constant 0 : index
    %341 = vector.load %arg21[%c3_258, %c0_259, %c0_260] : memref<4x32x32xf32, #tpu.memory_space<vmem>>, vector<1x32x32xf32>
    %342 = vector.shape_cast %341 : vector<1x32x32xf32> to vector<32x32xf32>
    %cst_261 = arith.constant dense<0.000000e+00> : vector<8x32xf32>
    %343 = tpu.matmul %275, %342, %cst_261 {dimension_numbers = #tpu.dot_dimension_numbers<[1], [0], [0], [1], [0, 0, 1, 1], [], []>} : vector<8x32xf32>, vector<32x32xf32>, vector<8x32xf32> -> vector<8x32xf32>
    %c3_262 = arith.constant 3 : index
    %c0_263 = arith.constant 0 : index
    %c0_264 = arith.constant 0 : index
    %344 = vector.load %arg22[%c3_262, %c0_263, %c0_264] : memref<4x32x32xf32, #tpu.memory_space<vmem>>, vector<1x32x32xf32>
    %345 = vector.shape_cast %344 : vector<1x32x32xf32> to vector<32x32xf32>
    %cst_265 = arith.constant dense<0.000000e+00> : vector<8x32xf32>
    %346 = tpu.matmul %340, %345, %cst_265 {dimension_numbers = #tpu.dot_dimension_numbers<[1], [0], [0], [1], [0, 0, 1, 1], [], []>} : vector<8x32xf32>, vector<32x32xf32>, vector<8x32xf32> -> vector<8x32xf32>
    %347 = arith.addf %343, %346 : vector<8x32xf32>
    %c3_266 = arith.constant 3 : index
    %c0_267 = arith.constant 0 : index
    %c0_268 = arith.constant 0 : index
    %348 = vector.load %arg23[%c3_266, %c0_267, %c0_268] : memref<4x1x32xf32, #tpu.memory_space<vmem>>, vector<1x1x32xf32>
    %349 = vector.shape_cast %348 : vector<1x1x32xf32> to vector<1x32xf32>
    %350 = vector.broadcast %349 : vector<1x32xf32> to vector<8x32xf32>
    %351 = arith.addf %347, %350 : vector<8x32xf32>
    %cst_269 = arith.constant 0.000000e+00 : f32
    %352 = vector.broadcast %cst_269 : f32 to vector<8x32xf32>
    %353 = arith.maximumf %351, %352 : vector<8x32xf32>
    %c3_270 = arith.constant 3 : index
    %c0_271 = arith.constant 0 : index
    %c0_272 = arith.constant 0 : index
    %354 = vector.load %arg24[%c3_270, %c0_271, %c0_272] : memref<4x32x32xf32, #tpu.memory_space<vmem>>, vector<1x32x32xf32>
    %355 = vector.shape_cast %354 : vector<1x32x32xf32> to vector<32x32xf32>
    %cst_273 = arith.constant dense<0.000000e+00> : vector<8x32xf32>
    %356 = tpu.matmul %353, %355, %cst_273 {dimension_numbers = #tpu.dot_dimension_numbers<[1], [0], [0], [1], [0, 0, 1, 1], [], []>} : vector<8x32xf32>, vector<32x32xf32>, vector<8x32xf32> -> vector<8x32xf32>
    %357 = arith.addf %275, %356 : vector<8x32xf32>
    %c3_274 = arith.constant 3 : index
    %c0_275 = arith.constant 0 : index
    %c0_276 = arith.constant 0 : index
    %358 = vector.load %arg25[%c3_274, %c0_275, %c0_276] : memref<4x1x32xf32, #tpu.memory_space<vmem>>, vector<1x1x32xf32>
    %359 = vector.shape_cast %358 : vector<1x1x32xf32> to vector<1x32xf32>
    %360 = vector.broadcast %359 : vector<1x32xf32> to vector<8x32xf32>
    %361 = arith.addf %357, %360 : vector<8x32xf32>
    %362 = arith.addf %361, %17 : vector<8x32xf32>
    %c0_277 = arith.constant 0 : index
    %c0_278 = arith.constant 0 : index
    %363 = vector.load %arg9[%c0_277, %c0_278] : memref<32x4xf32, #tpu.memory_space<vmem>>, vector<32x4xf32>
    %cst_279 = arith.constant dense<0.000000e+00> : vector<8x4xf32>
    %364 = tpu.matmul %362, %363, %cst_279 {dimension_numbers = #tpu.dot_dimension_numbers<[1], [0], [0], [1], [0, 0, 1, 1], [], []>} : vector<8x32xf32>, vector<32x4xf32>, vector<8x4xf32> -> vector<8x4xf32>
    %c0_280 = arith.constant 0 : index
    %c0_281 = arith.constant 0 : index
    %365 = vector.load %arg10[%c0_280, %c0_281] : memref<1x4xf32, #tpu.memory_space<vmem>>, vector<1x4xf32>
    %366 = vector.broadcast %365 : vector<1x4xf32> to vector<8x4xf32>
    %367 = arith.addf %364, %366 : vector<8x4xf32>
    %368 = arith.negf %367 : vector<8x4xf32>
    %369 = math.exp %368 : vector<8x4xf32>
    %cst_282 = arith.constant 1.000000e+00 : f32
    %370 = vector.broadcast %cst_282 : f32 to vector<8x4xf32>
    %371 = arith.addf %370, %369 : vector<8x4xf32>
    %372 = arith.divf %370, %371 : vector<8x4xf32>
    %c0_283 = arith.constant 0 : index
    %c0_284 = arith.constant 0 : index
    %373 = vector.load %arg5[%c0_283, %c0_284] : memref<4x128xf32, #tpu.memory_space<vmem>>, vector<4x128xf32>
    %cst_285 = arith.constant dense<0.000000e+00> : vector<8x128xf32>
    %374 = tpu.matmul %372, %373, %cst_285 {dimension_numbers = #tpu.dot_dimension_numbers<[1], [0], [0], [1], [0, 0, 1, 1], [], []>} : vector<8x4xf32>, vector<4x128xf32>, vector<8x128xf32> -> vector<8x128xf32>
    %c0_286 = arith.constant 0 : index
    %c0_287 = arith.constant 0 : index
    %375 = vector.load %arg6[%c0_286, %c0_287] : memref<3x128xf32, #tpu.memory_space<vmem>>, vector<3x128xf32>
    %cst_288 = arith.constant dense<0.000000e+00> : vector<8x128xf32>
    %376 = tpu.matmul %339, %375, %cst_288 {dimension_numbers = #tpu.dot_dimension_numbers<[1], [0], [0], [1], [0, 0, 1, 1], [], []>} : vector<8x3xf32>, vector<3x128xf32>, vector<8x128xf32> -> vector<8x128xf32>
    %377 = arith.addf %374, %376 : vector<8x128xf32>
    %c0_289 = arith.constant 0 : index
    %c0_290 = arith.constant 0 : index
    %378 = vector.load %arg26[%c0_289, %c0_290] : memref<8x128xf32, #tpu.memory_space<vmem>>, vector<8x128xf32>
    tpu.vector_store %arg26[%c0_289, %c0_290], %377 {strides = array<i32>} : memref<8x128xf32, #tpu.memory_space<vmem>>, vector<8x128xf32>,
    return
  }
}

</mosaic_0001>

<bundles_post_ra>
// kernel: egnn_pallas.1
= control target key start
LH: loop header
LB: loop body
LE: loop exit
PB: predicated region body
PF: predicated region fallthrough
CT: control target
= control target key end

     0   :  { %vm7386_vm0 = vcmask 1043456   ;;  %vm7385_vm1 = vcmask 31744   ;;  %vm105_vm2 = vcmask 64512   ;;  %vm314_vm3 = vcmask 23552   ;;  %s7350_s7 = inlined_call_operand.vmem [shape: f32[4,32], index: 7, kind: input, shape index: {}]   ;;  %s7351_s1 = inlined_call_operand.vmem [shape: f32[8,3], index: 1, kind: input, shape index: {}]   ;;  %s7352_s0 = inlined_call_operand.vmem [shape: f32[8,4], index: 0, kind: input, shape index: {}]   ;;  %s7353_s3 = inlined_call_operand.vmem [shape: f32[56,8], index: 3, kind: input, shape index: {}]   ;;  %s7354_s4 = inlined_call_operand.vmem [shape: f32[56,8], index: 4, kind: input, shape index: {}]   ;;  %s7355_s8 = inlined_call_operand.vmem [shape: f32[1,32], index: 8, kind: input, shape index: {}]   ;;  %s7356_s11 = inlined_call_operand.vmem [shape: f32[4,32,32], index: 11, kind: input, shape index: {}]   ;;  %s7357_s13 = inlined_call_operand.vmem [shape: f32[4,1,32], index: 13, kind: input, shape index: {}]   ;;  %s7358_s12 = inlined_call_operand.vmem [shape: f32[4,32,32], index: 12, kind: input, shape index: {}]   ;;  %s7359_s14 = inlined_call_operand.vmem [shape: f32[4,2,32], index: 14, kind: input, shape index: {}]   ;;  %s7360_s2 = inlined_call_operand.vmem [shape: f32[56,2], index: 2, kind: input, shape index: {}]   ;;  %s7361_s15 = inlined_call_operand.vmem [shape: f32[4,1,32], index: 15, kind: input, shape index: {}]   ;;  %s7362_s17 = inlined_call_operand.vmem [shape: f32[4,1,32], index: 17, kind: input, shape index: {}]   ;;  %s7363_s16 = inlined_call_operand.vmem [shape: f32[4,32,32], index: 16, kind: input, shape index: {}]   ;;  %s7364_s18 = inlined_call_operand.vmem [shape: f32[4,32,32], index: 18, kind: input, shape index: {}]   ;;  %s7365_s19 = inlined_call_operand.vmem [shape: f32[4,1,32], index: 19, kind: input, shape index: {}]   ;;  %s7366_s20 = inlined_call_operand.vmem [shape: f32[4,1,32], index: 20, kind: input, shape index: {}]   ;;  %s7367_s21 = inlined_call_operand.vmem [shape: f32[4,32,32], index: 21, kind: input, shape index: {}]   ;;  %s7368_s22 = inlined_call_operand.vmem [shape: f32[4,32,32], index: 22, kind: input, shape index: {}]   ;;  %s7369_s23 = inlined_call_operand.vmem [shape: f32[4,1,32], index: 23, kind: input, shape index: {}]   ;;  %s7370_s24 = inlined_call_operand.vmem [shape: f32[4,32,32], index: 24, kind: input, shape index: {}]   ;;  %s7371_s25 = inlined_call_operand.vmem [shape: f32[4,1,32], index: 25, kind: input, shape index: {}]   ;;  %s7372_s6 = inlined_call_operand.vmem [shape: f32[3,128], index: 6, kind: input, shape index: {}]   ;;  %s7373_s10 = inlined_call_operand.vmem [shape: f32[1,4], index: 10, kind: input, shape index: {}]   ;;  %s7374_s9 = inlined_call_operand.vmem [shape: f32[32,4], index: 9, kind: input, shape index: {}]   ;;  %s7375_s5 = inlined_call_operand.vmem [shape: f32[4,128], index: 5, kind: input, shape index: {}]   ;;  %s7376_s26 = inlined_call_operand.vmem [shape: f32[8,128], index: 26, kind: output, shape index: {}]  }
   0x1   :  { %7391 = sst [smem:[#allocation2_spill]] %s7350_s7  ;;  %vm7390_vm4 = vcmask 1041408   ;;  %vm7387_vm5 = vcmask 15360   ;;  %vm616_vm6 = vcmask 261120   ;;  %vm1062_vm11 = vcmask 457728  }
   0x2   :  { %7392 = sst [smem:[#allocation3_spill]] %s7351_s1 }
   0x3   :  { %7393 = sst [smem:[#allocation4_spill]] %s7352_s0 }
   0x4   :  { %7394 = sst [smem:[#allocation5_spill]] %s7353_s3 }
   0x5   :  { %7395 = sst [smem:[#allocation6_spill]] %s7354_s4 }
   0x6   :  { %7396 = sst [smem:[#allocation7_spill]] %s7355_s8 }
   0x7   :  { %7397 = sst [smem:[#allocation8_spill]] %s7356_s11 }
   0x8   :  { %7398 = sst [smem:[#allocation9_spill]] %s7357_s13 }
   0x9   :  { %7399 = sst [smem:[#allocation10_spill]] %s7358_s12 }
   0xa   :  { %7400 = sst [smem:[#allocation11_spill]] %s7359_s14 }
   0xb   :  { %7401 = sst [smem:[#allocation12_spill]] %s7360_s2 }
   0xc   :  { %7402 = sst [smem:[#allocation13_spill]] %s7373_s10 }
   0xd   :  { %7403 = sst [smem:[#allocation14_spill]] %s7375_s5 }
   0xe   :  { %7404 = sst [smem:[#allocation15_spill]] %s7376_s26 }
   0xf   :  { %s7405_s13 = sld [smem:[#allocation2_spill]] }
  0x10   :  { %s7406_s4 = sld [smem:[#allocation3_spill]] }
  0x11   :  { %s7407_s14 = sld [smem:[#allocation4_spill]] }
  0x12   :  { %s7408_s8 = sld [smem:[#allocation5_spill]] }
  0x13   :  { %s7409_s1 = sld [smem:[#allocation6_spill]] }
  0x14   :  { %s7411_s29 = sld [smem:[#allocation8_spill]] }
  0x15   :  { %v149_v0 = vld [vmem:[%s7405_s13] sm:$0xf]  ;;  %s7410_s13 = sld [smem:[#allocation7_spill]] }
  0x16   :  { %v104_v1 = vld [vmem:[%s7406_s4] sm:$0xff]  ;;  %4136 = vmatpush.msk.msra.mxu0 %vm7386_vm0, %v149_v0  ;;  %s7412_s27 = sld [smem:[#allocation10_spill]] }
  0x17   :  { %v148_v2 = vld [vmem:[%s7407_s14] sm:$0xff]  ;;  %218 = vmatpush.msra.mxu1 %v104_v1  ;;  %4528 = vmatpush.msra.mxu2 %v104_v1  ;;  %s7413_s7 = sld [smem:[#allocation11_spill]] }
  0x18   :  { %v4891_v3 = vld [vmem:[%s7408_s8] sm:$0xff]  ;;  %4137 = vmatmul.msk.f32.vlgmr.msra.gmra.mxu0 %vm7385_vm1, %v148_v2  ;;  %4529 = vmatpush.msra.mxu3 %v104_v1  ;;  %v4903_v5 = vld [vmem:[%s7408_s8 + $0x8] sm:$0xff]  ;;  %v4914_v7 = vld [vmem:[%s7408_s8 + $0x10] sm:$0xff]  ;;  %s7415_s26 = sld [smem:[#allocation9_spill]] }
  0x19   :  { %v91_v4 = vld [vmem:[%s7409_s1 + $0x8] sm:$0xff]  ;;  %4138 = vmatmul.msk.f32.vlgmr.msra.gmra.mxu1 %vm105_vm2, %v4891_v3  ;;  %v92_v6 = vld [vmem:[%s7409_s1 + $0x10] sm:$0xff]  ;;  %v93_v8 = vld [vmem:[%s7409_s1 + $0x18] sm:$0xff]  ;;  %s7496_s11 = sld [smem:[#allocation13_spill]] }
  0x1a   :  { %277 = vmatpush.msrb.mxu1 %v104_v1  ;;  %4146 = vmatmul.msk.f32.vlgmr.msra.gmra.mxu2 %vm105_vm2, %v91_v4  ;;  %v4925_v9 = vld [vmem:[%s7408_s8 + $0x18] sm:$0xff]  ;;  %v94_v10 = vld [vmem:[%s7409_s1 + $0x20] sm:$0xff]  ;;  %v4935_v11 = vld [vmem:[%s7409_s1 + $0x30] sm:$0xff] }
  0x1b   :  { %4151 = vmatmul.msk.f32.vlgmr.msra.gmra.mxu3 %vm105_vm2, %v4935_v11  ;;  %v4943_v12 = vld [vmem:[%s7408_s8 + $0x20] sm:$0xff]  ;;  %v95_v13 = vld [vmem:[%s7409_s1 + $0x28] sm:$0xff]  ;;  %v4961_v15 = vld [vmem:[%s7408_s8 + $0x30] sm:$0xff] }
  0x1c   :  { %v4954_v14 = vld [vmem:[%s7408_s8 + $0x28] sm:$0xff]  ;;  %v90_v16 = vld [vmem:[%s7409_s1] sm:$0xff]  ;;  %v611_v43 = vld [vmem:[%s7411_s29 + $0x18] sm:$0xff] }
  0x1d   :  { %v4531_v17 = vld [vmem:[%s7410_s13] ss:$0 sm:$0xff]  ;;  %v610_v44 = vld [vmem:[%s7411_s29 + $0x10] sm:$0xff]  ;;  %709 = vmatpush.msrb.mxu2 %v611_v43  ;;  %v609_v46 = vld [vmem:[%s7411_s29 + $0x8] sm:$0xff]  ;;  %s7414_s13 = sld [smem:[#allocation12_spill]] }
  0x1e   :  { %v615_v58 = vld [vmem:[%s7412_s27 + $0x18] sm:$0xff]  ;;  %v608_v59 = vld [vmem:[%s7411_s29] sm:$0xff]  ;;  %v614_v60 = vld [vmem:[%s7412_s27 + $0x10] sm:$0xff] }
  0x1f   :  { %710 = vmatpush.msrb.mxu2 %v610_v44  ;;  %650 = vmatpush.msra.mxu1 %v615_v58  ;;  %v613_v61 = vld [vmem:[%s7412_s27 + $0x8] sm:$0xff]  ;;  %v753_v62 = vld [vmem:[%s7413_s7] sm:$0x3] }
  0x20   :  { %v612_v0 = vld [vmem:[%s7412_s27] sm:$0xff] }
  0x21   :  { %4139 = vmatmul.msk.f32.gmra.mxu1 %vm105_vm2, %v4903_v5  ;;  %711 = vmatpush.msrb.mxu2 %v609_v46 }
  0x22   :  { %4147 = vmatmul.msk.f32.gmra.mxu2 %vm105_vm2, %v92_v6  ;;  %651 = vmatpush.msra.mxu1 %v614_v60 }
  0x23   :  { %712 = vmatpush.msrb.mxu2 %v608_v59  ;;  %v97_v63 = vld [vmem:[%s7414_s13] sm:$0xff]  ;;  %v98_v1 = vld [vmem:[%s7414_s13 + $0x8] sm:$0xff]  ;;  %v99_v2 = vld [vmem:[%s7414_s13 + $0x10] sm:$0xff] }
  0x24   :  { %652 = vmatpush.msra.mxu1 %v613_v61 }
  0x26   :  { %653 = vmatpush.msra.mxu1 %v612_v0 }
  0x29   :  { %4140 = vmatmul.msk.f32.gmra.mxu1 %vm105_vm2, %v4914_v7 }
  0x2a   :  { %4148 = vmatmul.msk.f32.gmra.mxu2 %vm105_vm2, %v93_v8 }
  0x31   :  { %4141 = vmatmul.msk.f32.gmra.mxu1 %vm105_vm2, %v4925_v9 }
  0x32   :  { %4149 = vmatmul.msk.f32.gmra.mxu2 %vm105_vm2, %v94_v10 }
  0x39   :  { %4142 = vmatmul.msk.f32.gmra.mxu1 %vm105_vm2, %v4943_v12 }
  0x3a   :  { %4150 = vmatmul.msk.f32.gmra.mxu2 %vm105_vm2, %v95_v13 }
  0x41   :  { %4143 = vmatmul.msk.f32.gmra.mxu1 %vm105_vm2, %v4954_v14 }
  0x49   :  { %4144 = vmatmul.msk.f32.gmra.mxu1 %vm105_vm2, %v4961_v15 }
  0x51   :  { %4145 = vmatmul.msk.f32.vlgmr.msrb.gmra.mxu1 %vm105_vm2, %v90_v16 }
  0x95   :  { %v179_v18 = vpop.f32.mrf.mxu0 }
  0x96   :  { %v220_v19 = vpop.f32.mrf.mxu1  ;;  %v4972_v20 = vadd.f32 %v4531_v17, %v179_v18  ;;  %v102_v17 = vld [vmem:[%s7414_s13 + $0x28] sm:$0xff] }
  0x98   :  { %547 = vmatpush.msrb.mxu3 %v4972_v20  ;;  %585 = vmatpush.msrb.mxu0 %v4972_v20 }
  0x99   :  { %4152 = vmatmul.msk.f32.vlgmr.msrb.gmra.mxu3 %vm105_vm2, %v4891_v3  ;;  %4159 = vmatmul.msk.f32.vlgmr.msrb.gmra.mxu0 %vm105_vm2, %v90_v16 }
  0x9a   :  { %4180 = vmatpush.msk.msra.mxu3 %vm7390_vm4, %v753_v62 }
  0x9d   :  { %v282_v22 = vpop.f32.mrf.mxu2 }
  0x9e   :  { %v223_v21 = vpop.f32.mrf.mxu1  ;;  %v297_v53 = vpop.f32.mrf.mxu3 }
  0x9f   :  { %v5029_v49 = vsub.f32 %v223_v21, %v282_v22  ;;  %v103_v21 = vld [vmem:[%s7414_s13 + $0x30] sm:$0xff] }
  0xa1   :  { %4153 = vmatmul.msk.f32.gmra.mxu3 %vm105_vm2, %v4903_v5  ;;  %4160 = vmatmul.msk.f32.gmra.mxu0 %vm105_vm2, %v91_v4  ;;  %v308_v52 = vmul.f32 %v5029_v49, %v5029_v49 }
  0xa3   :  { %v318_v54 = vsel %vm314_vm3, %v308_v52, 0.0 }
  0xa5   :  { %v285_v24 = vpop.f32.mrf.mxu2 }
  0xa6   :  { %v226_v23 = vpop.f32.mrf.mxu1 }
  0xa7   :  { %v4982_v25 = vsub.f32 %v226_v23, %v285_v24 }
  0xa9   :  { %v309_v26 = vmul.f32 %v4982_v25, %v4982_v25  ;;  %4154 = vmatmul.msk.f32.gmra.mxu3 %vm105_vm2, %v4914_v7  ;;  %4161 = vmatmul.msk.f32.gmra.mxu0 %vm105_vm2, %v92_v6  ;;  %v100_v6 = vld [vmem:[%s7414_s13 + $0x18] sm:$0xff] }
  0xab   :  { %v321_v27 = vsel %vm314_vm3, %v309_v26, 0.0 }
  0xac   :  { %322 = vadd.xlane.f32.xlu1 %v321_v27 }
  0xad   :  { %v288_v29 = vpop.f32.mrf.mxu2 }
  0xae   :  { %v229_v28 = vpop.f32.mrf.mxu1 }
  0xaf   :  { %v4990_v30 = vsub.f32 %v229_v28, %v288_v29 }
  0xb1   :  { %v310_v31 = vmul.f32 %v4990_v30, %v4990_v30  ;;  %4155 = vmatmul.msk.f32.gmra.mxu3 %vm105_vm2, %v4925_v9  ;;  %4162 = vmatmul.msk.f32.gmra.mxu0 %vm105_vm2, %v93_v8 }
  0xb3   :  { %v324_v32 = vsel %vm314_vm3, %v310_v31, 0.0  ;;  %v846_v31 = vld [vmem:[%s7363_s16 + $0x18] sm:$0xff] }
  0xb4   :  { %325 = vadd.xlane.f32.xlu1 %v324_v32  ;;  %884 = vmatpush.msra.mxu0 %v846_v31  ;;  %v845_v32 = vld [vmem:[%s7363_s16 + $0x10] sm:$0xff] }
  0xb5   :  { %v291_v34 = vpop.f32.mrf.mxu2 }
  0xb6   :  { %v232_v33 = vpop.f32.mrf.mxu1  ;;  %885 = vmatpush.msra.mxu0 %v845_v32 }
  0xb7   :  { %v4998_v35 = vsub.f32 %v232_v33, %v291_v34  ;;  %v844_v33 = vld [vmem:[%s7363_s16 + $0x8] sm:$0xff]  ;;  %v843_v34 = vld [vmem:[%s7363_s16] sm:$0xff] }
  0xb8   :  { %886 = vmatpush.msra.mxu0 %v844_v33 }
  0xb9   :  { %v311_v36 = vmul.f32 %v4998_v35, %v4998_v35  ;;  %4156 = vmatmul.msk.f32.gmra.mxu3 %vm105_vm2, %v4943_v12  ;;  %4163 = vmatmul.msk.f32.gmra.mxu0 %vm105_vm2, %v94_v10 }
  0xba   :  { %887 = vmatpush.msra.mxu0 %v843_v34 }
  0xbb   :  { %v327_v37 = vsel %vm314_vm3, %v311_v36, 0.0 }
  0xbc   :  { %328 = vadd.xlane.f32.xlu2 %v327_v37 }
  0xbd   :  { %v294_v39 = vpop.f32.mrf.mxu2 }
  0xbe   :  { %v235_v38 = vpop.f32.mrf.mxu1 }
  0xbf   :  { %v5006_v40 = vsub.f32 %v235_v38, %v294_v39  ;;  %v5125_v39 = vld [vmem:[%s7415_s26] ss:$0 sm:$0xff] }
  0xc1   :  { %v312_v41 = vmul.f32 %v5006_v40, %v5006_v40  ;;  %4157 = vmatmul.msk.f32.gmra.mxu3 %vm105_vm2, %v4954_v14  ;;  %4164 = vmatmul.msk.f32.gmra.mxu0 %vm105_vm2, %v95_v13 }
  0xc3   :  { %v330_v42 = vsel %vm314_vm3, %v312_v41, 0.0 }
  0xc4   :  { %331 = vadd.xlane.f32.xlu2 %v330_v42 }
  0xc6   :  { %v238_v45 = vpop.f32.mrf.mxu1 }
  0xc7   :  { %v5037_v55 = vsub.f32 %v238_v45, %v297_v53 }
  0xc9   :  { %4158 = vmatmul.msk.f32.gmra.mxu3 %vm105_vm2, %v4961_v15  ;;  %4165 = vmatmul.msk.f32.gmra.mxu0 %vm105_vm2, %v4935_v11  ;;  %v313_v56 = vmul.f32 %v5037_v55, %v5037_v55  ;;  %v101_v11 = vld [vmem:[%s7414_s13 + $0x20] sm:$0xff] }
  0xcb   :  { %v333_v57 = vsel %vm314_vm3, %v313_v56, 0.0 }
  0xce   :  { %v279_v47 = vpop.f32.mrf.mxu1 }
  0xcf   :  { %v5027_v48 = vsub.f32 %v220_v19, %v279_v47  ;;  %v5134_v47 = vld [vmem:[%s7361_s15] ss:$0 sm:$0xff] }
  0xd1   :  { %v307_v50 = vmul.f32 %v5027_v48, %v5027_v48  ;;  %4181 = vmatmul.msk.f32.vlgmr.msra.gmra.mxu3 %vm7387_vm5, %v97_v63 }
  0xd3   :  { %v315_v51 = vsel %vm314_vm3, %v307_v50, 0.0 }
  0xd4   :  { %316 = vadd.xlane.f32.xlu0 %v315_v51 }
  0xd9   :  { %4182 = vmatmul.msk.f32.gmra.mxu3 %vm7387_vm5, %v98_v1 }
  0xdc   :  { %319 = vadd.xlane.f32.xlu0 %v318_v54 }
  0xe1   :  { %4183 = vmatmul.msk.f32.gmra.mxu3 %vm7387_vm5, %v99_v2 }
  0xe4   :  { %334 = vadd.xlane.f32.xlu0 %v333_v57 }
  0xe9   :  { %4184 = vmatmul.msk.f32.gmra.mxu3 %vm7387_vm5, %v100_v6 }
  0xee   :  { %1087 = vxpose.xlu1.b32.start [1/7] (short) (narrow) %v4891_v3, 8 }
  0xf1   :  { %4185 = vmatmul.msk.f32.gmra.mxu3 %vm7387_vm5, %v101_v11 }
  0xf6   :  { %1088 = vxpose.xlu1.b32.cont [2/7] (short) (narrow) %v4903_v5, 8 }
  0xf9   :  { %4186 = vmatmul.msk.f32.gmra.mxu3 %vm7387_vm5, %v102_v17 }
  0xfe   :  { %1089 = vxpose.xlu1.b32.cont [3/7] (short) (narrow) %v4914_v7, 8 }
 0x101   :  { %4187 = vmatmul.msk.f32.gmra.mxu3 %vm7387_vm5, %v103_v21 }
 0x106   :  { %1090 = vxpose.xlu1.b32.cont [4/7] (short) (narrow) %v4925_v9, 8 }
 0x10e   :  { %1091 = vxpose.xlu1.b32.cont [5/7] (short) (narrow) %v4943_v12, 8 }
 0x116   :  { %1092 = vxpose.xlu1.b32.cont [6/7] (short) (narrow) %v4954_v14, 8  ;;  %v587_v4 = vpop.f32.mrf.mxu0 }
 0x117   :  { %4166 = vmatmul.msk.f32.vlgmr.msra.gmra.mxu1 %vm616_vm6, %v587_v4 }
 0x11c   :  { %v549_v8 = vpop.f32.mrf.mxu3 }
 0x11d   :  { %4173 = vmatmul.msk.f32.vlgmr.msrb.gmra.mxu2 %vm616_vm6, %v549_v8 }
 0x11e   :  { %1093 = vxpose.xlu1.b32.end [7/7] (short) (narrow) %v4961_v15, 8  ;;  %v590_v10 = vpop.f32.mrf.mxu0 }
 0x11f   :  { %4167 = vmatmul.msk.f32.gmra.mxu1 %vm616_vm6, %v590_v10  ;;  %v5142_v62 = vpop.xlane.xlu1 %322 }
 0x120   :  { %v741_v6 = vmul.f32 %v5125_v39, %v5142_v62 }
 0x124   :  { %v552_v13 = vpop.f32.mrf.mxu3 }
 0x125   :  { %4174 = vmatmul.msk.f32.gmra.mxu2 %vm616_vm6, %v552_v13 }
 0x126   :  { %v593_v16 = vpop.f32.mrf.mxu0 }
 0x127   :  { %4168 = vmatmul.msk.f32.gmra.mxu1 %vm616_vm6, %v593_v16  ;;  %v5149_v16 = vpop.xlane.xlu1 %325 }
 0x128   :  { %v742_v21 = vmul.f32 %v5125_v39, %v5149_v16 }
 0x12c   :  { %v555_v18 = vpop.f32.mrf.mxu3 }
 0x12d   :  { %4175 = vmatmul.msk.f32.gmra.mxu2 %vm616_vm6, %v555_v18 }
 0x12e   :  { %v596_v19 = vpop.f32.mrf.mxu0 }
 0x12f   :  { %4169 = vmatmul.msk.f32.gmra.mxu1 %vm616_vm6, %v596_v19 }
 0x134   :  { %v558_v22 = vpop.f32.mrf.mxu3 }
 0x135   :  { %4176 = vmatmul.msk.f32.gmra.mxu2 %vm616_vm6, %v558_v22 }
 0x136   :  { %v599_v23 = vpop.f32.mrf.mxu0 }
 0x137   :  { %4170 = vmatmul.msk.f32.gmra.mxu1 %vm616_vm6, %v599_v23 }
 0x13c   :  { %v561_v24 = vpop.f32.mrf.mxu3 }
 0x13d   :  { %4177 = vmatmul.msk.f32.gmra.mxu2 %vm616_vm6, %v561_v24  ;;  %v920_v24 = vld [vmem:[%s7364_s18 + $0x18] sm:$0xff] }
 0x13e   :  { %v602_v26 = vpop.f32.mrf.mxu0  ;;  %958 = vmatpush.msrb.mxu1 %v920_v24 }
 0x13f   :  { %4171 = vmatmul.msk.f32.gmra.mxu1 %vm616_vm6, %v602_v26  ;;  %v5157_v26 = vpop.xlane.xlu2 %328 }
 0x140   :  { %v743_v34 = vmul.f32 %v5125_v39, %v5157_v26  ;;  %vm391_vm14 = vcmp.eq.f32.partialorder %v5157_v26, inf }
 0x144   :  { %v564_v27 = vpop.f32.mrf.mxu3 }
 0x145   :  { %4178 = vmatmul.msk.f32.gmra.mxu2 %vm616_vm6, %v564_v27 }
 0x146   :  { %v605_v28 = vpop.f32.mrf.mxu0 }
 0x147   :  { %4172 = vmatmul.msk.f32.gmra.mxu1 %vm616_vm6, %v605_v28  ;;  %v5127_v41 = vpop.xlane.xlu0 %316 }
 0x148   :  { %v739_v45 = vmul.f32 %v5125_v39, %v5127_v41 }
 0x14c   :  { %v567_v29 = vpop.f32.mrf.mxu3 }
 0x14d   :  { %4179 = vmatmul.msk.f32.gmra.mxu2 %vm616_vm6, %v567_v29 }
 0x14f   :  { %v5137_v53 = vpop.xlane.xlu0 %319 }
 0x150   :  { %v740_v58 = vmul.f32 %v5125_v39, %v5137_v53 }
 0x154   :  { %v797_v37 = vpop.f32.mrf.mxu3 }
 0x15c   :  { %v800_v43 = vpop.f32.mrf.mxu3 }
 0x164   :  { %v803_v59 = vpop.f32.mrf.mxu3 }
 0x16c   :  { %v806_v10 = vpop.f32.mrf.mxu3 }
 0x174   :  { %v809_v28 = vpop.f32.mrf.mxu3 }
 0x194   :  { %v655_v36 = vpop.f32.mrf.mxu1 }
 0x19c   :  { %v658_v38 = vpop.f32.mrf.mxu1 }
 0x1a0   :  { %v714_v42 = vpop.f32.mrf.mxu2 }
 0x1a1   :  { %v715_v44 = vadd.f32 %v714_v42, %v655_v36  ;;  %v5163_v42 = vpop.xlane.xlu2 %331 }
 0x1a2   :  { %vm403_vm13 = vcmp.eq.f32.partialorder %v5163_v42, inf }
 0x1a3   :  { %v746_v46 = vadd.f32 %v739_v45, %v715_v44  ;;  %v812_v45 = vpop.f32.mrf.mxu3 }
 0x1a4   :  { %v661_v51 = vpop.f32.mrf.mxu1 }
 0x1a5   :  { %v818_v50 = vadd.f32 %v797_v37, %v746_v46 }
 0x1a7   :  { %v829_v52 = vadd.f32 %v5134_v47, %v818_v50 }
 0x1a8   :  { %v717_v54 = vpop.f32.mrf.mxu2 }
 0x1a9   :  { %v836_v56 = vmax.f32 %v829_v52, 0.0  ;;  %v718_v57 = vadd.f32 %v717_v54, %v658_v38 }
 0x1ab   :  { %4188 = vmatmul.msk.f32.vlgmr.msra.gmra.mxu0 %vm616_vm6, %v836_v56  ;;  %v747_v60 = vadd.f32 %v740_v58, %v718_v57  ;;  %v5170_v58 = vpop.xlane.xlu0 %334 }
 0x1ac   :  { %v664_v1 = vpop.f32.mrf.mxu1  ;;  %vm415_vm12 = vcmp.eq.f32.partialorder %v5170_v58, inf  ;;  %vm417_vm15 = vcmp.eq.f32.partialorder %v5170_v58, 0.0 }
 0x1ad   :  { %v819_v61 = vadd.f32 %v800_v43, %v747_v60 }
 0x1af   :  { %v830_v63 = vadd.f32 %v5134_v47, %v819_v61 }
 0x1b0   :  { %v720_v0 = vpop.f32.mrf.mxu2 }
 0x1b1   :  { %v721_v2 = vadd.f32 %v720_v0, %v661_v51  ;;  %v837_v4 = vmax.f32 %v830_v63, 0.0  ;;  %v744_v51 = vmul.f32 %v5125_v39, %v5163_v42  ;;  %v745_v63 = vmul.f32 %v5125_v39, %v5170_v58  ;;  %v815_v0 = vpop.f32.mrf.mxu3  ;;  %v917_v39 = vld [vmem:[%s7364_s18] sm:$0xff] }
 0x1b3   :  { %4189 = vmatmul.msk.f32.gmra.mxu0 %vm616_vm6, %v837_v4  ;;  %v748_v8 = vadd.f32 %v741_v6, %v721_v2 }
 0x1b4   :  { %v667_v22 = vpop.f32.mrf.mxu1 }
 0x1b5   :  { %v820_v11 = vadd.f32 %v803_v59, %v748_v8  ;;  %v919_v8 = vld [vmem:[%s7364_s18 + $0x10] sm:$0xff] }
 0x1b6   :  { %959 = vmatpush.msrb.mxu1 %v919_v8  ;;  %v115_v8 = vsel %vm105_vm2, %v4954_v14, 0.0 }
 0x1b7   :  { %v831_v13 = vadd.f32 %v5134_v47, %v820_v11 }
 0x1b8   :  { %v723_v17 = vpop.f32.mrf.mxu2 }
 0x1b9   :  { %v724_v18 = vadd.f32 %v723_v17, %v664_v1  ;;  %v838_v19 = vmax.f32 %v831_v13, 0.0 }
 0x1bb   :  { %4190 = vmatmul.msk.f32.gmra.mxu0 %vm616_vm6, %v838_v19  ;;  %v749_v23 = vadd.f32 %v742_v21, %v724_v18 }
 0x1bc   :  { %v670_v37 = vpop.f32.mrf.mxu1 }
 0x1bd   :  { %v821_v27 = vadd.f32 %v806_v10, %v749_v23  ;;  %v918_v10 = vld [vmem:[%s7364_s18 + $0x8] sm:$0xff] }
 0x1be   :  { %960 = vmatpush.msrb.mxu1 %v918_v10 }
 0x1bf   :  { %v832_v29 = vadd.f32 %v5134_v47, %v821_v27 }
 0x1c0   :  { %v726_v31 = vpop.f32.mrf.mxu2  ;;  %961 = vmatpush.msrb.mxu1 %v917_v39 }
 0x1c1   :  { %v727_v32 = vadd.f32 %v726_v31, %v667_v22  ;;  %v839_v33 = vmax.f32 %v832_v29, 0.0 }
 0x1c3   :  { %4191 = vmatmul.msk.f32.gmra.mxu0 %vm616_vm6, %v839_v33  ;;  %v750_v36 = vadd.f32 %v743_v34, %v727_v32 }
 0x1c4   :  { %v673_v56 = vpop.f32.mrf.mxu1 }
 0x1c5   :  { %v822_v38 = vadd.f32 %v809_v28, %v750_v36 }
 0x1c7   :  { %v833_v43 = vadd.f32 %v5134_v47, %v822_v38 }
 0x1c8   :  { %v729_v44 = vpop.f32.mrf.mxu2 }
 0x1c9   :  { %v730_v46 = vadd.f32 %v729_v44, %v670_v37  ;;  %v840_v50 = vmax.f32 %v833_v43, 0.0 }
 0x1cb   :  { %4192 = vmatmul.msk.f32.gmra.mxu0 %vm616_vm6, %v840_v50  ;;  %v751_v52 = vadd.f32 %v744_v51, %v730_v46  ;;  %v106_v51 = vsel %vm105_vm2, %v4891_v3, 0.0 }
 0x1cd   :  { %v823_v54 = vadd.f32 %v812_v45, %v751_v52  ;;  %v107_v52 = vsel %vm105_vm2, %v4903_v5, 0.0 }
 0x1cf   :  { %v834_v57 = vadd.f32 %v5134_v47, %v823_v54  ;;  %v108_v54 = vadd.f32 %v107_v52, %v106_v51 }
 0x1d0   :  { %v732_v59 = vpop.f32.mrf.mxu2 }
 0x1d1   :  { %v733_v60 = vadd.f32 %v732_v59, %v673_v56  ;;  %v841_v61 = vmax.f32 %v834_v57, 0.0  ;;  %v109_v56 = vsel %vm105_vm2, %v4914_v7, 0.0  ;;  %v4535_v59 = vld [vmem:[%s7365_s19] ss:$0 sm:$0xff] }
 0x1d2   :  { %v110_v57 = vadd.f32 %v109_v56, %v108_v54 }
 0x1d3   :  { %4193 = vmatmul.msk.f32.gmra.mxu0 %vm616_vm6, %v841_v61  ;;  %v752_v1 = vadd.f32 %v745_v63, %v733_v60  ;;  %v111_v60 = vsel %vm105_vm2, %v4925_v9, 0.0 }
 0x1d4   :  { %v112_v63 = vadd.f32 %v111_v60, %v110_v57 }
 0x1d5   :  { %v824_v2 = vadd.f32 %v815_v0, %v752_v1  ;;  %v113_v1 = vsel %vm105_vm2, %v4943_v12, 0.0 }
 0x1d7   :  { %v835_v4 = vadd.f32 %v5134_v47, %v824_v2  ;;  %v4534_v47 = vld [vmem:[%s7362_s17] ss:$0 sm:$0xff]  ;;  %v114_v2 = vadd.f32 %v113_v1, %v112_v63 }
 0x1d9   :  { %v842_v6 = vmax.f32 %v835_v4, 0.0  ;;  %v116_v10 = vadd.f32 %v115_v8, %v114_v2 }
 0x1db   :  { %4194 = vmatmul.msk.f32.gmra.mxu0 %vm616_vm6, %v842_v6  ;;  %v4536_v6 = vld [vmem:[%s7366_s20] ss:$0 sm:$0xff] }
 0x228   :  { %v889_v11 = vpop.f32.mrf.mxu0 }
 0x229   :  { %v890_v13 = vadd.f32 %v4534_v47, %v889_v11 }
 0x22b   :  { %v910_v17 = vmax.f32 %v890_v13, 0.0 }
 0x22d   :  { %4195 = vmatmul.msk.f32.vlgmr.msrb.gmra.mxu1 %vm616_vm6, %v910_v17 }
 0x230   :  { %v892_v18 = vpop.f32.mrf.mxu0 }
 0x231   :  { %v893_v19 = vadd.f32 %v4534_v47, %v892_v18 }
 0x233   :  { %v911_v21 = vmax.f32 %v893_v19, 0.0 }
 0x235   :  { %4196 = vmatmul.msk.f32.gmra.mxu1 %vm616_vm6, %v911_v21 }
 0x238   :  { %v895_v22 = vpop.f32.mrf.mxu0 }
 0x239   :  { %v896_v23 = vadd.f32 %v4534_v47, %v895_v22 }
 0x23b   :  { %v912_v24 = vmax.f32 %v896_v23, 0.0 }
 0x23d   :  { %4197 = vmatmul.msk.f32.gmra.mxu1 %vm616_vm6, %v912_v24 }
 0x240   :  { %v898_v27 = vpop.f32.mrf.mxu0 }
 0x241   :  { %v899_v28 = vadd.f32 %v4534_v47, %v898_v27 }
 0x243   :  { %v913_v29 = vmax.f32 %v899_v28, 0.0 }
 0x245   :  { %4198 = vmatmul.msk.f32.gmra.mxu1 %vm616_vm6, %v913_v29 }
 0x248   :  { %v901_v31 = vpop.f32.mrf.mxu0 }
 0x249   :  { %v902_v32 = vadd.f32 %v4534_v47, %v901_v31 }
 0x24b   :  { %v914_v33 = vmax.f32 %v902_v32, 0.0 }
 0x24d   :  { %4199 = vmatmul.msk.f32.gmra.mxu1 %vm616_vm6, %v914_v33 }
 0x250   :  { %v904_v34 = vpop.f32.mrf.mxu0 }
 0x251   :  { %v905_v36 = vadd.f32 %v4534_v47, %v904_v34 }
 0x253   :  { %v915_v37 = vmax.f32 %v905_v36, 0.0 }
 0x255   :  { %4200 = vmatmul.msk.f32.gmra.mxu1 %vm616_vm6, %v915_v37 }
 0x258   :  { %v907_v38 = vpop.f32.mrf.mxu0 }
 0x259   :  { %v908_v43 = vadd.f32 %v4534_v47, %v907_v38  ;;  %v117_v47 = vsel %vm105_vm2, %v4961_v15, 0.0 }
 0x25a   :  { %v118_v11 = vadd.f32 %v117_v47, %v116_v10 }
 0x25b   :  { %v916_v44 = vmax.f32 %v908_v43, 0.0 }
 0x25c   :  { %v119_v19 = vrot.slane %v118_v11, 4 }
 0x25d   :  { %4201 = vmatmul.msk.f32.gmra.mxu1 %vm616_vm6, %v916_v44  ;;  %1131 = vmatpush.msrb.mxu3 %v916_v44 }
 0x25e   :  { %v120_v23 = vadd.f32 %v119_v19, %v118_v11 }
 0x25f   :  { %1132 = vmatpush.msrb.mxu3 %v915_v37 }
 0x261   :  { %1133 = vmatpush.msrb.mxu3 %v914_v33 }
 0x263   :  { %1134 = vmatpush.msrb.mxu3 %v913_v29  ;;  %v121_v29 = vrot.slane %v120_v23, 2 }
 0x265   :  { %1135 = vmatpush.msrb.mxu3 %v912_v24  ;;  %v122_v34 = vadd.f32 %v121_v29, %v120_v23 }
 0x267   :  { %1136 = vmatpush.msrb.mxu3 %v911_v21  ;;  %v123_v44 = vrot.slane %v122_v34, 1 }
 0x269   :  { %1137 = vmatpush.msrb.mxu3 %v910_v17  ;;  %v124_v57 = vadd.f32 %v123_v44, %v122_v34 }
 0x26b   :  { %v125_v63 = vmax.f32 %v124_v57, 1.0 }
 0x26d   :  { %4561 = vrcp.f32 %v125_v63  ;;  %vm131_vm7 = vweird.f32 %v125_v63 }
 0x26e   :  { %4563 = vrsqrt.f32 %v5170_v58 }
 0x26f   :  { %4565 = vrsqrt.f32 %v5163_v42 }
 0x270   :  { %4567 = vrsqrt.f32 %v5157_v26 }
 0x271   :  { %4569 = vrsqrt.f32 %v5149_v16 }
 0x272   :  { %4571 = vrsqrt.f32 %v5142_v62 }
 0x273   :  { %v4562_v8 = vpop.eup %4561  ;;  %4573 = vrsqrt.f32 %v5137_v53 }
 0x274   :  { %vm132_vm8 = vweird.f32 %v4562_v8  ;;  %4575 = vrsqrt.f32 %v5127_v41 }
 0x275   :  { %vm133_vm9 = vmor %vm131_vm7, %vm132_vm8  ;;  %vm379_vm7 = vcmp.eq.f32.partialorder %v5149_v16, inf  ;;  %vm405_vm8 = vcmp.eq.f32.partialorder %v5163_v42, 0.0 }
 0x2aa   :  { %v963_v45 = vpop.f32.mrf.mxu1 }
 0x2b2   :  { %v966_v46 = vpop.f32.mrf.mxu1 }
 0x2b3   :  { %v967_v31 = vadd.f32 %v4535_v59, %v966_v46 }
 0x2b5   :  { %v985_v36 = vmax.f32 %v967_v31, 0.0 }
 0x2b7   :  { %v996_v54 = vmul.f32 %v4536_v6, %v985_v36 }
 0x2ba   :  { %v969_v50 = vpop.f32.mrf.mxu1 }
 0x2bb   :  { %v970_v51 = vadd.f32 %v4535_v59, %v969_v50 }
 0x2bd   :  { %v986_v60 = vmax.f32 %v970_v51, 0.0 }
 0x2bf   :  { %v997_v1 = vmul.f32 %v4536_v6, %v986_v60 }
 0x2c2   :  { %v972_v61 = vpop.f32.mrf.mxu1 }
 0x2c3   :  { %v973_v0 = vadd.f32 %v4535_v59, %v972_v61  ;;  %v1005_v61 = vsel %vm616_vm6, %v996_v54, 0.0 }
 0x2c5   :  { %v987_v4 = vmax.f32 %v973_v0, 0.0  ;;  %v964_v0 = vadd.f32 %v4535_v59, %v963_v45 }
 0x2c7   :  { %v998_v39 = vmul.f32 %v4536_v6, %v987_v4  ;;  %v984_v2 = vmax.f32 %v964_v0, 0.0  ;;  %v1008_v4 = vsel %vm616_vm6, %v997_v1, 0.0 }
 0x2c9   :  { %v1011_v13 = vsel %vm616_vm6, %v998_v39, 0.0  ;;  %v995_v50 = vmul.f32 %v4536_v6, %v984_v2  ;;  %v127_v39 = vmul.f32 %v4562_v8, %v125_v63 }
 0x2ca   :  { %1012 = vadd.xlane.f32.xlu0 %v1011_v13  ;;  %v975_v17 = vpop.f32.mrf.mxu1  ;;  %v137_v13 = vand.u32 2147483648, %v125_v63 }
 0x2cb   :  { %v976_v18 = vadd.f32 %v4535_v59, %v975_v17  ;;  %v1002_v10 = vsel %vm616_vm6, %v995_v50, 0.0  ;;  %v128_v47 = vsub.f32 1.0, %v127_v39 }
 0x2cc   :  { %v138_v45 = vor.u32 1.1754944e-38, %v137_v13 }
 0x2cd   :  { %v988_v21 = vmax.f32 %v976_v18, 0.0  ;;  %v129_v11 = vmul.f32 %v4562_v8, %v128_v47  ;;  %v135_v18 = vand.u32 2147483647, %v125_v63 }
 0x2cf   :  { %v999_v22 = vmul.f32 %v4536_v6, %v988_v21  ;;  %v130_v17 = vadd.f32 %v4562_v8, %v129_v11  ;;  %vm136_vm10 = vcmp.eq.f32.partialorder %v135_v18, 8.507059e+37 }
 0x2d1   :  { %v1014_v24 = vsel %vm616_vm6, %v999_v22, 0.0  ;;  %v4564_v22 = vpop.eup %4563 }
 0x2d2   :  { %1015 = vadd.xlane.f32.xlu2 %v1014_v24  ;;  %v978_v27 = vpop.f32.mrf.mxu1  ;;  %v4566_v23 = vpop.eup %4565 }
 0x2d3   :  { %v979_v28 = vadd.f32 %v4535_v59, %v978_v27  ;;  %v4568_v24 = vpop.eup %4567  ;;  %v409_v27 = vmul.f32 %v4564_v22, %v5170_v58  ;;  %v397_v29 = vmul.f32 %v4566_v23, %v5163_v42 }
 0x2d5   :  { %v989_v32 = vmax.f32 %v979_v28, 0.0  ;;  %v4570_v28 = vpop.eup %4569  ;;  %v398_v36 = vmul.f32 %v4566_v23, %v397_v29 }
 0x2d6   :  { %v4572_v31 = vpop.eup %4571  ;;  %v373_v34 = vmul.f32 %v4570_v28, %v5149_v16 }
 0x2d7   :  { %v1000_v33 = vmul.f32 %v4536_v6, %v989_v32  ;;  %v410_v32 = vmul.f32 %v4564_v22, %v409_v27  ;;  %v406_v27 = vand.u32 2147483648, %v5163_v42 }
 0x2d8   :  { %v374_v51 = vmul.f32 %v4570_v28, %v373_v34 }
 0x2d9   :  { %v1017_v37 = vsel %vm616_vm6, %v1000_v33, 0.0  ;;  %v411_v44 = vmul.f32 0.5, %v410_v32 }
 0x2da   :  { %1018 = vadd.xlane.f32.xlu0 %v1017_v37  ;;  %v981_v38 = vpop.f32.mrf.mxu1  ;;  %v4574_v37 = vpop.eup %4573 }
 0x2db   :  { %v982_v43 = vadd.f32 %v4535_v59, %v981_v38  ;;  %v134_v59 = vsel %vm133_vm9, %v4562_v8, %v130_v17  ;;  %v361_v38 = vmul.f32 %v4572_v31, %v5142_v62  ;;  %v349_v54 = vmul.f32 %v4574_v37, %v5137_v53 }
 0x2dc   :  { %v5223_v19 = vsel %vm136_vm10, %v138_v45, %v134_v59  ;;  %v412_v60 = vsub.f32 1.5, %v411_v44  ;;  %vm393_vm9 = vcmp.eq.f32.partialorder %v5157_v26, 0.0  ;;  %vm367_vm10 = vcmp.eq.f32.partialorder %v5142_v62, inf }
 0x2dd   :  { %v990_v52 = vmax.f32 %v982_v43, 0.0  ;;  %v142_v21 = vmul.f32 %v5223_v19, %v4903_v5  ;;  %v385_v5 = vmul.f32 %v4568_v24, %v5157_v26  ;;  %v143_v33 = vmul.f32 %v5223_v19, %v4914_v7 }
 0x2de   :  { %v144_v7 = vmul.f32 %v5223_v19, %v4925_v9  ;;  %v350_v0 = vmul.f32 %v4574_v37, %v349_v54  ;;  %v413_v50 = vmul.f32 %v4564_v22, %v412_v60  ;;  %v145_v9 = vmul.f32 %v5223_v19, %v4943_v12 }
 0x2df   :  { %v1001_v56 = vmul.f32 %v4536_v6, %v990_v52  ;;  %v141_v6 = vmul.f32 %v5223_v19, %v4891_v3  ;;  %v5235_v3 = vpop.trf.xlu1  ;;  %v386_v43 = vmul.f32 %v4568_v24, %v385_v5  ;;  %v399_v52 = vmul.f32 0.5, %v398_v36 }
 0x2e0   :  { %4203 = vmatmul.msk.f32.vlgmr.msrb.gmra.mxu3 %vm1062_vm11, %v5235_v3  ;;  %v351_v39 = vmul.f32 0.5, %v350_v0  ;;  %v414_v17 = vmul.f32 %v413_v50, %v5170_v58  ;;  %v418_v22 = vand.u32 2147483648, %v5170_v58  ;;  %v146_v36 = vmul.f32 %v5223_v19, %v4954_v14 }
 0x2e1   :  { %v1020_v46 = vsel %vm616_vm6, %v1001_v56, 0.0  ;;  %v362_v56 = vmul.f32 %v4572_v31, %v361_v38  ;;  %v387_v57 = vmul.f32 0.5, %v386_v43  ;;  %v400_v63 = vsub.f32 1.5, %v399_v52 }
 0x2e2   :  { %1006 = vadd.xlane.f32.xlu0 %v1005_v61  ;;  %1021 = vadd.xlane.f32.xlu2 %v1020_v46  ;;  %v4576_v61 = vpop.eup %4575  ;;  %v375_v46 = vmul.f32 0.5, %v374_v51  ;;  %v352_v59 = vsub.f32 1.5, %v351_v39 }
 0x2e3   :  { %v363_v1 = vmul.f32 0.5, %v362_v56  ;;  %v388_v2 = vsub.f32 1.5, %v387_v57 }
 0x2e4   :  { %v376_v8 = vsub.f32 1.5, %v375_v46  ;;  %v353_v5 = vmul.f32 %v4574_v37, %v352_v59  ;;  %v370_v37 = vand.u32 2147483648, %v5142_v62 }
 0x2e5   :  { %v364_v47 = vsub.f32 1.5, %v363_v1  ;;  %v389_v11 = vmul.f32 %v4568_v24, %v388_v2  ;;  %v416_v24 = vsel %vm415_vm12, %v5170_v58, %v414_v17  ;;  %vm381_vm12 = vcmp.eq.f32.partialorder %v5149_v16, 0.0 }
 0x2e6   :  { %v377_v18 = vmul.f32 %v4570_v28, %v376_v8  ;;  %v394_v28 = vand.u32 2147483648, %v5157_v26  ;;  %v419_v58 = vsel %vm417_vm15, %v418_v22, %v416_v24  ;;  %v354_v43 = vmul.f32 %v353_v5, %v5137_v53 }
 0x2e7   :  { %vm357_vm15 = vcmp.eq.f32.partialorder %v5137_v53, 0.0 }
 0x2e8   :  { %v378_v12 = vmul.f32 %v377_v18, %v5149_v16 }
 0x2ea   :  { %1009 = vadd.xlane.f32.xlu2 %v1008_v4  ;;  %v337_v4 = vmul.f32 %v4576_v61, %v5127_v41  ;;  %v380_v38 = vsel %vm379_vm7, %v5149_v16, %v378_v12  ;;  %vm343_vm7 = vcmp.eq.f32.partialorder %v5127_v41, inf }
 0x2ec   :  { %v338_v13 = vmul.f32 %v4576_v61, %v337_v4 }
 0x2f2   :  { %1003 = vadd.xlane.f32.xlu2 %v1002_v10  ;;  %v401_v10 = vmul.f32 %v4566_v23, %v400_v63  ;;  %v339_v23 = vmul.f32 0.5, %v338_v13 }
 0x2f4   :  { %v402_v45 = vmul.f32 %v401_v10, %v5163_v42  ;;  %v340_v34 = vsub.f32 1.5, %v339_v23 }
 0x2f6   :  { %v404_v29 = vsel %vm403_vm13, %v5163_v42, %v402_v45  ;;  %vm369_vm13 = vcmp.eq.f32.partialorder %v5142_v62, 0.0  ;;  %v341_v52 = vmul.f32 %v4576_v61, %v340_v34  ;;  %v147_v61 = vmul.f32 %v5223_v19, %v4961_v15 }
 0x2f7   :  { %v407_v42 = vsel %vm405_vm8, %v406_v27, %v404_v29  ;;  %vm345_vm8 = vcmp.eq.f32.partialorder %v5127_v41, 0.0 }
 0x2f8   :  { %v5284_v54 = vadd.f32 1e-08, %v407_v42 }
 0x2fa   :  { %v513_v34 = vand.u32 2147483648, %v5284_v54 }
 0x30b   :  { %1030 = vxpose.xlu0.b32.start [1/7] (short) (narrow) %v141_v6, 8  ;;  %v365_v6 = vmul.f32 %v4572_v31, %v364_v47 }
 0x30d   :  { %v366_v31 = vmul.f32 %v365_v6, %v5142_v62 }
 0x30f   :  { %v368_v51 = vsel %vm367_vm10, %v5142_v62, %v366_v31  ;;  %v342_v62 = vmul.f32 %v341_v52, %v5127_v41 }
 0x310   :  { %v371_v60 = vsel %vm369_vm13, %v370_v37, %v368_v51  ;;  %v511_v37 = vand.u32 2147483647, %v5284_v54 }
 0x311   :  { %v5300_v63 = vadd.f32 1e-08, %v371_v60  ;;  %v344_v1 = vsel %vm343_vm7, %v5127_v41, %v342_v62 }
 0x313   :  { %1031 = vxpose.xlu0.b32.cont [2/7] (short) (narrow) %v142_v21, 8  ;;  %v390_v21 = vmul.f32 %v389_v11, %v5157_v26  ;;  %v468_v22 = vand.u32 2147483648, %v5300_v63  ;;  %vm462_vm13 = vweird.f32 %v5300_v63 }
 0x315   :  { %v392_v32 = vsel %vm391_vm14, %v5157_v26, %v390_v21  ;;  %v5279_v26 = vadd.f32 1e-08, %v419_v58  ;;  %vm355_vm14 = vcmp.eq.f32.partialorder %v5137_v53, inf  ;;  %v466_v21 = vand.u32 2147483647, %v5300_v63 }
 0x316   :  { %v395_v44 = vsel %vm393_vm9, %v394_v28, %v392_v32  ;;  %v356_v57 = vsel %vm355_vm14, %v5137_v53, %v354_v43  ;;  %vm507_vm14 = vweird.f32 %v5284_v54 }
 0x317   :  { %v5287_v56 = vadd.f32 1e-08, %v395_v44  ;;  %4577 = vrcp.f32 %v5279_v26  ;;  %vm522_vm10 = vweird.f32 %v5279_v26  ;;  %v528_v28 = vand.u32 2147483648, %v5279_v26 }
 0x318   :  { %4579 = vrcp.f32 %v5284_v54  ;;  %v526_v31 = vand.u32 2147483647, %v5279_v26 }
 0x319   :  { %4581 = vrcp.f32 %v5287_v56  ;;  %vm492_vm7 = vweird.f32 %v5287_v56  ;;  %v496_v51 = vand.u32 2147483647, %v5287_v56 }
 0x31a   :  { %vm527_vm5 = vcmp.eq.f32.partialorder %v526_v31, 8.507059e+37 }
 0x31b   :  { %1032 = vxpose.xlu0.b32.cont [3/7] (short) (narrow) %v143_v33, 8  ;;  %v382_v33 = vand.u32 2147483648, %v5149_v16  ;;  %v358_v16 = vand.u32 2147483648, %v5137_v53  ;;  %v346_v53 = vand.u32 2147483648, %v5127_v41 }
 0x31d   :  { %v383_v14 = vsel %vm381_vm12, %v382_v33, %v380_v38  ;;  %v359_v46 = vsel %vm357_vm15, %v358_v16, %v356_v57  ;;  %v5304_v0 = vpop.eup %4577  ;;  %v347_v50 = vsel %vm345_vm8, %v346_v53, %v344_v1  ;;  %v498_v38 = vand.u32 2147483648, %v5287_v56  ;;  %v1142_v16 = vld [vmem:[%s7367_s21] sm:$0xff] }
 0x31e   :  { %v5308_v15 = vadd.f32 1e-08, %v359_v46  ;;  %v5311_v19 = vpop.eup %4579  ;;  %v518_v4 = vmul.f32 %v5304_v0, %v5279_v26  ;;  %v5324_v39 = vadd.f32 1e-08, %v347_v50  ;;  %vm523_vm12 = vweird.f32 %v5304_v0  ;;  %v1204_v46 = vld [vmem:[%s7370_s24 + $0x10] sm:$0xff] }
 0x31f   :  { %v5313_v2 = vpop.eup %4581  ;;  %v503_v41 = vmul.f32 %v5311_v19, %v5284_v54  ;;  %vm508_vm15 = vweird.f32 %v5311_v19  ;;  %vm5364_vm1 = vmor %vm522_vm10, %vm523_vm12  ;;  %v499_v53 = vor.u32 1.1754944e-38, %v498_v38 }
 0x320   :  { %v488_v10 = vmul.f32 %v5313_v2, %v5287_v56  ;;  %v519_v11 = vsub.f32 1.0, %v518_v4  ;;  %vm493_vm8 = vweird.f32 %v5313_v2  ;;  %vm5378_vm10 = vmor %vm507_vm14, %vm508_vm15  ;;  %v4679_v4 = vld [vmem:[%s7406_s4] sm:$0xff]  ;;  %s7498_s4 = sld [smem:[#allocation15_spill]] }
 0x321   :  { %v504_v17 = vsub.f32 1.0, %v503_v41  ;;  %vm5382_vm12 = vmor %vm492_vm7, %vm493_vm8 }
 0x322   :  { %v489_v18 = vsub.f32 1.0, %v488_v10  ;;  %v520_v59 = vmul.f32 %v5304_v0, %v519_v11 }
 0x323   :  { %1033 = vxpose.xlu0.b32.cont [4/7] (short) (narrow) %v144_v7, 8  ;;  %v5292_v7 = vadd.f32 1e-08, %v383_v14  ;;  %v505_v23 = vmul.f32 %v5311_v19, %v504_v17  ;;  %v529_v14 = vor.u32 1.1754944e-38, %v528_v28 }
 0x324   :  { %v490_v27 = vmul.f32 %v5313_v2, %v489_v18  ;;  %v521_v5 = vadd.f32 %v5304_v0, %v520_v59  ;;  %v453_v18 = vand.u32 2147483648, %v5308_v15 }
 0x325   :  { %4583 = vrcp.f32 %v5292_v7  ;;  %vm477_vm9 = vweird.f32 %v5292_v7  ;;  %v481_v12 = vand.u32 2147483647, %v5292_v7  ;;  %v506_v42 = vadd.f32 %v5311_v19, %v505_v23  ;;  %v4687_v23 = vld [vmem:[%s7408_s8 + $0x18] sm:$0xff] }
 0x326   :  { %4585 = vrcp.f32 %v5300_v63  ;;  %v491_v44 = vadd.f32 %v5313_v2, %v490_v27  ;;  %v525_v57 = vsel %vm5364_vm1, %v5304_v0, %v521_v5  ;;  %v483_v62 = vand.u32 2147483648, %v5292_v7 }
 0x327   :  { %4587 = vrcp.f32 %v5308_v15  ;;  %v510_v0 = vsel %vm5378_vm10, %v5311_v19, %v506_v42  ;;  %vm512_vm1 = vcmp.eq.f32.partialorder %v511_v37, 8.507059e+37  ;;  %vm5407_vm7 = vcmp.eq.f32.partialorder %v481_v12, 8.507059e+37 }
 0x328   :  { %4589 = vrcp.f32 %v5324_v39  ;;  %v530_v50 = vsel %vm527_vm5, %v529_v14, %v525_v57  ;;  %v484_v11 = vor.u32 1.1754944e-38, %v483_v62  ;;  %v469_v12 = vor.u32 1.1754944e-38, %v468_v22  ;;  %v1148_v57 = vld [vmem:[%s7368_s22 + $0x10] sm:$0xff] }
 0x329   :  { %v454_v31 = vor.u32 1.1754944e-38, %v453_v18  ;;  %v4682_v18 = vld [vmem:[%s7409_s1 + $0x8] sm:$0xff] }
 0x32b   :  { %1034 = vxpose.xlu0.b32.cont [5/7] (short) (narrow) %v145_v9, 8  ;;  %v5318_v8 = vpop.eup %4583 }
 0x32c   :  { %v5326_v47 = vpop.eup %4585  ;;  %v473_v13 = vmul.f32 %v5318_v8, %v5292_v7  ;;  %vm478_vm0 = vweird.f32 %v5318_v8  ;;  %v495_v7 = vsel %vm5382_vm12, %v5313_v2, %v491_v44  ;;  %vm467_vm12 = vcmp.eq.f32.partialorder %v466_v21, 8.507059e+37  ;;  %v4683_v2 = vld [vmem:[%s7408_s8 + $0x8] sm:$0xff] }
 0x32d   :  { %v5330_v9 = vpop.eup %4587  ;;  %v458_v45 = vmul.f32 %v5326_v47, %v5300_v63  ;;  %vm463_vm14 = vweird.f32 %v5326_v47  ;;  %vm5399_vm15 = vmor %vm477_vm9, %vm478_vm0  ;;  %vm497_vm0 = vcmp.eq.f32.partialorder %v496_v51, 8.507059e+37  ;;  %vm447_vm9 = vweird.f32 %v5308_v15 }
 0x32e   :  { %v474_v6 = vsub.f32 1.0, %v473_v13  ;;  %v443_v24 = vmul.f32 %v5330_v9, %v5308_v15  ;;  %v5352_v32 = vpop.eup %4589  ;;  %vm448_vm8 = vweird.f32 %v5330_v9  ;;  %vm5425_vm5 = vmor %vm462_vm13, %vm463_vm14  ;;  %vm432_vm13 = vweird.f32 %v5324_v39 }
 0x32f   :  { %v459_v29 = vsub.f32 1.0, %v458_v45  ;;  %v428_v60 = vmul.f32 %v5352_v32, %v5324_v39  ;;  %v500_v45 = vsel %vm497_vm0, %v499_v53, %v495_v7  ;;  %vm5432_vm10 = vmor %vm447_vm9, %vm448_vm8  ;;  %v1203_v53 = vld [vmem:[%s7370_s24 + $0x8] sm:$0xff]  ;;  %vm7430_vm0 = vcmask 15360  }
 0x330   :  { %v475_v58 = vmul.f32 %v5318_v8, %v474_v6  ;;  %v444_v43 = vsub.f32 1.0, %v443_v24  ;;  %v451_v6 = vand.u32 2147483647, %v5308_v15  ;;  %v501_v5 = vmul.f32 %v500_v45, %v4998_v35  ;;  %vm7431_vm9 = vmmov %vm7430_vm0 }
 0x331   :  { %v460_v56 = vmul.f32 %v5326_v47, %v459_v29  ;;  %v429_v19 = vsub.f32 1.0, %v428_v60  ;;  %v1146_v60 = vld [vmem:[%s7368_s22] sm:$0xff]  ;;  %vm7432_vm8 = vmmov %vm7430_vm0 }
 0x332   :  { %v476_v54 = vadd.f32 %v5318_v8, %v475_v58  ;;  %v445_v1 = vmul.f32 %v5330_v9, %v444_v43  ;;  %vm452_vm14 = vcmp.eq.f32.partialorder %v451_v6, 8.507059e+37  ;;  %v4685_v6 = vld [vmem:[%s7408_s8 + $0x10] sm:$0xff] }
 0x333   :  { %1035 = vxpose.xlu0.b32.cont [6/7] (short) (narrow) %v146_v36, 8  ;;  %v461_v41 = vadd.f32 %v5326_v47, %v460_v56  ;;  %v1147_v56 = vld [vmem:[%s7368_s22 + $0x8] sm:$0xff] }
 0x334   :  { %v480_v10 = vsel %vm5399_vm15, %v5318_v8, %v476_v54  ;;  %v446_v59 = vadd.f32 %v5330_v9, %v445_v1  ;;  %v531_v8 = vmul.f32 %v530_v50, %v5037_v55  ;;  %v430_v55 = vmul.f32 %v5352_v32, %v429_v19  ;;  %v4680_v50 = vld [vmem:[%s7409_s1] sm:$0xff] }
 0x335   :  { %v465_v15 = vsel %vm5425_vm5, %v5326_v47, %v461_v41  ;;  %v485_v29 = vsel %vm5407_vm7, %v484_v11, %v480_v10  ;;  %vm433_vm15 = vweird.f32 %v5352_v32  ;;  %v438_v47 = vand.u32 2147483648, %v5324_v39  ;;  %v4681_v41 = vld [vmem:[%s7408_s8] sm:$0xff]  ;;  %vm7433_vm5 = vmmov %vm7430_vm0 }
 0x336   :  { %v470_v63 = vsel %vm467_vm12, %v469_v12, %v465_v15  ;;  %v486_v22 = vmul.f32 %v485_v29, %v4990_v30  ;;  %v431_v35 = vadd.f32 %v5352_v32, %v430_v55  ;;  %v4537_v10 = vld [vmem:[%s7369_s23] ss:$0 sm:$0xff]  ;;  %v5579_v15 = vld [vmem:[%s7409_s1 + $0x30] sm:$0xff]  ;;  %vm7435_vm12 = vmmov %vm7430_vm0 }
 0x337   :  { %v439_v43 = vor.u32 1.1754944e-38, %v438_v47  ;;  %v5558_v12 = vld [vmem:[%s7408_s8 + $0x20] sm:$0xff]  ;;  %v4693_v55 = vld [vmem:[%s7408_s8 + $0x30] sm:$0xff] }
 0x33b   :  { %1036 = vxpose.xlu0.b32.end [7/7] (short) (narrow) %v147_v61, 8  ;;  %v514_v61 = vor.u32 1.1754944e-38, %v513_v34  ;;  %v436_v34 = vand.u32 2147483647, %v5324_v39 }
 0x33d   :  { %v5355_v33 = vpop.xlane.xlu0 %1012  ;;  %v515_v13 = vsel %vm512_vm1, %v514_v61, %v510_v0  ;;  %vm434_vm1 = vmor %vm432_vm13, %vm433_vm15  ;;  %vm437_vm7 = vcmp.eq.f32.partialorder %v436_v34, 8.507059e+37  ;;  %v1205_v61 = vld [vmem:[%s7370_s24 + $0x18] sm:$0xff]  ;;  %v1202_v0 = vld [vmem:[%s7370_s24] sm:$0xff] }
 0x33e   :  { %v516_v27 = vmul.f32 %v515_v13, %v5006_v40  ;;  %v450_v40 = vsel %vm5432_vm10, %v5330_v9, %v446_v59  ;;  %v1026_v38 = vmul.f32 %v5355_v33, %v486_v22  ;;  %v471_v9 = vmul.f32 %v470_v63, %v4982_v25  ;;  %v1145_v25 = vld [vmem:[%s7367_s21 + $0x18] sm:$0xff]  ;;  %1221 = vmatpush.msra.mxu3 %v1205_v61  ;;  %v4684_v59 = vld [vmem:[%s7409_s1 + $0x10] sm:$0xff]  ;;  %vm7434_vm10 = vmmov %vm7430_vm0 }
 0x33f   :  { %v455_v36 = vsel %vm452_vm14, %v454_v31, %v450_v40  ;;  %v435_v30 = vsel %vm434_vm1, %v5352_v32, %v431_v35  ;;  %v1149_v32 = vld [vmem:[%s7368_s22 + $0x18] sm:$0xff]  ;;  %vm7436_vm13 = vmmov %vm7430_vm0 }
 0x340   :  { %v456_v44 = vmul.f32 %v455_v36, %v5029_v49  ;;  %v440_v39 = vsel %vm437_vm7, %v439_v43, %v435_v30  ;;  %v1144_v49 = vld [vmem:[%s7367_s21 + $0x10] sm:$0xff]  ;;  %1165 = vmatpush.msrb.mxu0 %v1149_v32  ;;  %1222 = vmatpush.msra.mxu3 %v1204_v46 }
 0x341   :  { %v441_v26 = vmul.f32 %v440_v39, %v5027_v48  ;;  %v1143_v48 = vld [vmem:[%s7367_s21 + $0x8] sm:$0xff] }
 0x342   :  { %1166 = vmatpush.msrb.mxu0 %v1148_v57  ;;  %1223 = vmatpush.msra.mxu3 %v1203_v53 }
 0x344   :  { %1167 = vmatpush.msrb.mxu0 %v1147_v56  ;;  %1224 = vmatpush.msra.mxu3 %v1202_v0 }
 0x345   :  { %v1016_v52 = vpop.xlane.xlu2 %1015 }
 0x346   :  { %v1027_v58 = vmul.f32 %v1016_v52, %v501_v5  ;;  %1168 = vmatpush.msrb.mxu0 %v1146_v60 }
 0x34d   :  { %v1019_v17 = vpop.xlane.xlu0 %1018 }
 0x34e   :  { %v1028_v21 = vmul.f32 %v1019_v17, %v516_v27  ;;  %v5565_v27 = vld [vmem:[%s7409_s1 + $0x28] sm:$0xff] }
 0x355   :  { %v1022_v24 = vpop.xlane.xlu2 %1021  ;;  %v1007_v42 = vpop.xlane.xlu0 %1006 }
 0x356   :  { %v1029_v28 = vmul.f32 %v1022_v24, %v531_v8  ;;  %v1024_v52 = vmul.f32 %v1007_v42, %v456_v44  ;;  %v4686_v8 = vld [vmem:[%s7409_s1 + $0x18] sm:$0xff]  ;;  %v5551_v24 = vld [vmem:[%s7409_s1 + $0x20] sm:$0xff] }
 0x358   :  { %1075 = vmatpush.msra.mxu2 %v1029_v28  ;;  %v5572_v28 = vld [vmem:[%s7408_s8 + $0x28] sm:$0xff] }
 0x35a   :  { %1076 = vmatpush.msra.mxu2 %v1028_v21 }
 0x35c   :  { %1077 = vmatpush.msra.mxu2 %v1027_v58  ;;  %v4538_v58 = vld [vmem:[%s7371_s25] ss:$0 sm:$0xff] }
 0x35d   :  { %v1010_v37 = vpop.xlane.xlu2 %1009 }
 0x35e   :  { %v1025_v51 = vmul.f32 %v1010_v37, %v471_v9  ;;  %1078 = vmatpush.msra.mxu2 %v1026_v38 }
 0x360   :  { %1079 = vmatpush.msra.mxu2 %v1025_v51 }
 0x362   :  { %1080 = vmatpush.msra.mxu2 %v1024_v52 }
 0x363   :  { %v1139_v54 = vpop.f32.mrf.mxu3 }
 0x364   :  { %4204 = vmatmul.msk.f32.vlgmr.msrb.gmra.mxu0 %vm616_vm6, %v1139_v54 }
 0x365   :  { %v1004_v33 = vpop.xlane.xlu2 %1003 }
 0x366   :  { %v1023_v14 = vmul.f32 %v1004_v33, %v441_v26 }
 0x368   :  { %1081 = vmatpush.msra.mxu2 %v1023_v14 }
 0x36a   :  { %1188 = vmatpush.msrb.mxu2 %v1145_v25 }
 0x36c   :  { %1189 = vmatpush.msrb.mxu2 %v1144_v49 }
 0x36e   :  { %1190 = vmatpush.msrb.mxu2 %v1143_v48 }
 0x370   :  { %1191 = vmatpush.msrb.mxu2 %v1142_v16 }
 0x3af   :  { %v5487_v62 = vpop.trf.xlu0 }
 0x3b0   :  { %4202 = vmatmul.msk.f32.vlgmr.msra.gmra.mxu2 %vm1062_vm11, %v5487_v62 }
 0x3b8   :  { %4205 = vmatmul.msk.f32.vlgmr.msrb.gmra.mxu2 %vm616_vm6, %v4972_v20 }
 0x3e1   :  { %v1170_v19 = vpop.f32.mrf.mxu0 }
 0x433   :  { %v1083_v1 = vpop.f32.mrf.mxu2 }
 0x434   :  { %v5508_v7 = vadd.f32 %v4679_v4, %v1083_v1  ;;  %v4238_v4 = vld [vmem:[%s7411_s29 + $0x38] sm:$0xff] }
 0x436   :  { %1250 = vmatpush.msra.mxu0 %v5508_v7  ;;  %1288 = vmatpush.msra.mxu2 %v5508_v7 }
 0x437   :  { %4214 = vmatmul.msk.f32.vlgmr.msra.gmra.mxu2 %vm105_vm2, %v4680_v50  ;;  %4207 = vmatmul.msk.f32.vlgmr.msra.gmra.mxu0 %vm105_vm2, %v4681_v41 }
 0x438   :  { %1720 = vmatpush.msrb.mxu2 %v4238_v4 }
 0x43b   :  { %v1193_v11 = vpop.f32.mrf.mxu2 }
 0x43c   :  { %v1194_v13 = vadd.f32 %v1193_v11, %v1170_v19  ;;  %v4242_v19 = vld [vmem:[%s7412_s27 + $0x38] sm:$0xff]  ;;  %v4241_v11 = vld [vmem:[%s7412_s27 + $0x30] sm:$0xff] }
 0x43d   :  { %1661 = vmatpush.msrb.mxu0 %v4242_v19 }
 0x43e   :  { %v1200_v17 = vadd.f32 %v4537_v10, %v1194_v13  ;;  %v4235_v10 = vld [vmem:[%s7411_s29 + $0x20] sm:$0xff]  ;;  %v4240_v13 = vld [vmem:[%s7412_s27 + $0x28] sm:$0xff] }
 0x43f   :  { %4215 = vmatmul.msk.f32.gmra.mxu2 %vm105_vm2, %v4682_v18  ;;  %4208 = vmatmul.msk.f32.gmra.mxu0 %vm105_vm2, %v4683_v2 }
 0x440   :  { %v1201_v45 = vmax.f32 %v1200_v17, 0.0  ;;  %1662 = vmatpush.msrb.mxu0 %v4241_v11  ;;  %v4258_v17 = vld [vmem:[%s7413_s7 + $0x2] sm:$0x3] }
 0x442   :  { %4206 = vmatmul.msk.f32.vlgmr.msra.gmra.mxu3 %vm616_vm6, %v1201_v45  ;;  %1663 = vmatpush.msrb.mxu0 %v4240_v13  ;;  %v4695_v45 = vld [vmem:[%s7414_s13 + $0x8] sm:$0xff] }
 0x447   :  { %4216 = vmatmul.msk.f32.gmra.mxu2 %vm105_vm2, %v4684_v59  ;;  %4209 = vmatmul.msk.f32.gmra.mxu0 %vm105_vm2, %v4685_v6 }
 0x44f   :  { %4217 = vmatmul.msk.f32.gmra.mxu2 %vm105_vm2, %v4686_v8  ;;  %4210 = vmatmul.msk.f32.gmra.mxu0 %vm105_vm2, %v4687_v23 }
 0x457   :  { %4218 = vmatmul.msk.f32.gmra.mxu2 %vm105_vm2, %v5551_v24  ;;  %4211 = vmatmul.msk.f32.gmra.mxu0 %vm105_vm2, %v5558_v12 }
 0x45f   :  { %4219 = vmatmul.msk.f32.gmra.mxu2 %vm105_vm2, %v5565_v27  ;;  %4212 = vmatmul.msk.f32.gmra.mxu0 %vm105_vm2, %v5572_v28 }
 0x467   :  { %4220 = vmatmul.msk.f32.gmra.mxu2 %vm105_vm2, %v5579_v15  ;;  %4213 = vmatmul.msk.f32.gmra.mxu0 %vm105_vm2, %v4693_v55 }
 0x4b4   :  { %v1252_v29 = vpop.f32.mrf.mxu0 }
 0x4ba   :  { %v1290_v5 = vpop.f32.mrf.mxu2 }
 0x4bb   :  { %v5587_v31 = vsub.f32 %v1252_v29, %v1290_v5 }
 0x4bc   :  { %v1255_v21 = vpop.f32.mrf.mxu0 }
 0x4bd   :  { %v1318_v40 = vmul.f32 %v5587_v31, %v5587_v31 }
 0x4bf   :  { %v1325_v63 = vsel %vm314_vm3, %v1318_v40, 0.0 }
 0x4c0   :  { %1326 = vadd.xlane.f32.xlu2 %v1325_v63 }
 0x4c2   :  { %v1293_v47 = vpop.f32.mrf.mxu2 }
 0x4c3   :  { %v5592_v22 = vsub.f32 %v1255_v21, %v1293_v47  ;;  %v4700_v21 = vld [vmem:[%s7414_s13 + $0x30] sm:$0xff] }
 0x4c4   :  { %v1258_v35 = vpop.f32.mrf.mxu0 }
 0x4c5   :  { %v1226_v34 = vpop.f32.mrf.mxu3  ;;  %v1319_v36 = vmul.f32 %v5592_v22, %v5592_v22 }
 0x4c6   :  { %v1229_v38 = vadd.f32 %v1226_v34, %v4972_v20 }
 0x4c7   :  { %v1328_v9 = vsel %vm314_vm3, %v1319_v36, 0.0  ;;  %v4271_v36 = vld [vmem:[%s7363_s16 + $0x38] sm:$0xff] }
 0x4c8   :  { %v5601_v42 = vadd.f32 %v4538_v58, %v1229_v38  ;;  %1329 = vadd.xlane.f32.xlu2 %v1328_v9  ;;  %v4270_v38 = vld [vmem:[%s7363_s16 + $0x30] sm:$0xff]  ;;  %v4269_v9 = vld [vmem:[%s7363_s16 + $0x28] sm:$0xff] }
 0x4ca   :  { %v1296_v37 = vpop.f32.mrf.mxu2  ;;  %1557 = vmatpush.msrb.mxu3 %v5601_v42  ;;  %1595 = vmatpush.msra.mxu1 %v5601_v42 }
 0x4cb   :  { %v5605_v43 = vsub.f32 %v1258_v35, %v1296_v37  ;;  %4221 = vmatmul.msk.f32.vlgmr.msrb.gmra.mxu3 %vm105_vm2, %v4681_v41  ;;  %4228 = vmatmul.msk.f32.vlgmr.msra.gmra.mxu1 %vm105_vm2, %v4680_v50  ;;  %v4237_v50 = vld [vmem:[%s7411_s29 + $0x30] sm:$0xff]  ;;  %v4236_v41 = vld [vmem:[%s7411_s29 + $0x28] sm:$0xff]  ;;  %v4268_v37 = vld [vmem:[%s7363_s16 + $0x20] sm:$0xff] }
 0x4cc   :  { %v1261_v44 = vpop.f32.mrf.mxu0  ;;  %1721 = vmatpush.msrb.mxu2 %v4237_v50  ;;  %4259 = vmatpush.msk.msra.mxu3 %vm7390_vm4, %v4258_v17 }
 0x4cd   :  { %v1320_v51 = vmul.f32 %v5605_v43, %v5605_v43  ;;  %1877 = vmatpush.msrb.mxu1 %v4271_v36 }
 0x4ce   :  { %1722 = vmatpush.msrb.mxu2 %v4236_v41 }
 0x4cf   :  { %v1331_v30 = vsel %vm314_vm3, %v1320_v51, 0.0  ;;  %1878 = vmatpush.msrb.mxu1 %v4270_v38 }
 0x4d0   :  { %1332 = vadd.xlane.f32.xlu2 %v1331_v30  ;;  %1723 = vmatpush.msrb.mxu2 %v4235_v10 }
 0x4d1   :  { %1879 = vmatpush.msrb.mxu1 %v4269_v9 }
 0x4d2   :  { %v1299_v52 = vpop.f32.mrf.mxu2 }
 0x4d3   :  { %v5612_v39 = vsub.f32 %v1261_v44, %v1299_v52  ;;  %4222 = vmatmul.msk.f32.gmra.mxu3 %vm105_vm2, %v4683_v2  ;;  %4229 = vmatmul.msk.f32.gmra.mxu1 %vm105_vm2, %v4682_v18  ;;  %v4694_v18 = vld [vmem:[%s7414_s13] sm:$0xff] }
 0x4d4   :  { %v1264_v26 = vpop.f32.mrf.mxu0  ;;  %v4239_v2 = vld [vmem:[%s7412_s27 + $0x20] sm:$0xff]  ;;  %1880 = vmatpush.msrb.mxu1 %v4268_v37 }
 0x4d5   :  { %v1321_v33 = vmul.f32 %v5612_v39, %v5612_v39  ;;  %1664 = vmatpush.msrb.mxu0 %v4239_v2 }
 0x4d7   :  { %v1334_v14 = vsel %vm314_vm3, %v1321_v33, 0.0 }
 0x4d8   :  { %1335 = vadd.xlane.f32.xlu2 %v1334_v14 }
 0x4da   :  { %v1302_v25 = vpop.f32.mrf.mxu2 }
 0x4db   :  { %v5619_v49 = vsub.f32 %v1264_v26, %v1302_v25  ;;  %4223 = vmatmul.msk.f32.gmra.mxu3 %vm105_vm2, %v4685_v6  ;;  %4230 = vmatmul.msk.f32.gmra.mxu1 %vm105_vm2, %v4684_v59  ;;  %v4696_v59 = vld [vmem:[%s7414_s13 + $0x10] sm:$0xff]  ;;  %v5738_v26 = vld [vmem:[%s7415_s26 + $0x1] ss:$0 sm:$0xff] }
 0x4dc   :  { %v1267_v48 = vpop.f32.mrf.mxu0 }
 0x4dd   :  { %v1322_v32 = vmul.f32 %v5619_v49, %v5619_v49 }
 0x4df   :  { %v1337_v16 = vsel %vm314_vm3, %v1322_v32, 0.0 }
 0x4e0   :  { %1338 = vadd.xlane.f32.xlu2 %v1337_v16 }
 0x4e2   :  { %v1305_v57 = vpop.f32.mrf.mxu2 }
 0x4e3   :  { %v5626_v56 = vsub.f32 %v1267_v48, %v1305_v57  ;;  %4224 = vmatmul.msk.f32.gmra.mxu3 %vm105_vm2, %v4687_v23  ;;  %4231 = vmatmul.msk.f32.gmra.mxu1 %vm105_vm2, %v4686_v8  ;;  %v4697_v23 = vld [vmem:[%s7414_s13 + $0x18] sm:$0xff]  ;;  %v5745_v57 = vld [vmem:[%s7361_s15 + $0x1] ss:$0 sm:$0xff] }
 0x4e4   :  { %v1270_v61 = vpop.f32.mrf.mxu0 }
 0x4e5   :  { %v1323_v60 = vmul.f32 %v5626_v56, %v5626_v56 }
 0x4e7   :  { %v1340_v54 = vsel %vm314_vm3, %v1323_v60, 0.0 }
 0x4e8   :  { %1341 = vadd.xlane.f32.xlu2 %v1340_v54 }
 0x4ea   :  { %v1308_v46 = vpop.f32.mrf.mxu2 }
 0x4eb   :  { %v5633_v53 = vsub.f32 %v1270_v61, %v1308_v46  ;;  %4225 = vmatmul.msk.f32.gmra.mxu3 %vm105_vm2, %v5558_v12  ;;  %4232 = vmatmul.msk.f32.gmra.mxu1 %vm105_vm2, %v5551_v24 }
 0x4ed   :  { %v1324_v0 = vmul.f32 %v5633_v53, %v5633_v53 }
 0x4ef   :  { %v1343_v1 = vsel %vm314_vm3, %v1324_v0, 0.0 }
 0x4f0   :  { %1344 = vadd.xlane.f32.xlu2 %v1343_v1 }
 0x4f3   :  { %4226 = vmatmul.msk.f32.gmra.mxu3 %vm105_vm2, %v5572_v28  ;;  %4233 = vmatmul.msk.f32.gmra.mxu1 %vm105_vm2, %v5565_v27  ;;  %v4698_v27 = vld [vmem:[%s7414_s13 + $0x20] sm:$0xff] }
 0x4fb   :  { %4227 = vmatmul.msk.f32.gmra.mxu3 %vm105_vm2, %v4693_v55  ;;  %4234 = vmatmul.msk.f32.gmra.mxu1 %vm105_vm2, %v5579_v15  ;;  %v4699_v55 = vld [vmem:[%s7414_s13 + $0x28] sm:$0xff] }
 0x503   :  { %4260 = vmatmul.msk.f32.vlgmr.msra.gmra.mxu3 %vm7430_vm0, %v4694_v18 }
 0x50b   :  { %4261 = vmatmul.msk.f32.gmra.mxu3 %vm7431_vm9, %v4695_v45 }
 0x513   :  { %4262 = vmatmul.msk.f32.gmra.mxu3 %vm7432_vm8, %v4696_v59 }
 0x51b   :  { %4263 = vmatmul.msk.f32.gmra.mxu3 %vm7433_vm5, %v4697_v23 }
 0x523   :  { %4264 = vmatmul.msk.f32.gmra.mxu3 %vm7434_vm10, %v4698_v27 }
 0x52b   :  { %4265 = vmatmul.msk.f32.gmra.mxu3 %vm7435_vm12, %v4699_v55 }
 0x533   :  { %4266 = vmatmul.msk.f32.gmra.mxu3 %vm7436_vm13, %v4700_v21  ;;  %v5731_v44 = vpop.xlane.xlu2 %1326  ;;  %v4283_v21 = vld [vmem:[%s7364_s18 + $0x38] sm:$0xff] }
 0x534   :  { %v1751_v14 = vmul.f32 %v5738_v26, %v5731_v44  ;;  %1953 = vmatpush.msra.mxu0 %v4283_v21  ;;  %vm1353_vm13 = vcmp.eq.f32.partialorder %v5731_v44, inf }
 0x53b   :  { %v5733_v52 = vpop.xlane.xlu2 %1329 }
 0x53c   :  { %v1752_v0 = vmul.f32 %v5738_v26, %v5733_v52 }
 0x543   :  { %v5747_v60 = vpop.xlane.xlu2 %1332 }
 0x544   :  { %v1753_v17 = vmul.f32 %v5738_v26, %v5747_v60  ;;  %vm1377_vm8 = vcmp.eq.f32.partialorder %v5747_v60, inf  ;;  %vm1379_vm12 = vcmp.eq.f32.partialorder %v5747_v60, 0.0 }
 0x548   :  { %v1597_v6 = vpop.f32.mrf.mxu1 }
 0x549   :  { %4243 = vmatmul.msk.f32.vlgmr.msrb.gmra.mxu0 %vm616_vm6, %v1597_v6 }
 0x54b   :  { %v5753_v11 = vpop.xlane.xlu2 %1335 }
 0x54c   :  { %vm1389_vm9 = vcmp.eq.f32.partialorder %v5753_v11, inf  ;;  %vm1391_vm10 = vcmp.eq.f32.partialorder %v5753_v11, 0.0 }
 0x54e   :  { %v1559_v8 = vpop.f32.mrf.mxu3 }
 0x54f   :  { %4250 = vmatmul.msk.f32.vlgmr.msrb.gmra.mxu2 %vm616_vm6, %v1559_v8 }
 0x550   :  { %v1600_v24 = vpop.f32.mrf.mxu1 }
 0x551   :  { %4244 = vmatmul.msk.f32.gmra.mxu0 %vm616_vm6, %v1600_v24 }
 0x553   :  { %v5762_v55 = vpop.xlane.xlu2 %1338 }
 0x554   :  { %vm1401_vm7 = vcmp.eq.f32.partialorder %v5762_v55, inf  ;;  %vm1403_vm5 = vcmp.eq.f32.partialorder %v5762_v55, 0.0 }
 0x556   :  { %v1562_v12 = vpop.f32.mrf.mxu3 }
 0x557   :  { %4251 = vmatmul.msk.f32.gmra.mxu2 %vm616_vm6, %v1562_v12  ;;  %v1754_v12 = vmul.f32 %v5738_v26, %v5753_v11 }
 0x558   :  { %v1603_v28 = vpop.f32.mrf.mxu1 }
 0x559   :  { %4245 = vmatmul.msk.f32.gmra.mxu0 %vm616_vm6, %v1603_v28 }
 0x55b   :  { %v5772_v9 = vpop.xlane.xlu2 %1341 }
 0x55c   :  { %vm1413_vm15 = vcmp.eq.f32.partialorder %v5772_v9, inf  ;;  %vm1415_vm0 = vcmp.eq.f32.partialorder %v5772_v9, 0.0 }
 0x55e   :  { %v1565_v15 = vpop.f32.mrf.mxu3 }
 0x55f   :  { %4252 = vmatmul.msk.f32.gmra.mxu2 %vm616_vm6, %v1565_v15 }
 0x560   :  { %v1606_v29 = vpop.f32.mrf.mxu1 }
 0x561   :  { %4246 = vmatmul.msk.f32.gmra.mxu0 %vm616_vm6, %v1606_v29 }
 0x566   :  { %v1568_v5 = vpop.f32.mrf.mxu3 }
 0x567   :  { %4253 = vmatmul.msk.f32.gmra.mxu2 %vm616_vm6, %v1568_v5 }
 0x568   :  { %v1609_v40 = vpop.f32.mrf.mxu1 }
 0x569   :  { %4247 = vmatmul.msk.f32.gmra.mxu0 %vm616_vm6, %v1609_v40 }
 0x56e   :  { %v1571_v63 = vpop.f32.mrf.mxu3 }
 0x56f   :  { %4254 = vmatmul.msk.f32.gmra.mxu2 %vm616_vm6, %v1571_v63 }
 0x570   :  { %v1612_v47 = vpop.f32.mrf.mxu1 }
 0x571   :  { %4248 = vmatmul.msk.f32.gmra.mxu0 %vm616_vm6, %v1612_v47 }
 0x576   :  { %v1574_v58 = vpop.f32.mrf.mxu3 }
 0x577   :  { %4255 = vmatmul.msk.f32.gmra.mxu2 %vm616_vm6, %v1574_v58  ;;  %v1755_v58 = vmul.f32 %v5738_v26, %v5762_v55 }
 0x578   :  { %v1615_v35 = vpop.f32.mrf.mxu1 }
 0x579   :  { %4249 = vmatmul.msk.f32.gmra.mxu0 %vm616_vm6, %v1615_v35 }
 0x57e   :  { %v1577_v34 = vpop.f32.mrf.mxu3 }
 0x57f   :  { %4256 = vmatmul.msk.f32.gmra.mxu2 %vm616_vm6, %v1577_v34 }
 0x586   :  { %v1787_v30 = vpop.f32.mrf.mxu3 }
 0x58e   :  { %v1790_v32 = vpop.f32.mrf.mxu3 }
 0x596   :  { %v1793_v41 = vpop.f32.mrf.mxu3 }
 0x59e   :  { %v1796_v8 = vpop.f32.mrf.mxu3 }
 0x5a6   :  { %v1799_v63 = vpop.f32.mrf.mxu3 }
 0x5c6   :  { %v1666_v51 = vpop.f32.mrf.mxu0 }
 0x5ce   :  { %v1669_v33 = vpop.f32.mrf.mxu0 }
 0x5d2   :  { %v1725_v25 = vpop.f32.mrf.mxu2 }
 0x5d3   :  { %v1726_v48 = vadd.f32 %v1725_v25, %v1666_v51  ;;  %v1802_v25 = vpop.f32.mrf.mxu3 }
 0x5d5   :  { %v1758_v16 = vadd.f32 %v1751_v14, %v1726_v48 }
 0x5d6   :  { %v1672_v61 = vpop.f32.mrf.mxu0 }
 0x5d7   :  { %v1808_v54 = vadd.f32 %v1787_v30, %v1758_v16 }
 0x5d9   :  { %v1820_v46 = vadd.f32 %v5745_v57, %v1808_v54 }
 0x5da   :  { %v1728_v1 = vpop.f32.mrf.mxu2 }
 0x5db   :  { %v1827_v4 = vmax.f32 %v1820_v46, 0.0  ;;  %v1729_v50 = vadd.f32 %v1728_v1, %v1669_v33  ;;  %v1756_v33 = vmul.f32 %v5738_v26, %v5772_v9 }
 0x5dd   :  { %4273 = vmatmul.msk.f32.vlgmr.msrb.gmra.mxu1 %vm616_vm6, %v1827_v4  ;;  %v1759_v19 = vadd.f32 %v1752_v0, %v1729_v50 }
 0x5de   :  { %v1675_v2 = vpop.f32.mrf.mxu0 }
 0x5df   :  { %v1809_v10 = vadd.f32 %v1790_v32, %v1759_v19  ;;  %v1805_v19 = vpop.f32.mrf.mxu3 }
 0x5e1   :  { %v1821_v13 = vadd.f32 %v5745_v57, %v1809_v10 }
 0x5e2   :  { %v1731_v18 = vpop.f32.mrf.mxu2 }
 0x5e3   :  { %v1828_v45 = vmax.f32 %v1821_v13, 0.0  ;;  %v1732_v59 = vadd.f32 %v1731_v18, %v1672_v61  ;;  %v5778_v61 = vpop.xlane.xlu2 %1344 }
 0x5e4   :  { %v1757_v1 = vmul.f32 %v5738_v26, %v5778_v61  ;;  %v4281_v26 = vld [vmem:[%s7364_s18 + $0x28] sm:$0xff]  ;;  %4591 = vrsqrt.f32 %v5778_v61  ;;  %vm1425_vm14 = vcmp.eq.f32.partialorder %v5778_v61, inf  ;;  %vm1427_vm1 = vcmp.eq.f32.partialorder %v5778_v61, 0.0 }
 0x5e5   :  { %4274 = vmatmul.msk.f32.gmra.mxu1 %vm616_vm6, %v1828_v45  ;;  %v1760_v6 = vadd.f32 %v1753_v17, %v1732_v59  ;;  %v4280_v45 = vld [vmem:[%s7364_s18 + $0x20] sm:$0xff]  ;;  %4593 = vrsqrt.f32 %v5772_v9 }
 0x5e6   :  { %v1678_v29 = vpop.f32.mrf.mxu0  ;;  %4595 = vrsqrt.f32 %v5762_v55 }
 0x5e7   :  { %v1810_v23 = vadd.f32 %v1793_v41, %v1760_v6  ;;  %4597 = vrsqrt.f32 %v5753_v11 }
 0x5e8   :  { %4599 = vrsqrt.f32 %v5747_v60 }
 0x5e9   :  { %v1822_v24 = vadd.f32 %v5745_v57, %v1810_v23  ;;  %4601 = vrsqrt.f32 %v5731_v44 }
 0x5ea   :  { %v1734_v27 = vpop.f32.mrf.mxu2  ;;  %4603 = vrsqrt.f32 %v5733_v52 }
 0x5eb   :  { %v1829_v28 = vmax.f32 %v1822_v24, 0.0  ;;  %v1735_v15 = vadd.f32 %v1734_v27, %v1675_v2  ;;  %v4282_v2 = vld [vmem:[%s7364_s18 + $0x30] sm:$0xff] }
 0x5ec   :  { %1954 = vmatpush.msra.mxu0 %v4282_v2 }
 0x5ed   :  { %4275 = vmatmul.msk.f32.gmra.mxu1 %vm616_vm6, %v1829_v28  ;;  %v1761_v5 = vadd.f32 %v1754_v12, %v1735_v15 }
 0x5ee   :  { %v1681_v37 = vpop.f32.mrf.mxu0  ;;  %1955 = vmatpush.msra.mxu0 %v4281_v26 }
 0x5ef   :  { %v1811_v40 = vadd.f32 %v1796_v8, %v1761_v5 }
 0x5f0   :  { %1956 = vmatpush.msra.mxu0 %v4280_v45 }
 0x5f1   :  { %v1823_v47 = vadd.f32 %v5745_v57, %v1811_v40 }
 0x5f2   :  { %v1737_v35 = vpop.f32.mrf.mxu2 }
 0x5f3   :  { %v1830_v34 = vmax.f32 %v1823_v47, 0.0  ;;  %v1738_v36 = vadd.f32 %v1737_v35, %v1678_v29 }
 0x5f5   :  { %4276 = vmatmul.msk.f32.gmra.mxu1 %vm616_vm6, %v1830_v34  ;;  %v1762_v38 = vadd.f32 %v1755_v58, %v1738_v36 }
 0x5f6   :  { %v1684_v46 = vpop.f32.mrf.mxu0 }
 0x5f7   :  { %v1812_v51 = vadd.f32 %v1799_v63, %v1762_v38 }
 0x5f9   :  { %v1824_v30 = vadd.f32 %v5745_v57, %v1812_v51  ;;  %v4298_v51 = vld [vmem:[%s7367_s21 + $0x38] sm:$0xff] }
 0x5fa   :  { %v1740_v14 = vpop.f32.mrf.mxu2 }
 0x5fb   :  { %v1831_v32 = vmax.f32 %v1824_v30, 0.0  ;;  %v1741_v48 = vadd.f32 %v1740_v14, %v1681_v37  ;;  %v4297_v30 = vld [vmem:[%s7367_s21 + $0x30] sm:$0xff]  ;;  %v4295_v14 = vld [vmem:[%s7367_s21 + $0x20] sm:$0xff] }
 0x5fd   :  { %4277 = vmatmul.msk.f32.gmra.mxu1 %vm616_vm6, %v1831_v32  ;;  %v1763_v16 = vadd.f32 %v1756_v33, %v1741_v48  ;;  %v4296_v33 = vld [vmem:[%s7367_s21 + $0x28] sm:$0xff] }
 0x5ff   :  { %v1813_v54 = vadd.f32 %v1802_v25, %v1763_v16  ;;  %v4542_v25 = vld [vmem:[%s7365_s19 + $0x1] ss:$0 sm:$0xff] }
 0x600   :  { %v4543_v16 = vld [vmem:[%s7366_s20 + $0x1] ss:$0 sm:$0xff] }
 0x601   :  { %v1825_v0 = vadd.f32 %v5745_v57, %v1813_v54 }
 0x602   :  { %v1743_v4 = vpop.f32.mrf.mxu2 }
 0x603   :  { %v1832_v50 = vmax.f32 %v1825_v0, 0.0  ;;  %v1744_v41 = vadd.f32 %v1743_v4, %v1684_v46 }
 0x605   :  { %4278 = vmatmul.msk.f32.gmra.mxu1 %vm616_vm6, %v1832_v50  ;;  %v1764_v10 = vadd.f32 %v1757_v1, %v1744_v41 }
 0x607   :  { %v1814_v13 = vadd.f32 %v1805_v19, %v1764_v10 }
 0x609   :  { %v1826_v17 = vadd.f32 %v5745_v57, %v1814_v13  ;;  %v4541_v57 = vld [vmem:[%s7362_s17 + $0x1] ss:$0 sm:$0xff] }
 0x60b   :  { %v1833_v18 = vmax.f32 %v1826_v17, 0.0 }
 0x60d   :  { %4279 = vmatmul.msk.f32.gmra.mxu1 %vm616_vm6, %v1833_v18 }
 0x65a   :  { %v1882_v59 = vpop.f32.mrf.mxu1 }
 0x65b   :  { %v1883_v6 = vadd.f32 %v4541_v57, %v1882_v59 }
 0x65d   :  { %v1903_v8 = vmax.f32 %v1883_v6, 0.0 }
 0x65f   :  { %4285 = vmatmul.msk.f32.vlgmr.msra.gmra.mxu0 %vm616_vm6, %v1903_v8 }
 0x662   :  { %v1885_v23 = vpop.f32.mrf.mxu1 }
 0x663   :  { %v1886_v24 = vadd.f32 %v4541_v57, %v1885_v23 }
 0x665   :  { %v1904_v12 = vmax.f32 %v1886_v24, 0.0 }
 0x667   :  { %4286 = vmatmul.msk.f32.gmra.mxu0 %vm616_vm6, %v1904_v12 }
 0x66a   :  { %v1888_v27 = vpop.f32.mrf.mxu1 }
 0x66b   :  { %v1889_v28 = vadd.f32 %v4541_v57, %v1888_v27 }
 0x66d   :  { %v1905_v15 = vmax.f32 %v1889_v28, 0.0 }
 0x66f   :  { %4287 = vmatmul.msk.f32.gmra.mxu0 %vm616_vm6, %v1905_v15 }
 0x672   :  { %v1891_v29 = vpop.f32.mrf.mxu1 }
 0x673   :  { %v1892_v5 = vadd.f32 %v4541_v57, %v1891_v29 }
 0x675   :  { %v1906_v21 = vmax.f32 %v1892_v5, 0.0 }
 0x677   :  { %4288 = vmatmul.msk.f32.gmra.mxu0 %vm616_vm6, %v1906_v21 }
 0x67a   :  { %v1894_v40 = vpop.f32.mrf.mxu1 }
 0x67b   :  { %v1895_v63 = vadd.f32 %v4541_v57, %v1894_v40 }
 0x67d   :  { %v1907_v47 = vmax.f32 %v1895_v63, 0.0 }
 0x67f   :  { %4289 = vmatmul.msk.f32.gmra.mxu0 %vm616_vm6, %v1907_v47 }
 0x682   :  { %v1897_v58 = vpop.f32.mrf.mxu1 }
 0x683   :  { %v1898_v35 = vadd.f32 %v4541_v57, %v1897_v58 }
 0x685   :  { %v1908_v34 = vmax.f32 %v1898_v35, 0.0 }
 0x687   :  { %4290 = vmatmul.msk.f32.gmra.mxu0 %vm616_vm6, %v1908_v34 }
 0x68a   :  { %v1900_v36 = vpop.f32.mrf.mxu1 }
 0x68b   :  { %v1901_v38 = vadd.f32 %v4541_v57, %v1900_v36 }
 0x68d   :  { %v1909_v37 = vmax.f32 %v1901_v38, 0.0 }
 0x68f   :  { %4291 = vmatmul.msk.f32.gmra.mxu0 %vm616_vm6, %v1909_v37  ;;  %2056 = vmatpush.msrb.mxu3 %v1909_v37 }
 0x691   :  { %2057 = vmatpush.msrb.mxu3 %v1908_v34  ;;  %v4592_v34 = vpop.eup %4591 }
 0x692   :  { %v4594_v36 = vpop.eup %4593  ;;  %v1419_v38 = vmul.f32 %v4592_v34, %v5778_v61 }
 0x693   :  { %2058 = vmatpush.msrb.mxu3 %v1907_v47  ;;  %v4596_v37 = vpop.eup %4595 }
 0x695   :  { %2059 = vmatpush.msrb.mxu3 %v1906_v21 }
 0x697   :  { %2060 = vmatpush.msrb.mxu3 %v1905_v15 }
 0x699   :  { %2061 = vmatpush.msrb.mxu3 %v1904_v12 }
 0x69b   :  { %2062 = vmatpush.msrb.mxu3 %v1903_v8 }
 0x69c   :  { %4294 = vmatmul.msk.f32.vlgmr.msrb.gmra.mxu3 %vm1062_vm11, %v5235_v3 }
 0x69d   :  { %2115 = vmatpush.msra.mxu3 %v4298_v51  ;;  %v1407_v51 = vmul.f32 %v4594_v36, %v5772_v9 }
 0x69f   :  { %2116 = vmatpush.msra.mxu3 %v4297_v30  ;;  %v4598_v30 = vpop.eup %4597 }
 0x6a1   :  { %2117 = vmatpush.msra.mxu3 %v4296_v33  ;;  %v4600_v33 = vpop.eup %4599 }
 0x6a3   :  { %2118 = vmatpush.msra.mxu3 %v4295_v14  ;;  %v1395_v14 = vmul.f32 %v4596_v37, %v5762_v55 }
 0x6a4   :  { %4304 = vmatmul.msk.f32.vlgmr.msra.gmra.mxu3 %vm616_vm6, %v5601_v42 }
 0x6dc   :  { %v1958_v32 = vpop.f32.mrf.mxu0 }
 0x6dd   :  { %v1959_v48 = vadd.f32 %v4542_v25, %v1958_v32  ;;  %v1383_v32 = vmul.f32 %v4598_v30, %v5753_v11 }
 0x6df   :  { %v1979_v54 = vmax.f32 %v1959_v48, 0.0  ;;  %v1408_v48 = vmul.f32 %v4594_v36, %v1407_v51 }
 0x6e1   :  { %v1991_v46 = vmul.f32 %v4543_v16, %v1979_v54  ;;  %v1371_v54 = vmul.f32 %v4600_v33, %v5747_v60 }
 0x6e3   :  { %v1998_v0 = vsel %vm616_vm6, %v1991_v46, 0.0  ;;  %v1396_v46 = vmul.f32 %v4596_v37, %v1395_v14 }
 0x6e4   :  { %v1961_v1 = vpop.f32.mrf.mxu0  ;;  %1999 = vadd.xlane.f32.xlu0 %v1998_v0 }
 0x6e5   :  { %v1962_v4 = vadd.f32 %v4542_v25, %v1961_v1 }
 0x6e7   :  { %v1980_v50 = vmax.f32 %v1962_v4, 0.0 }
 0x6e9   :  { %v1992_v41 = vmul.f32 %v4543_v16, %v1980_v50  ;;  %v1384_v50 = vmul.f32 %v4598_v30, %v1383_v32 }
 0x6eb   :  { %v2001_v35 = vsel %vm616_vm6, %v1992_v41, 0.0  ;;  %v1409_v41 = vmul.f32 0.5, %v1408_v48  ;;  %v1380_v48 = vand.u32 2147483648, %v5747_v60 }
 0x6ec   :  { %v1964_v19 = vpop.f32.mrf.mxu0 }
 0x6ed   :  { %v1965_v29 = vadd.f32 %v4542_v25, %v1964_v19  ;;  %v1372_v19 = vmul.f32 %v4600_v33, %v1371_v54 }
 0x6ef   :  { %v1981_v40 = vmax.f32 %v1965_v29, 0.0 }
 0x6f1   :  { %v1993_v47 = vmul.f32 %v4543_v16, %v1981_v40 }
 0x6f3   :  { %v2004_v58 = vsel %vm616_vm6, %v1993_v47, 0.0 }
 0x6f4   :  { %v1967_v10 = vpop.f32.mrf.mxu0 }
 0x6f5   :  { %v1968_v13 = vadd.f32 %v4542_v25, %v1967_v10  ;;  %v1397_v10 = vmul.f32 0.5, %v1396_v46 }
 0x6f7   :  { %v1982_v17 = vmax.f32 %v1968_v13, 0.0 }
 0x6f9   :  { %v1994_v18 = vmul.f32 %v4543_v16, %v1982_v17 }
 0x6fb   :  { %v2007_v2 = vsel %vm616_vm6, %v1994_v18, 0.0 }
 0x6fc   :  { %v1970_v26 = vpop.f32.mrf.mxu0  ;;  %2008 = vadd.xlane.f32.xlu1 %v2007_v2  ;;  %v1385_v2 = vmul.f32 0.5, %v1384_v50 }
 0x6fd   :  { %v1971_v45 = vadd.f32 %v4542_v25, %v1970_v26  ;;  %v1410_v26 = vsub.f32 1.5, %v1409_v41 }
 0x6ff   :  { %v1983_v57 = vmax.f32 %v1971_v45, 0.0  ;;  %v1373_v45 = vmul.f32 0.5, %v1372_v19 }
 0x701   :  { %v1995_v59 = vmul.f32 %v4543_v16, %v1983_v57  ;;  %v1398_v57 = vsub.f32 1.5, %v1397_v10 }
 0x703   :  { %v2010_v6 = vsel %vm616_vm6, %v1995_v59, 0.0 }
 0x704   :  { %v1973_v8 = vpop.f32.mrf.mxu0  ;;  %2011 = vadd.xlane.f32.xlu2 %v2010_v6 }
 0x705   :  { %v1974_v23 = vadd.f32 %v4542_v25, %v1973_v8 }
 0x707   :  { %v1984_v24 = vmax.f32 %v1974_v23, 0.0  ;;  %v1386_v23 = vsub.f32 1.5, %v1385_v2 }
 0x709   :  { %v1996_v12 = vmul.f32 %v4543_v16, %v1984_v24  ;;  %v1411_v24 = vmul.f32 %v4594_v36, %v1410_v26 }
 0x70b   :  { %v2013_v27 = vsel %vm616_vm6, %v1996_v12, 0.0  ;;  %v1374_v12 = vsub.f32 1.5, %v1373_v45 }
 0x70c   :  { %2014 = vadd.xlane.f32.xlu2 %v2013_v27  ;;  %v1976_v28 = vpop.f32.mrf.mxu0  ;;  %v1399_v27 = vmul.f32 %v4596_v37, %v1398_v57 }
 0x70d   :  { %v1977_v15 = vadd.f32 %v4542_v25, %v1976_v28  ;;  %v1420_v25 = vmul.f32 %v4592_v34, %v1419_v38  ;;  %v1375_v40 = vmul.f32 %v4600_v33, %v1374_v12 }
 0x70e   :  { %v1400_v47 = vmul.f32 %v1399_v27, %v5762_v55 }
 0x70f   :  { %v1985_v5 = vmax.f32 %v1977_v15, 0.0  ;;  %v1421_v0 = vmul.f32 0.5, %v1420_v25  ;;  %v1376_v51 = vmul.f32 %v1375_v40, %v5747_v60  ;;  %v1392_v25 = vand.u32 2147483648, %v5753_v11 }
 0x711   :  { %v1997_v21 = vmul.f32 %v4543_v16, %v1985_v5  ;;  %v4602_v16 = vpop.eup %4601  ;;  %v1422_v13 = vsub.f32 1.5, %v1421_v0  ;;  %v1387_v5 = vmul.f32 %v4598_v30, %v1386_v23  ;;  %v1404_v30 = vand.u32 2147483648, %v5762_v55 }
 0x712   :  { %v4604_v1 = vpop.eup %4603  ;;  %v1347_v4 = vmul.f32 %v4602_v16, %v5731_v44  ;;  %v1378_v46 = vsel %vm1377_vm8, %v5747_v60, %v1376_v51  ;;  %v1368_v60 = vand.u32 2147483648, %v5733_v52 }
 0x713   :  { %v2016_v63 = vsel %vm616_vm6, %v1997_v21, 0.0  ;;  %v1359_v17 = vmul.f32 %v4604_v1, %v5733_v52  ;;  %v1423_v59 = vmul.f32 %v4592_v34, %v1422_v13  ;;  %v1412_v21 = vmul.f32 %v1411_v24, %v5772_v9 }
 0x714   :  { %2017 = vadd.xlane.f32.xlu2 %v2016_v63  ;;  %v1348_v18 = vmul.f32 %v4602_v16, %v1347_v4  ;;  %v1428_v63 = vand.u32 2147483648, %v5778_v61  ;;  %v1416_v34 = vand.u32 2147483648, %v5772_v9  ;;  %v1388_v38 = vmul.f32 %v1387_v5, %v5753_v11 }
 0x715   :  { %v1360_v6 = vmul.f32 %v4604_v1, %v1359_v17  ;;  %v1424_v28 = vmul.f32 %v1423_v59, %v5778_v61  ;;  %v1414_v37 = vsel %vm1413_vm15, %v5772_v9, %v1412_v21  ;;  %v1381_v41 = vsel %vm1379_vm12, %v1380_v48, %v1378_v46 }
 0x716   :  { %v1349_v8 = vmul.f32 0.5, %v1348_v18  ;;  %v1417_v32 = vsel %vm1415_vm0, %v1416_v34, %v1414_v37  ;;  %v1390_v9 = vsel %vm1389_vm9, %v5753_v11, %v1388_v38  ;;  %vm1355_vm15 = vcmp.eq.f32.partialorder %v5731_v44, 0.0 }
 0x717   :  { %v1361_v15 = vmul.f32 0.5, %v1360_v6  ;;  %v1393_v50 = vsel %vm1391_vm10, %v1392_v25, %v1390_v9  ;;  %v5893_v17 = vadd.f32 1e-08, %v1381_v41 }
 0x718   :  { %v1350_v29 = vsub.f32 1.5, %v1349_v8  ;;  %v5888_v10 = vadd.f32 1e-08, %v1393_v50 }
 0x71a   :  { %v1351_v36 = vmul.f32 %v4602_v16, %v1350_v29  ;;  %v1493_v50 = vand.u32 2147483648, %v5888_v10 }
 0x71c   :  { %2005 = vadd.xlane.f32.xlu2 %v2004_v58  ;;  %v1426_v58 = vsel %vm1425_vm14, %v5778_v61, %v1424_v28  ;;  %v1402_v61 = vsel %vm1401_vm7, %v5762_v55, %v1400_v47  ;;  %v1352_v54 = vmul.f32 %v1351_v36, %v5731_v44  ;;  %v5877_v55 = vadd.f32 1e-08, %v1417_v32 }
 0x71d   :  { %v1429_v33 = vsel %vm1427_vm1, %v1428_v63, %v1426_v58  ;;  %v1405_v0 = vsel %vm1403_vm5, %v1404_v30, %v1402_v61  ;;  %vm1365_vm14 = vcmp.eq.f32.partialorder %v5733_v52, inf  ;;  %vm1367_vm1 = vcmp.eq.f32.partialorder %v5733_v52, 0.0 }
 0x71e   :  { %v5871_v16 = vadd.f32 1e-08, %v1429_v33  ;;  %v5882_v11 = vadd.f32 1e-08, %v1405_v0  ;;  %v1354_v19 = vsel %vm1353_vm13, %v5731_v44, %v1352_v54  ;;  %vm1517_vm9 = vweird.f32 %v5877_v55 }
 0x71f   :  { %vm1487_vm5 = vweird.f32 %v5888_v10  ;;  %v1523_v30 = vand.u32 2147483648, %v5877_v55  ;;  %v1521_v32 = vand.u32 2147483647, %v5877_v55 }
 0x720   :  { %4605 = vrcp.f32 %v5871_v16  ;;  %vm1532_vm7 = vweird.f32 %v5871_v16  ;;  %v1538_v34 = vand.u32 2147483648, %v5871_v16  ;;  %v1536_v51 = vand.u32 2147483647, %v5871_v16 }
 0x721   :  { %4607 = vrcp.f32 %v5877_v55  ;;  %vm1502_vm10 = vweird.f32 %v5882_v11  ;;  %v1508_v48 = vand.u32 2147483648, %v5882_v11  ;;  %v1524_v41 = vor.u32 1.1754944e-38, %v1523_v30 }
 0x722   :  { %4609 = vrcp.f32 %v5882_v11  ;;  %v1539_v54 = vor.u32 1.1754944e-38, %v1538_v34 }
 0x723   :  { %4611 = vrcp.f32 %v5888_v10 }
 0x724   :  { %2002 = vadd.xlane.f32.xlu2 %v2001_v35  ;;  %v1362_v35 = vsub.f32 1.5, %v1361_v15  ;;  %4613 = vrcp.f32 %v5893_v17 }
 0x726   :  { %v1363_v14 = vmul.f32 %v4604_v1, %v1362_v35  ;;  %v1356_v1 = vand.u32 2147483648, %v5731_v44  ;;  %v5896_v2 = vpop.eup %4605 }
 0x727   :  { %v5902_v45 = vpop.eup %4607  ;;  %v1528_v57 = vmul.f32 %v5896_v2, %v5871_v16  ;;  %vm1533_vm0 = vweird.f32 %v5896_v2 }
 0x728   :  { %v1364_v4 = vmul.f32 %v1363_v14, %v5733_v52  ;;  %v1357_v18 = vsel %vm1355_vm15, %v1356_v1, %v1354_v19  ;;  %v5908_v59 = vpop.eup %4609  ;;  %v1513_v6 = vmul.f32 %v5902_v45, %v5877_v55  ;;  %vm1518_vm8 = vweird.f32 %v5902_v45  ;;  %vm5947_vm12 = vmor %vm1532_vm7, %vm1533_vm0 }
 0x729   :  { %v5899_v26 = vadd.f32 1e-08, %v1357_v18  ;;  %v5913_v8 = vpop.eup %4611  ;;  %v1498_v24 = vmul.f32 %v5908_v59, %v5882_v11  ;;  %v1529_v12 = vsub.f32 1.0, %v1528_v57  ;;  %vm1503_vm13 = vweird.f32 %v5908_v59  ;;  %vm5961_vm15 = vmor %vm1517_vm9, %vm1518_vm8 }
 0x72a   :  { %v1366_v13 = vsel %vm1365_vm14, %v5733_v52, %v1364_v4  ;;  %v5915_v23 = vpop.eup %4613  ;;  %v1483_v27 = vmul.f32 %v5913_v8, %v5888_v10  ;;  %v1514_v28 = vsub.f32 1.0, %v1513_v6  ;;  %vm1488_vm14 = vweird.f32 %v5913_v8  ;;  %vm5974_vm7 = vmor %vm1502_vm10, %vm1503_vm13 }
 0x72b   :  { %v1369_v44 = vsel %vm1367_vm1, %v1368_v60, %v1366_v13  ;;  %4615 = vrcp.f32 %v5899_v26  ;;  %v1468_v29 = vmul.f32 %v5915_v23, %v5893_v17  ;;  %v1499_v21 = vsub.f32 1.0, %v1498_v24  ;;  %vm5989_vm10 = vmor %vm1487_vm5, %vm1488_vm14 }
 0x72c   :  { %v5906_v52 = vadd.f32 1e-08, %v1369_v44  ;;  %v1530_v40 = vmul.f32 %v5896_v2, %v1529_v12  ;;  %v1484_v47 = vsub.f32 1.0, %v1483_v27  ;;  %v1515_v58 = vmul.f32 %v5902_v45, %v1514_v28 }
 0x72d   :  { %v1469_v36 = vsub.f32 1.0, %v1468_v29  ;;  %v1500_v38 = vmul.f32 %v5908_v59, %v1499_v21  ;;  %v1506_v1 = vand.u32 2147483647, %v5882_v11  ;;  %vm1537_vm1 = vcmp.eq.f32.partialorder %v1536_v51, 8.507059e+37  ;;  %v4308_v11 = vld [vmem:[%s7370_s24 + $0x30] sm:$0xff] }
 0x72e   :  { %4617 = vrcp.f32 %v5906_v52  ;;  %v1531_v37 = vadd.f32 %v5896_v2, %v1530_v40  ;;  %v1485_v14 = vmul.f32 %v5913_v8, %v1484_v47  ;;  %v1516_v25 = vadd.f32 %v5902_v45, %v1515_v58  ;;  %v6117_v47 = vld [vmem:[%s7408_s8 + $0x20] sm:$0xff] }
 0x72f   :  { %v1470_v46 = vmul.f32 %v5915_v23, %v1469_v36  ;;  %v1501_v0 = vadd.f32 %v5908_v59, %v1500_v38  ;;  %vm1472_vm0 = vweird.f32 %v5893_v17  ;;  %vm1473_vm9 = vweird.f32 %v5915_v23 }
 0x730   :  { %v1535_v4 = vsel %vm5947_vm12, %v5896_v2, %v1531_v37  ;;  %v1486_v19 = vadd.f32 %v5913_v8, %v1485_v14  ;;  %v1491_v60 = vand.u32 2147483647, %v5888_v10  ;;  %v1520_v13 = vsel %vm5961_vm15, %v5902_v45, %v1516_v25  ;;  %vm6003_vm5 = vmor %vm1472_vm0, %vm1473_vm9 }
 0x731   :  { %v5926_v5 = vpop.eup %4615  ;;  %vm1522_vm8 = vcmp.eq.f32.partialorder %v1521_v32, 8.507059e+37  ;;  %v1509_v18 = vor.u32 1.1754944e-38, %v1508_v48  ;;  %v1540_v2 = vsel %vm1537_vm1, %v1539_v54, %v1535_v4  ;;  %v1476_v44 = vand.u32 2147483647, %v5893_v17 }
 0x732   :  { %v5936_v35 = vmul.f32 %v5926_v5, %v5899_v26  ;;  %v1478_v57 = vand.u32 2147483648, %v5893_v17  ;;  %v1505_v6 = vsel %vm5974_vm7, %v5908_v59, %v1501_v0  ;;  %vm1507_vm12 = vcmp.eq.f32.partialorder %v1506_v1, 8.507059e+37 }
 0x733   :  { %v1471_v45 = vadd.f32 %v5915_v23, %v1470_v46  ;;  %v1494_v12 = vor.u32 1.1754944e-38, %v1493_v50  ;;  %v1525_v10 = vsel %vm1522_vm8, %v1524_v41, %v1520_v13  ;;  %v1490_v59 = vsel %vm5989_vm10, %v5913_v8, %v1486_v19  ;;  %v2064_v13 = vpop.f32.mrf.mxu3 }
 0x734   :  { %v5929_v63 = vpop.eup %4617  ;;  %v1439_v28 = vsub.f32 1.0, %v5936_v35  ;;  %vm1492_vm13 = vcmp.eq.f32.partialorder %v1491_v60, 8.507059e+37  ;;  %v1541_v29 = vmul.f32 %v1540_v2, %v5633_v53  ;;  %v1510_v21 = vsel %vm1507_vm12, %v1509_v18, %v1505_v6  ;;  %v4309_v60 = vld [vmem:[%s7370_s24 + $0x38] sm:$0xff]  ;;  %v4307_v18 = vld [vmem:[%s7370_s24 + $0x28] sm:$0xff]  ;;  %v4306_v2 = vld [vmem:[%s7370_s24 + $0x20] sm:$0xff] }
 0x735   :  { %v1453_v61 = vmul.f32 %v5929_v63, %v5906_v52  ;;  %vm6012_vm14 = vcmp.eq.f32.partialorder %v1476_v44, 8.507059e+37  ;;  %v1479_v17 = vor.u32 1.1754944e-38, %v1478_v57  ;;  %v1526_v58 = vmul.f32 %v1525_v10, %v5626_v56  ;;  %v4701_v6 = vld [vmem:[%s7408_s8] sm:$0xff] }
 0x736   :  { %v1475_v35 = vsel %vm6003_vm5, %v5915_v23, %v1471_v45  ;;  %v1495_v8 = vsel %vm1492_vm13, %v1494_v12, %v1490_v59  ;;  %vm1457_vm15 = vweird.f32 %v5906_v52  ;;  %v1440_v53 = vmul.f32 %v5926_v5, %v1439_v28  ;;  %v4544_v45 = vld [vmem:[%s7369_s23 + $0x1] ss:$0 sm:$0xff]  ;;  %v4703_v59 = vld [vmem:[%s7408_s8 + $0x10] sm:$0xff] }
 0x737   :  { %v1454_v24 = vsub.f32 1.0, %v1453_v61  ;;  %v1511_v38 = vmul.f32 %v1510_v21, %v5619_v49  ;;  %vm1458_vm1 = vweird.f32 %v5929_v63  ;;  %vm1442_vm7 = vweird.f32 %v5899_v26  ;;  %v4705_v21 = vld [vmem:[%s7408_s8 + $0x18] sm:$0xff] }
 0x738   :  { %vm1443_vm0 = vweird.f32 %v5926_v5  ;;  %v1480_v23 = vsel %vm6012_vm14, %v1479_v17, %v1475_v35  ;;  %v1463_v51 = vand.u32 2147483648, %v5906_v52  ;;  %v1496_v30 = vmul.f32 %v1495_v8, %v5612_v39  ;;  %vm6037_vm9 = vmor %vm1457_vm15, %vm1458_vm1  ;;  %v4708_v17 = vld [vmem:[%s7409_s1 + $0x10] sm:$0xff]  ;;  %v6150_v8 = vld [vmem:[%s7409_s1 + $0x28] sm:$0xff] }
 0x739   :  { %v1455_v36 = vmul.f32 %v5929_v63, %v1454_v24  ;;  %v1461_v61 = vand.u32 2147483647, %v5906_v52  ;;  %v1448_v14 = vand.u32 2147483648, %v5899_v26  ;;  %v1441_v32 = vadd.f32 %v5926_v5, %v1440_v53  ;;  %vm1444_vm8 = vmor %vm1442_vm7, %vm1443_vm0  ;;  %v6139_v35 = vld [vmem:[%s7408_s8 + $0x30] sm:$0xff] }
 0x73a   :  { %v1446_v48 = vand.u32 2147483647, %v5899_v26  ;;  %v6157_v53 = vld [vmem:[%s7409_s1 + $0x30] sm:$0xff]  ;;  %vm7451_vm5 = vcmask 15360  }
 0x73b   :  { %v1456_v49 = vadd.f32 %v5929_v63, %v1455_v36  ;;  %vm1462_vm10 = vcmp.eq.f32.partialorder %v1461_v61, 8.507059e+37  ;;  %v1449_v46 = vor.u32 1.1754944e-38, %v1448_v14  ;;  %v1445_v0 = vsel %vm1444_vm8, %v5926_v5, %v1441_v32  ;;  %v4301_v5 = vld [vmem:[%s7368_s22 + $0x30] sm:$0xff]  ;;  %v2120_v24 = vpop.f32.mrf.mxu3  ;;  %v4712_v36 = vld [vmem:[%s7409_s1 + $0x20] sm:$0xff]  ;;  %vm7452_vm13 = vmmov %vm7451_vm5 }
 0x73c   :  { %vm1447_vm12 = vcmp.eq.f32.partialorder %v1446_v48, 8.507059e+37  ;;  %vm7453_vm14 = vmmov %vm7451_vm5 }
 0x73d   :  { %v1460_v54 = vsel %vm6037_vm9, %v5929_v63, %v1456_v49  ;;  %v1450_v1 = vsel %vm1447_vm12, %v1449_v46, %v1445_v0  ;;  %v4302_v63 = vld [vmem:[%s7368_s22 + $0x38] sm:$0xff]  ;;  %vm7454_vm15 = vmmov %vm7451_vm5 }
 0x73e   :  { %v1451_v55 = vmul.f32 %v1450_v1, %v5587_v31  ;;  %v4300_v31 = vld [vmem:[%s7368_s22 + $0x28] sm:$0xff]  ;;  %v4347_v46 = vld [vmem:[%s7412_s27 + $0x58] sm:$0xff]  ;;  %vm7455_vm1 = vmmov %vm7451_vm5 }
 0x73f   :  { %v4343_v0 = vld [vmem:[%s7411_s29 + $0x58] sm:$0xff]  ;;  %vm7456_vm7 = vmmov %vm7455_vm1 }
 0x740   :  { %vm7457_vm0 = vmmov %vm7455_vm1 }
 0x757   :  { %v2000_v26 = vpop.xlane.xlu0 %1999 }
 0x758   :  { %v2019_v19 = vmul.f32 %v2000_v26, %v1451_v55  ;;  %v4341_v55 = vld [vmem:[%s7411_s29 + $0x48] sm:$0xff] }
 0x76f   :  { %v2009_v56 = vpop.xlane.xlu1 %2008 }
 0x770   :  { %v2022_v39 = vmul.f32 %v2009_v56, %v1496_v30 }
 0x777   :  { %v5922_v15 = vpop.xlane.xlu2 %2011 }
 0x778   :  { %v2023_v33 = vmul.f32 %v5922_v15, %v1511_v38  ;;  %v1481_v15 = vmul.f32 %v1480_v23, %v5605_v43 }
 0x77f   :  { %v2015_v16 = vpop.xlane.xlu2 %2014 }
 0x780   :  { %v2024_v37 = vmul.f32 %v2015_v16, %v1526_v58  ;;  %v1464_v16 = vor.u32 1.1754944e-38, %v1463_v51  ;;  %v6128_v58 = vld [vmem:[%s7408_s8 + $0x28] sm:$0xff] }
 0x782   :  { %v1465_v43 = vsel %vm1462_vm10, %v1464_v16, %v1460_v54 }
 0x783   :  { %v1466_v4 = vmul.f32 %v1465_v43, %v5592_v22  ;;  %v4299_v22 = vld [vmem:[%s7368_s22 + $0x20] sm:$0xff]  ;;  %v4346_v43 = vld [vmem:[%s7412_s27 + $0x50] sm:$0xff] }
 0x787   :  { %v2018_v40 = vpop.xlane.xlu2 %2017 }
 0x788   :  { %v2025_v34 = vmul.f32 %v2018_v40, %v1541_v29  ;;  %v4704_v29 = vld [vmem:[%s7409_s1] sm:$0xff]  ;;  %v4706_v40 = vld [vmem:[%s7409_s1 + $0x8] sm:$0xff] }
 0x78a   :  { %2035 = vmatpush.msra.mxu2 %v2025_v34  ;;  %v4710_v34 = vld [vmem:[%s7409_s1 + $0x18] sm:$0xff] }
 0x78c   :  { %2036 = vmatpush.msra.mxu2 %v2024_v37  ;;  %v4545_v37 = vld [vmem:[%s7371_s25 + $0x1] ss:$0 sm:$0xff] }
 0x78e   :  { %2037 = vmatpush.msra.mxu2 %v2023_v33 }
 0x78f   :  { %v2006_v9 = vpop.xlane.xlu2 %2005 }
 0x790   :  { %v2021_v52 = vmul.f32 %v2006_v9, %v1481_v15  ;;  %2038 = vmatpush.msra.mxu2 %v2022_v39 }
 0x792   :  { %2039 = vmatpush.msra.mxu2 %v2021_v52 }
 0x797   :  { %v2003_v50 = vpop.xlane.xlu2 %2002 }
 0x798   :  { %v2020_v41 = vmul.f32 %v2003_v50, %v1466_v4  ;;  %v4342_v4 = vld [vmem:[%s7411_s29 + $0x50] sm:$0xff]  ;;  %v4345_v50 = vld [vmem:[%s7412_s27 + $0x48] sm:$0xff] }
 0x79a   :  { %2040 = vmatpush.msra.mxu2 %v2020_v41 }
 0x79c   :  { %2041 = vmatpush.msra.mxu2 %v2019_v19 }
 0x79d   :  { %4293 = vmatmul.msk.f32.vlgmr.msra.gmra.mxu2 %vm1062_vm11, %v5487_v62 }
 0x79e   :  { %2092 = vmatpush.msrb.mxu2 %v4302_v63 }
 0x7a0   :  { %2093 = vmatpush.msrb.mxu2 %v4301_v5 }
 0x7a2   :  { %2094 = vmatpush.msrb.mxu2 %v4300_v31 }
 0x7a4   :  { %2095 = vmatpush.msrb.mxu2 %v4299_v22 }
 0x7a5   :  { %4303 = vmatmul.msk.f32.vlgmr.msrb.gmra.mxu2 %vm616_vm6, %v2064_v13 }
 0x7a6   :  { %2150 = vmatpush.msra.mxu2 %v4309_v60 }
 0x7a8   :  { %2151 = vmatpush.msra.mxu2 %v4308_v11 }
 0x7aa   :  { %2152 = vmatpush.msra.mxu2 %v4307_v18 }
 0x7ac   :  { %2153 = vmatpush.msra.mxu2 %v4306_v2 }
 0x820   :  { %v2043_v44 = vpop.f32.mrf.mxu2 }
 0x821   :  { %v6082_v57 = vadd.f32 %v2043_v44, %v5508_v7  ;;  %v4702_v7 = vld [vmem:[%s7408_s8 + $0x8] sm:$0xff] }
 0x823   :  { %2180 = vmatpush.msrb.mxu3 %v6082_v57  ;;  %2218 = vmatpush.msrb.mxu2 %v6082_v57 }
 0x824   :  { %4312 = vmatmul.msk.f32.vlgmr.msrb.gmra.mxu3 %vm105_vm2, %v4701_v6 }
 0x825   :  { %2591 = vmatpush.msra.mxu3 %v4347_v46  ;;  %v6312_v46 = vld [vmem:[%s7415_s26 + $0x2] ss:$0 sm:$0xff] }
 0x827   :  { %2592 = vmatpush.msra.mxu3 %v4346_v43 }
 0x828   :  { %v2097_v12 = vpop.f32.mrf.mxu2 }
 0x829   :  { %v2121_v10 = vadd.f32 %v2120_v24, %v2097_v12  ;;  %2593 = vmatpush.msra.mxu3 %v4345_v50 }
 0x82b   :  { %v2128_v27 = vadd.f32 %v4544_v45, %v2121_v10 }
 0x82c   :  { %4313 = vmatmul.msk.f32.gmra.mxu3 %vm105_vm2, %v4702_v7 }
 0x82d   :  { %v2129_v28 = vmax.f32 %v2128_v27, 0.0  ;;  %v4344_v27 = vld [vmem:[%s7412_s27 + $0x40] sm:$0xff] }
 0x82e   :  { %2594 = vmatpush.msra.mxu3 %v4344_v27 }
 0x82f   :  { %4310 = vmatmul.msk.f32.vlgmr.msra.gmra.mxu2 %vm616_vm6, %v2129_v28  ;;  %v4363_v28 = vld [vmem:[%s7413_s7 + $0x4] sm:$0x3] }
 0x830   :  { %2650 = vmatpush.msra.mxu2 %v4343_v0 }
 0x832   :  { %2651 = vmatpush.msra.mxu2 %v4342_v4 }
 0x834   :  { %4314 = vmatmul.msk.f32.gmra.mxu3 %vm105_vm2, %v4703_v59  ;;  %2652 = vmatpush.msra.mxu2 %v4341_v55 }
 0x837   :  { %4319 = vmatmul.msk.f32.vlgmr.msrb.gmra.mxu2 %vm105_vm2, %v4704_v29 }
 0x83c   :  { %4315 = vmatmul.msk.f32.gmra.mxu3 %vm105_vm2, %v4705_v21 }
 0x83f   :  { %4320 = vmatmul.msk.f32.gmra.mxu2 %vm105_vm2, %v4706_v40 }
 0x844   :  { %4316 = vmatmul.msk.f32.gmra.mxu3 %vm105_vm2, %v6117_v47 }
 0x847   :  { %4321 = vmatmul.msk.f32.gmra.mxu2 %vm105_vm2, %v4708_v17 }
 0x84c   :  { %4317 = vmatmul.msk.f32.gmra.mxu3 %vm105_vm2, %v6128_v58 }
 0x84f   :  { %4322 = vmatmul.msk.f32.gmra.mxu2 %vm105_vm2, %v4710_v34 }
 0x854   :  { %4318 = vmatmul.msk.f32.gmra.mxu3 %vm105_vm2, %v6139_v35 }
 0x857   :  { %4323 = vmatmul.msk.f32.gmra.mxu2 %vm105_vm2, %v4712_v36 }
 0x85f   :  { %4324 = vmatmul.msk.f32.gmra.mxu2 %vm105_vm2, %v6150_v8 }
 0x867   :  { %4325 = vmatmul.msk.f32.gmra.mxu2 %vm105_vm2, %v6157_v53 }
 0x8a7   :  { %v2182_v38 = vpop.f32.mrf.mxu3 }
 0x8af   :  { %v2185_v30 = vpop.f32.mrf.mxu3 }
 0x8b2   :  { %v2155_v56 = vpop.f32.mrf.mxu2 }
 0x8b3   :  { %v2158_v23 = vadd.f32 %v2155_v56, %v5601_v42 }
 0x8b5   :  { %v6165_v51 = vadd.f32 %v4545_v37, %v2158_v23  ;;  %v4720_v37 = vld [vmem:[%s7414_s13 + $0x28] sm:$0xff] }
 0x8b7   :  { %2487 = vmatpush.msra.mxu1 %v6165_v51  ;;  %2525 = vmatpush.msrb.mxu0 %v6165_v51  ;;  %v2188_v42 = vpop.f32.mrf.mxu3 }
 0x8b8   :  { %4326 = vmatmul.msk.f32.vlgmr.msra.gmra.mxu1 %vm105_vm2, %v4701_v6  ;;  %4333 = vmatmul.msk.f32.vlgmr.msrb.gmra.mxu0 %vm105_vm2, %v4704_v29  ;;  %v4716_v29 = vld [vmem:[%s7414_s13 + $0x8] sm:$0xff] }
 0x8b9   :  { %4364 = vmatpush.msk.msrb.mxu1 %vm7390_vm4, %v4363_v28 }
 0x8ba   :  { %v2220_v33 = vpop.f32.mrf.mxu2 }
 0x8bb   :  { %v6171_v49 = vsub.f32 %v2182_v38, %v2220_v33 }
 0x8bd   :  { %v2248_v61 = vmul.f32 %v6171_v49, %v6171_v49 }
 0x8bf   :  { %v2255_v14 = vsel %vm314_vm3, %v2248_v61, 0.0  ;;  %v2191_v9 = vpop.f32.mrf.mxu3 }
 0x8c0   :  { %4327 = vmatmul.msk.f32.gmra.mxu1 %vm105_vm2, %v4702_v7  ;;  %4334 = vmatmul.msk.f32.gmra.mxu0 %vm105_vm2, %v4706_v40  ;;  %v4340_v7 = vld [vmem:[%s7411_s29 + $0x40] sm:$0xff] }
 0x8c1   :  { %2256 = vadd.xlane.f32.xlu2 %v2255_v14  ;;  %2653 = vmatpush.msra.mxu2 %v4340_v7 }
 0x8c2   :  { %v2223_v25 = vpop.f32.mrf.mxu2 }
 0x8c3   :  { %v6178_v32 = vsub.f32 %v2185_v30, %v2223_v25  ;;  %v4721_v30 = vld [vmem:[%s7414_s13 + $0x30] sm:$0xff]  ;;  %v4376_v25 = vld [vmem:[%s7363_s16 + $0x58] sm:$0xff] }
 0x8c4   :  { %2807 = vmatpush.msra.mxu0 %v4376_v25 }
 0x8c5   :  { %v2249_v48 = vmul.f32 %v6178_v32, %v6178_v32 }
 0x8c7   :  { %v2258_v39 = vsel %vm314_vm3, %v2249_v48, 0.0  ;;  %v2194_v41 = vpop.f32.mrf.mxu3  ;;  %v4375_v48 = vld [vmem:[%s7363_s16 + $0x50] sm:$0xff] }
 0x8c8   :  { %4328 = vmatmul.msk.f32.gmra.mxu1 %vm105_vm2, %v4703_v59  ;;  %4335 = vmatmul.msk.f32.gmra.mxu0 %vm105_vm2, %v4708_v17  ;;  %v4715_v59 = vld [vmem:[%s7414_s13] sm:$0xff] }
 0x8c9   :  { %2259 = vadd.xlane.f32.xlu2 %v2258_v39  ;;  %v4374_v39 = vld [vmem:[%s7363_s16 + $0x48] sm:$0xff]  ;;  %2808 = vmatpush.msra.mxu0 %v4375_v48 }
 0x8ca   :  { %v2226_v15 = vpop.f32.mrf.mxu2 }
 0x8cb   :  { %v6185_v16 = vsub.f32 %v2188_v42, %v2226_v15  ;;  %v4373_v15 = vld [vmem:[%s7363_s16 + $0x40] sm:$0xff]  ;;  %2809 = vmatpush.msra.mxu0 %v4374_v39 }
 0x8cd   :  { %v2250_v52 = vmul.f32 %v6185_v16, %v6185_v16  ;;  %2810 = vmatpush.msra.mxu0 %v4373_v15 }
 0x8cf   :  { %v2261_v54 = vsel %vm314_vm3, %v2250_v52, 0.0  ;;  %v2197_v60 = vpop.f32.mrf.mxu3 }
 0x8d0   :  { %4329 = vmatmul.msk.f32.gmra.mxu1 %vm105_vm2, %v4705_v21  ;;  %4336 = vmatmul.msk.f32.gmra.mxu0 %vm105_vm2, %v4710_v34  ;;  %v4718_v34 = vld [vmem:[%s7414_s13 + $0x18] sm:$0xff] }
 0x8d1   :  { %2262 = vadd.xlane.f32.xlu2 %v2261_v54 }
 0x8d2   :  { %v2229_v1 = vpop.f32.mrf.mxu2 }
 0x8d3   :  { %v6204_v26 = vsub.f32 %v2191_v9, %v2229_v1 }
 0x8d5   :  { %v2251_v19 = vmul.f32 %v6204_v26, %v6204_v26 }
 0x8d7   :  { %v2264_v63 = vsel %vm314_vm3, %v2251_v19, 0.0  ;;  %v2200_v6 = vpop.f32.mrf.mxu3 }
 0x8d8   :  { %4330 = vmatmul.msk.f32.gmra.mxu1 %vm105_vm2, %v6117_v47  ;;  %4337 = vmatmul.msk.f32.gmra.mxu0 %vm105_vm2, %v4712_v36  ;;  %v4717_v47 = vld [vmem:[%s7414_s13 + $0x10] sm:$0xff] }
 0x8d9   :  { %2265 = vadd.xlane.f32.xlu2 %v2264_v63 }
 0x8da   :  { %v2232_v5 = vpop.f32.mrf.mxu2 }
 0x8db   :  { %v6218_v31 = vsub.f32 %v2194_v41, %v2232_v5  ;;  %v6319_v41 = vld [vmem:[%s7361_s15 + $0x2] ss:$0 sm:$0xff] }
 0x8dd   :  { %v2252_v22 = vmul.f32 %v6218_v31, %v6218_v31 }
 0x8df   :  { %v2267_v13 = vsel %vm314_vm3, %v2252_v22, 0.0 }
 0x8e0   :  { %4331 = vmatmul.msk.f32.gmra.mxu1 %vm105_vm2, %v6128_v58  ;;  %4338 = vmatmul.msk.f32.gmra.mxu0 %vm105_vm2, %v6150_v8  ;;  %v4719_v8 = vld [vmem:[%s7414_s13 + $0x20] sm:$0xff] }
 0x8e1   :  { %2268 = vadd.xlane.f32.xlu2 %v2267_v13 }
 0x8e2   :  { %v2235_v11 = vpop.f32.mrf.mxu2 }
 0x8e3   :  { %v6227_v18 = vsub.f32 %v2197_v60, %v2235_v11 }
 0x8e5   :  { %v2253_v2 = vmul.f32 %v6227_v18, %v6227_v18 }
 0x8e7   :  { %v2270_v44 = vsel %vm314_vm3, %v2253_v2, 0.0 }
 0x8e8   :  { %4332 = vmatmul.msk.f32.gmra.mxu1 %vm105_vm2, %v6139_v35  ;;  %4339 = vmatmul.msk.f32.gmra.mxu0 %vm105_vm2, %v6157_v53 }
 0x8e9   :  { %2271 = vadd.xlane.f32.xlu2 %v2270_v44 }
 0x8ea   :  { %v2238_v45 = vpop.f32.mrf.mxu2 }
 0x8eb   :  { %v6236_v24 = vsub.f32 %v2200_v6, %v2238_v45 }
 0x8ed   :  { %v2254_v12 = vmul.f32 %v6236_v24, %v6236_v24 }
 0x8ef   :  { %v2273_v10 = vsel %vm314_vm3, %v2254_v12, 0.0 }
 0x8f0   :  { %4365 = vmatmul.msk.f32.vlgmr.msrb.gmra.mxu1 %vm7451_vm5, %v4715_v59 }
 0x8f1   :  { %2274 = vadd.xlane.f32.xlu2 %v2273_v10 }
 0x8f8   :  { %4366 = vmatmul.msk.f32.gmra.mxu1 %vm7452_vm13, %v4716_v29 }
 0x900   :  { %4367 = vmatmul.msk.f32.gmra.mxu1 %vm7453_vm14, %v4717_v47 }
 0x908   :  { %4368 = vmatmul.msk.f32.gmra.mxu1 %vm7454_vm15, %v4718_v34 }
 0x910   :  { %4369 = vmatmul.msk.f32.gmra.mxu1 %vm7455_vm1, %v4719_v8 }
 0x918   :  { %4370 = vmatmul.msk.f32.gmra.mxu1 %vm7456_vm7, %v4720_v37  ;;  %v4388_v37 = vld [vmem:[%s7364_s18 + $0x58] sm:$0xff] }
 0x919   :  { %2883 = vmatpush.msrb.mxu3 %v4388_v37 }
 0x920   :  { %4371 = vmatmul.msk.f32.gmra.mxu1 %vm7457_vm0, %v4721_v30 }
 0x934   :  { %v6305_v9 = vpop.xlane.xlu2 %2256 }
 0x935   :  { %v2489_v21 = vpop.f32.mrf.mxu1  ;;  %v2527_v40 = vpop.f32.mrf.mxu0  ;;  %v2681_v0 = vmul.f32 %v6312_v46, %v6305_v9  ;;  %vm2283_vm8 = vcmp.eq.f32.partialorder %v6305_v9, inf  ;;  %vm2285_vm12 = vcmp.eq.f32.partialorder %v6305_v9, 0.0 }
 0x936   :  { %4348 = vmatmul.msk.f32.vlgmr.msra.gmra.mxu3 %vm616_vm6, %v2527_v40  ;;  %4355 = vmatmul.msk.f32.vlgmr.msra.gmra.mxu2 %vm616_vm6, %v2489_v21 }
 0x93c   :  { %v6307_v54 = vpop.xlane.xlu2 %2259 }
 0x93d   :  { %v2492_v17 = vpop.f32.mrf.mxu1  ;;  %v2530_v58 = vpop.f32.mrf.mxu0  ;;  %v2682_v22 = vmul.f32 %v6312_v46, %v6307_v54  ;;  %vm2295_vm1 = vcmp.eq.f32.partialorder %v6307_v54, inf }
 0x93e   :  { %4349 = vmatmul.msk.f32.gmra.mxu3 %vm616_vm6, %v2530_v58  ;;  %4356 = vmatmul.msk.f32.gmra.mxu2 %vm616_vm6, %v2492_v17 }
 0x944   :  { %v6321_v19 = vpop.xlane.xlu2 %2262 }
 0x945   :  { %v2495_v35 = vpop.f32.mrf.mxu1  ;;  %v2533_v36 = vpop.f32.mrf.mxu0  ;;  %v2683_v27 = vmul.f32 %v6312_v46, %v6321_v19  ;;  %vm2307_vm7 = vcmp.eq.f32.partialorder %v6321_v19, inf }
 0x946   :  { %4350 = vmatmul.msk.f32.gmra.mxu3 %vm616_vm6, %v2533_v36  ;;  %4357 = vmatmul.msk.f32.gmra.mxu2 %vm616_vm6, %v2495_v35 }
 0x94c   :  { %v6327_v12 = vpop.xlane.xlu2 %2265 }
 0x94d   :  { %v2498_v53 = vpop.f32.mrf.mxu1  ;;  %v2536_v38 = vpop.f32.mrf.mxu0  ;;  %v2684_v58 = vmul.f32 %v6312_v46, %v6327_v12  ;;  %vm2319_vm15 = vcmp.eq.f32.partialorder %v6327_v12, inf }
 0x94e   :  { %4351 = vmatmul.msk.f32.gmra.mxu3 %vm616_vm6, %v2536_v38  ;;  %4358 = vmatmul.msk.f32.gmra.mxu2 %vm616_vm6, %v2498_v53 }
 0x954   :  { %v6336_v53 = vpop.xlane.xlu2 %2268 }
 0x955   :  { %v2501_v56 = vpop.f32.mrf.mxu1  ;;  %v2539_v23 = vpop.f32.mrf.mxu0  ;;  %vm2331_vm13 = vcmp.eq.f32.partialorder %v6336_v53, inf  ;;  %vm2333_vm0 = vcmp.eq.f32.partialorder %v6336_v53, 0.0 }
 0x956   :  { %4352 = vmatmul.msk.f32.gmra.mxu3 %vm616_vm6, %v2539_v23  ;;  %4359 = vmatmul.msk.f32.gmra.mxu2 %vm616_vm6, %v2501_v56 }
 0x95c   :  { %v6346_v39 = vpop.xlane.xlu2 %2271 }
 0x95d   :  { %v2504_v33 = vpop.f32.mrf.mxu1  ;;  %v2542_v61 = vpop.f32.mrf.mxu0  ;;  %vm2343_vm10 = vcmp.eq.f32.partialorder %v6346_v39, inf  ;;  %vm2345_vm14 = vcmp.eq.f32.partialorder %v6346_v39, 0.0 }
 0x95e   :  { %4353 = vmatmul.msk.f32.gmra.mxu3 %vm616_vm6, %v2542_v61  ;;  %4360 = vmatmul.msk.f32.gmra.mxu2 %vm616_vm6, %v2504_v33  ;;  %v2685_v33 = vmul.f32 %v6312_v46, %v6336_v53 }
 0x965   :  { %v2507_v14 = vpop.f32.mrf.mxu1  ;;  %v2545_v42 = vpop.f32.mrf.mxu0 }
 0x966   :  { %4354 = vmatmul.msk.f32.gmra.mxu3 %vm616_vm6, %v2545_v42  ;;  %4361 = vmatmul.msk.f32.gmra.mxu2 %vm616_vm6, %v2507_v14 }
 0x96d   :  { %v2717_v52 = vpop.f32.mrf.mxu1 }
 0x975   :  { %v2720_v43 = vpop.f32.mrf.mxu1 }
 0x97d   :  { %v2723_v44 = vpop.f32.mrf.mxu1 }
 0x985   :  { %v2726_v40 = vpop.f32.mrf.mxu1 }
 0x98d   :  { %v2729_v23 = vpop.f32.mrf.mxu1 }
 0x9b9   :  { %v2596_v1 = vpop.f32.mrf.mxu3  ;;  %v2655_v4 = vpop.f32.mrf.mxu2 }
 0x9ba   :  { %v2656_v50 = vadd.f32 %v2655_v4, %v2596_v1 }
 0x9bc   :  { %v2688_v55 = vadd.f32 %v2681_v0, %v2656_v50  ;;  %v2686_v0 = vmul.f32 %v6312_v46, %v6346_v39 }
 0x9be   :  { %v2738_v63 = vadd.f32 %v2717_v52, %v2688_v55 }
 0x9c0   :  { %v2750_v5 = vadd.f32 %v6319_v41, %v2738_v63 }
 0x9c1   :  { %v2599_v60 = vpop.f32.mrf.mxu3  ;;  %v2658_v13 = vpop.f32.mrf.mxu2 }
 0x9c2   :  { %v2757_v11 = vmax.f32 %v2750_v5, 0.0  ;;  %v2659_v2 = vadd.f32 %v2658_v13, %v2599_v60 }
 0x9c4   :  { %4378 = vmatmul.msk.f32.vlgmr.msra.gmra.mxu0 %vm616_vm6, %v2757_v11  ;;  %v2689_v6 = vadd.f32 %v2682_v22, %v2659_v2  ;;  %v6352_v22 = vpop.xlane.xlu2 %2274 }
 0x9c5   :  { %v2687_v13 = vmul.f32 %v6312_v46, %v6352_v22  ;;  %v4386_v46 = vld [vmem:[%s7364_s18 + $0x48] sm:$0xff]  ;;  %4619 = vrsqrt.f32 %v6352_v22  ;;  %vm2355_vm9 = vcmp.eq.f32.partialorder %v6352_v22, inf  ;;  %vm2357_vm5 = vcmp.eq.f32.partialorder %v6352_v22, 0.0 }
 0x9c6   :  { %v2739_v45 = vadd.f32 %v2720_v43, %v2689_v6  ;;  %v2732_v43 = vpop.f32.mrf.mxu1  ;;  %4621 = vrsqrt.f32 %v6346_v39 }
 0x9c7   :  { %4623 = vrsqrt.f32 %v6336_v53 }
 0x9c8   :  { %v2751_v10 = vadd.f32 %v6319_v41, %v2739_v45  ;;  %4625 = vrsqrt.f32 %v6305_v9 }
 0x9c9   :  { %v2602_v7 = vpop.f32.mrf.mxu3  ;;  %v2661_v28 = vpop.f32.mrf.mxu2  ;;  %4627 = vrsqrt.f32 %v6327_v12 }
 0x9ca   :  { %v2758_v59 = vmax.f32 %v2751_v10, 0.0  ;;  %v2662_v29 = vadd.f32 %v2661_v28, %v2602_v7  ;;  %4629 = vrsqrt.f32 %v6321_v19 }
 0x9cb   :  { %4631 = vrsqrt.f32 %v6307_v54 }
 0x9cc   :  { %4379 = vmatmul.msk.f32.gmra.mxu0 %vm616_vm6, %v2758_v59  ;;  %v2690_v21 = vadd.f32 %v2683_v27, %v2662_v29  ;;  %v4387_v59 = vld [vmem:[%s7364_s18 + $0x50] sm:$0xff]  ;;  %v4385_v29 = vld [vmem:[%s7364_s18 + $0x40] sm:$0xff] }
 0x9cd   :  { %2884 = vmatpush.msrb.mxu3 %v4387_v59 }
 0x9ce   :  { %v2740_v47 = vadd.f32 %v2723_v44, %v2690_v21  ;;  %v2735_v45 = vpop.f32.mrf.mxu1 }
 0x9cf   :  { %2885 = vmatpush.msrb.mxu3 %v4386_v46 }
 0x9d0   :  { %v2752_v17 = vadd.f32 %v6319_v41, %v2740_v47 }
 0x9d1   :  { %v2605_v34 = vpop.f32.mrf.mxu3  ;;  %v2664_v35 = vpop.f32.mrf.mxu2  ;;  %2886 = vmatpush.msrb.mxu3 %v4385_v29 }
 0x9d2   :  { %v2759_v36 = vmax.f32 %v2752_v17, 0.0  ;;  %v2665_v8 = vadd.f32 %v2664_v35, %v2605_v34 }
 0x9d4   :  { %4380 = vmatmul.msk.f32.gmra.mxu0 %vm616_vm6, %v2759_v36  ;;  %v2691_v38 = vadd.f32 %v2684_v58, %v2665_v8 }
 0x9d6   :  { %v2741_v56 = vadd.f32 %v2726_v40, %v2691_v38 }
 0x9d8   :  { %v2753_v30 = vadd.f32 %v6319_v41, %v2741_v56 }
 0x9d9   :  { %v2608_v61 = vpop.f32.mrf.mxu3  ;;  %v2667_v14 = vpop.f32.mrf.mxu2 }
 0x9da   :  { %v2760_v42 = vmax.f32 %v2753_v30, 0.0  ;;  %v2668_v25 = vadd.f32 %v2667_v14, %v2608_v61 }
 0x9dc   :  { %4381 = vmatmul.msk.f32.gmra.mxu0 %vm616_vm6, %v2760_v42  ;;  %v2692_v48 = vadd.f32 %v2685_v33, %v2668_v25 }
 0x9de   :  { %v2742_v15 = vadd.f32 %v2729_v23, %v2692_v48 }
 0x9e0   :  { %v2754_v52 = vadd.f32 %v6319_v41, %v2742_v15 }
 0x9e1   :  { %v2611_v1 = vpop.f32.mrf.mxu3  ;;  %v2670_v4 = vpop.f32.mrf.mxu2 }
 0x9e2   :  { %v2761_v50 = vmax.f32 %v2754_v52, 0.0  ;;  %v2671_v55 = vadd.f32 %v2670_v4, %v2611_v1  ;;  %v4549_v1 = vld [vmem:[%s7365_s19 + $0x2] ss:$0 sm:$0xff] }
 0x9e4   :  { %4382 = vmatmul.msk.f32.gmra.mxu0 %vm616_vm6, %v2761_v50  ;;  %v2693_v63 = vadd.f32 %v2686_v0, %v2671_v55 }
 0x9e6   :  { %v2743_v5 = vadd.f32 %v2732_v43, %v2693_v63 }
 0x9e8   :  { %v2755_v60 = vadd.f32 %v6319_v41, %v2743_v5  ;;  %v4550_v5 = vld [vmem:[%s7366_s20 + $0x2] ss:$0 sm:$0xff] }
 0x9e9   :  { %v2614_v11 = vpop.f32.mrf.mxu3  ;;  %v2673_v2 = vpop.f32.mrf.mxu2 }
 0x9ea   :  { %v2762_v44 = vmax.f32 %v2755_v60, 0.0  ;;  %v2674_v6 = vadd.f32 %v2673_v2, %v2614_v11 }
 0x9ec   :  { %4383 = vmatmul.msk.f32.gmra.mxu0 %vm616_vm6, %v2762_v44  ;;  %v2694_v10 = vadd.f32 %v2687_v13, %v2674_v6 }
 0x9ee   :  { %v2744_v27 = vadd.f32 %v2735_v45, %v2694_v10 }
 0x9f0   :  { %v2756_v7 = vadd.f32 %v6319_v41, %v2744_v27  ;;  %v4548_v41 = vld [vmem:[%s7362_s17 + $0x2] ss:$0 sm:$0xff] }
 0x9f2   :  { %v2763_v28 = vmax.f32 %v2756_v7, 0.0 }
 0x9f4   :  { %4384 = vmatmul.msk.f32.gmra.mxu0 %vm616_vm6, %v2763_v28 }
 0xa41   :  { %v2812_v21 = vpop.f32.mrf.mxu0 }
 0xa42   :  { %v6372_v40 = vadd.f32 %v4548_v41, %v2812_v21 }
 0xa44   :  { %v7388_v47 = vmax.f32 %v6372_v40, 0.0 }
 0xa46   :  { %4390 = vmatmul.msk.f32.vlgmr.msrb.gmra.mxu3 %vm616_vm6, %v7388_v47 }
 0xa49   :  { %v2815_v17 = vpop.f32.mrf.mxu0 }
 0xa4a   :  { %v6378_v58 = vadd.f32 %v4548_v41, %v2815_v17 }
 0xa4c   :  { %v7389_v34 = vmax.f32 %v6378_v58, 0.0 }
 0xa4e   :  { %4391 = vmatmul.msk.f32.gmra.mxu3 %vm616_vm6, %v7389_v34 }
 0xa51   :  { %v2818_v35 = vpop.f32.mrf.mxu0 }
 0xa52   :  { %v6384_v36 = vadd.f32 %v4548_v41, %v2818_v35 }
 0xa54   :  { %v2835_v8 = vmax.f32 %v6384_v36, 0.0  ;;  %v4400_v36 = vld [vmem:[%s7367_s21 + $0x40] sm:$0xff] }
 0xa56   :  { %4392 = vmatmul.msk.f32.gmra.mxu3 %vm616_vm6, %v2835_v8 }
 0xa59   :  { %v2821_v38 = vpop.f32.mrf.mxu0 }
 0xa5a   :  { %v6390_v37 = vadd.f32 %v4548_v41, %v2821_v38 }
 0xa5c   :  { %v2836_v56 = vmax.f32 %v6390_v37, 0.0  ;;  %v4402_v37 = vld [vmem:[%s7367_s21 + $0x50] sm:$0xff] }
 0xa5e   :  { %4393 = vmatmul.msk.f32.gmra.mxu3 %vm616_vm6, %v2836_v56 }
 0xa61   :  { %v2824_v23 = vpop.f32.mrf.mxu0 }
 0xa62   :  { %v6396_v30 = vadd.f32 %v4548_v41, %v2824_v23 }
 0xa64   :  { %v2837_v33 = vmax.f32 %v6396_v30, 0.0  ;;  %v4404_v30 = vld [vmem:[%s7368_s22 + $0x40] sm:$0xff] }
 0xa66   :  { %4394 = vmatmul.msk.f32.gmra.mxu3 %vm616_vm6, %v2837_v33 }
 0xa69   :  { %v2827_v61 = vpop.f32.mrf.mxu0 }
 0xa6a   :  { %v6402_v14 = vadd.f32 %v4548_v41, %v2827_v61 }
 0xa6c   :  { %v2838_v42 = vmax.f32 %v6402_v14, 0.0 }
 0xa6e   :  { %4395 = vmatmul.msk.f32.gmra.mxu3 %vm616_vm6, %v2838_v42 }
 0xa71   :  { %v2830_v25 = vpop.f32.mrf.mxu0 }
 0xa72   :  { %v6408_v48 = vadd.f32 %v4548_v41, %v2830_v25 }
 0xa74   :  { %v2839_v15 = vmax.f32 %v6408_v48, 0.0  ;;  %v6712_v48 = vld [vmem:[%s7409_s1] sm:$0xff] }
 0xa76   :  { %4396 = vmatmul.msk.f32.gmra.mxu3 %vm616_vm6, %v2839_v15 }
 0xac9   :  { %v2888_v52 = vpop.f32.mrf.mxu3 }
 0xad1   :  { %v2891_v0 = vpop.f32.mrf.mxu3 }
 0xad2   :  { %v2892_v55 = vadd.f32 %v4549_v1, %v2891_v0  ;;  %v2889_v0 = vadd.f32 %v4549_v1, %v2888_v52 }
 0xad4   :  { %v2910_v13 = vmax.f32 %v2892_v55, 0.0 }
 0xad6   :  { %v2922_v45 = vmul.f32 %v4550_v5, %v2910_v13 }
 0xad8   :  { %v2931_v27 = vsel %vm616_vm6, %v2922_v45, 0.0 }
 0xad9   :  { %v2894_v43 = vpop.f32.mrf.mxu3 }
 0xada   :  { %v2895_v35 = vadd.f32 %v4549_v1, %v2894_v43  ;;  %v4620_v43 = vpop.eup %4619 }
 0xadb   :  { %v4622_v52 = vpop.eup %4621 }
 0xadc   :  { %v2911_v61 = vmax.f32 %v2895_v35, 0.0 }
 0xae1   :  { %v2897_v4 = vpop.f32.mrf.mxu3 }
 0xae2   :  { %v2898_v50 = vadd.f32 %v4549_v1, %v2897_v4  ;;  %v2923_v4 = vmul.f32 %v4550_v5, %v2911_v61 }
 0xae4   :  { %v2912_v63 = vmax.f32 %v2898_v50, 0.0  ;;  %v2909_v50 = vmax.f32 %v2889_v0, 0.0  ;;  %v2934_v55 = vsel %vm616_vm6, %v2923_v4, 0.0 }
 0xae6   :  { %v2924_v60 = vmul.f32 %v4550_v5, %v2912_v63  ;;  %v2921_v63 = vmul.f32 %v4550_v5, %v2909_v50 }
 0xae8   :  { %v2937_v11 = vsel %vm616_vm6, %v2924_v60, 0.0  ;;  %v2928_v60 = vsel %vm616_vm6, %v2921_v63, 0.0 }
 0xae9   :  { %v2900_v2 = vpop.f32.mrf.mxu3  ;;  %2938 = vadd.xlane.f32.xlu1 %v2937_v11  ;;  %v2337_v11 = vmul.f32 %v4622_v52, %v6346_v39 }
 0xaea   :  { %v2901_v44 = vadd.f32 %v4549_v1, %v2900_v2 }
 0xaec   :  { %v2913_v6 = vmax.f32 %v2901_v44, 0.0 }
 0xaee   :  { %v2925_v10 = vmul.f32 %v4550_v5, %v2913_v6 }
 0xaf0   :  { %v2940_v7 = vsel %vm616_vm6, %v2925_v10, 0.0 }
 0xaf1   :  { %v2903_v28 = vpop.f32.mrf.mxu3  ;;  %2932 = vadd.xlane.f32.xlu1 %v2931_v27  ;;  %2941 = vadd.xlane.f32.xlu2 %v2940_v7 }
 0xaf2   :  { %v2904_v59 = vadd.f32 %v4549_v1, %v2903_v28  ;;  %v2338_v28 = vmul.f32 %v4622_v52, %v2337_v11 }
 0xaf4   :  { %v2914_v46 = vmax.f32 %v2904_v59, 0.0  ;;  %v2339_v35 = vmul.f32 0.5, %v2338_v28 }
 0xaf6   :  { %v2926_v29 = vmul.f32 %v4550_v5, %v2914_v46  ;;  %v2340_v50 = vsub.f32 1.5, %v2339_v35 }
 0xaf8   :  { %v2943_v41 = vsel %vm616_vm6, %v2926_v29, 0.0 }
 0xaf9   :  { %2944 = vadd.xlane.f32.xlu2 %v2943_v41  ;;  %v2906_v21 = vpop.f32.mrf.mxu3 }
 0xafa   :  { %v2907_v17 = vadd.f32 %v4549_v1, %v2906_v21  ;;  %v2349_v1 = vmul.f32 %v4620_v43, %v6352_v22 }
 0xafc   :  { %v2915_v38 = vmax.f32 %v2907_v17, 0.0  ;;  %v2350_v45 = vmul.f32 %v4620_v43, %v2349_v1 }
 0xafe   :  { %v2927_v23 = vmul.f32 %v4550_v5, %v2915_v38  ;;  %v4624_v5 = vpop.eup %4623  ;;  %v2351_v29 = vmul.f32 0.5, %v2350_v45 }
 0xaff   :  { %v4626_v13 = vpop.eup %4625  ;;  %v2325_v6 = vmul.f32 %v4624_v5, %v6336_v53 }
 0xb00   :  { %v2946_v25 = vsel %vm616_vm6, %v2927_v23, 0.0  ;;  %v4628_v2 = vpop.eup %4627  ;;  %v2277_v10 = vmul.f32 %v4626_v13, %v6305_v9  ;;  %v2352_v61 = vsub.f32 1.5, %v2351_v29 }
 0xb01   :  { %2947 = vadd.xlane.f32.xlu2 %v2946_v25  ;;  %v4630_v44 = vpop.eup %4629  ;;  %v2313_v7 = vmul.f32 %v4628_v2, %v6327_v12  ;;  %v2326_v46 = vmul.f32 %v4624_v5, %v2325_v6  ;;  %v2341_v6 = vmul.f32 %v4622_v52, %v2340_v50  ;;  %v2298_v50 = vand.u32 2147483648, %v6307_v54 }
 0xb02   :  { %v4632_v27 = vpop.eup %4631  ;;  %v2301_v59 = vmul.f32 %v4630_v44, %v6321_v19  ;;  %v2278_v41 = vmul.f32 %v4626_v13, %v2277_v10 }
 0xb03   :  { %v2289_v21 = vmul.f32 %v4632_v27, %v6307_v54  ;;  %v2314_v17 = vmul.f32 %v4628_v2, %v2313_v7  ;;  %v2327_v23 = vmul.f32 0.5, %v2326_v46  ;;  %v2342_v46 = vmul.f32 %v2341_v6, %v6346_v39 }
 0xb04   :  { %v2302_v38 = vmul.f32 %v4630_v44, %v2301_v59  ;;  %v2279_v25 = vmul.f32 0.5, %v2278_v41 }
 0xb05   :  { %v2290_v0 = vmul.f32 %v4632_v27, %v2289_v21  ;;  %v2315_v4 = vmul.f32 0.5, %v2314_v17  ;;  %v2328_v63 = vsub.f32 1.5, %v2327_v23  ;;  %v2344_v21 = vsel %vm2343_vm10, %v6346_v39, %v2342_v46 }
 0xb06   :  { %v2280_v1 = vsub.f32 1.5, %v2279_v25  ;;  %vm2309_vm10 = vcmp.eq.f32.partialorder %v6321_v19, 0.0 }
 0xb07   :  { %v2291_v11 = vmul.f32 0.5, %v2290_v0  ;;  %v2316_v47 = vsub.f32 1.5, %v2315_v4  ;;  %v2329_v10 = vmul.f32 %v4624_v5, %v2328_v63 }
 0xb08   :  { %v2281_v7 = vmul.f32 %v4626_v13, %v2280_v1 }
 0xb09   :  { %2935 = vadd.xlane.f32.xlu2 %v2934_v55  ;;  %v2303_v55 = vmul.f32 0.5, %v2302_v38  ;;  %v2292_v28 = vsub.f32 1.5, %v2291_v11  ;;  %v2317_v59 = vmul.f32 %v4628_v2, %v2316_v47  ;;  %v2330_v52 = vmul.f32 %v2329_v10, %v6336_v53 }
 0xb0a   :  { %v2282_v13 = vmul.f32 %v2281_v7, %v6305_v9  ;;  %v2346_v2 = vand.u32 2147483648, %v6346_v39  ;;  %v2322_v38 = vand.u32 2147483648, %v6327_v12 }
 0xb0b   :  { %v2304_v45 = vsub.f32 1.5, %v2303_v55  ;;  %v2293_v47 = vmul.f32 %v4632_v27, %v2292_v28  ;;  %v2318_v41 = vmul.f32 %v2317_v59, %v6327_v12  ;;  %v2332_v27 = vsel %vm2331_vm13, %v6336_v53, %v2330_v52 }
 0xb0c   :  { %v2284_v35 = vsel %vm2283_vm8, %v6305_v9, %v2282_v13  ;;  %v2347_v23 = vsel %vm2345_vm14, %v2346_v2, %v2344_v21  ;;  %vm2297_vm8 = vcmp.eq.f32.partialorder %v6307_v54, 0.0 }
 0xb0d   :  { %v2305_v29 = vmul.f32 %v4630_v44, %v2304_v45  ;;  %v2286_v44 = vand.u32 2147483648, %v6305_v9  ;;  %v2294_v39 = vmul.f32 %v2293_v47, %v6307_v54  ;;  %v2320_v25 = vsel %vm2319_vm15, %v6327_v12, %v2318_v41 }
 0xb0e   :  { %v6478_v55 = vadd.f32 1e-08, %v2347_v23 }
 0xb0f   :  { %v2306_v17 = vmul.f32 %v2305_v29, %v6321_v19  ;;  %v2287_v63 = vsel %vm2285_vm12, %v2286_v44, %v2284_v35 }
 0xb10   :  { %v6489_v11 = vadd.f32 1e-08, %v2287_v63  ;;  %vm2447_vm13 = vweird.f32 %v6478_v55  ;;  %v2453_v63 = vand.u32 2147483648, %v6478_v55 }
 0xb11   :  { %2929 = vadd.xlane.f32.xlu2 %v2928_v60  ;;  %v2353_v60 = vmul.f32 %v4620_v43, %v2352_v61  ;;  %v2358_v43 = vand.u32 2147483648, %v6352_v22  ;;  %v2310_v61 = vand.u32 2147483648, %v6321_v19  ;;  %v2308_v4 = vsel %vm2307_vm7, %v6321_v19, %v2306_v17 }
 0xb13   :  { %v2354_v34 = vmul.f32 %v2353_v60, %v6352_v22  ;;  %v2296_v60 = vsel %vm2295_vm1, %v6307_v54, %v2294_v39  ;;  %v2311_v19 = vsel %vm2309_vm10, %v2310_v61, %v2308_v4 }
 0xb14   :  { %v2299_v45 = vsel %vm2297_vm8, %v2298_v50, %v2296_v60  ;;  %v6494_v9 = vadd.f32 1e-08, %v2311_v19 }
 0xb15   :  { %v2356_v5 = vsel %vm2355_vm9, %v6352_v22, %v2354_v34  ;;  %v2334_v22 = vand.u32 2147483648, %v6336_v53  ;;  %vm2321_vm9 = vcmp.eq.f32.partialorder %v6327_v12, 0.0  ;;  %v6497_v10 = vadd.f32 1e-08, %v2299_v45 }
 0xb16   :  { %v2359_v34 = vsel %vm2357_vm5, %v2358_v43, %v2356_v5  ;;  %v2323_v12 = vsel %vm2321_vm9, %v2322_v38, %v2320_v25  ;;  %vm2402_vm14 = vweird.f32 %v6494_v9  ;;  %v2451_v45 = vand.u32 2147483647, %v6478_v55 }
 0xb17   :  { %v6473_v0 = vadd.f32 1e-08, %v2359_v34  ;;  %v2335_v53 = vsel %vm2333_vm0, %v2334_v22, %v2332_v27  ;;  %v6491_v6 = vadd.f32 1e-08, %v2323_v12  ;;  %vm2387_vm15 = vweird.f32 %v6497_v10 }
 0xb18   :  { %v6486_v1 = vadd.f32 1e-08, %v2335_v53  ;;  %v2393_v60 = vand.u32 2147483648, %v6497_v10 }
 0xb19   :  { %4633 = vrcp.f32 %v6473_v0  ;;  %vm2462_vm12 = vweird.f32 %v6473_v0  ;;  %v2468_v23 = vand.u32 2147483648, %v6473_v0  ;;  %v2466_v53 = vand.u32 2147483647, %v6473_v0 }
 0xb1a   :  { %4635 = vrcp.f32 %v6478_v55  ;;  %vm2417_vm7 = vweird.f32 %v6491_v6  ;;  %vm2432_vm0 = vweird.f32 %v6486_v1 }
 0xb1b   :  { %4637 = vrcp.f32 %v6486_v1 }
 0xb1c   :  { %4639 = vrcp.f32 %v6489_v11 }
 0xb1d   :  { %4641 = vrcp.f32 %v6491_v6 }
 0xb1e   :  { %4643 = vrcp.f32 %v6494_v9 }
 0xb1f   :  { %v6500_v54 = vpop.eup %4633  ;;  %4645 = vrcp.f32 %v6497_v10 }
 0xb20   :  { %v6504_v7 = vpop.eup %4635  ;;  %v2458_v28 = vmul.f32 %v6500_v54, %v6473_v0  ;;  %vm2463_vm5 = vweird.f32 %v6500_v54  ;;  %v4414_v0 = vld [vmem:[%s7370_s24 + $0x58] sm:$0xff] }
 0xb21   :  { %v6509_v59 = vpop.eup %4637  ;;  %v2443_v29 = vmul.f32 %v6504_v7, %v6478_v55  ;;  %vm2448_vm1 = vweird.f32 %v6504_v7  ;;  %vm6553_vm9 = vmor %vm2462_vm12, %vm2463_vm5  ;;  %vm2467_vm12 = vcmp.eq.f32.partialorder %v2466_v53, 8.507059e+37  ;;  %v2406_v53 = vand.u32 2147483647, %v6494_v9 }
 0xb22   :  { %v6511_v46 = vpop.eup %4639  ;;  %v2428_v5 = vmul.f32 %v6509_v59, %v6486_v1  ;;  %v2459_v13 = vsub.f32 1.0, %v2458_v28  ;;  %vm2433_vm10 = vweird.f32 %v6509_v59  ;;  %v2438_v28 = vand.u32 2147483648, %v6486_v1  ;;  %vm6565_vm4 = vmor %vm2447_vm13, %vm2448_vm1 }
 0xb23   :  { %v6515_v43 = vpop.eup %4641  ;;  %v6523_v47 = vmul.f32 %v6511_v46, %v6489_v11  ;;  %v2444_v41 = vsub.f32 1.0, %v2443_v29  ;;  %vm6581_vm5 = vmor %vm2432_vm0, %vm2433_vm10  ;;  %vm2452_vm1 = vcmp.eq.f32.partialorder %v2451_v45, 8.507059e+37 }
 0xb24   :  { %v6517_v52 = vpop.eup %4643  ;;  %v2413_v44 = vmul.f32 %v6515_v43, %v6491_v6  ;;  %v2429_v22 = vsub.f32 1.0, %v2428_v5  ;;  %v2460_v34 = vmul.f32 %v6500_v54, %v2459_v13  ;;  %vm2418_vm8 = vweird.f32 %v6515_v43 }
 0xb25   :  { %v6525_v2 = vpop.eup %4645  ;;  %v2398_v17 = vmul.f32 %v6517_v52, %v6494_v9  ;;  %v2369_v35 = vsub.f32 1.0, %v6523_v47  ;;  %v2445_v38 = vmul.f32 %v6504_v7, %v2444_v41  ;;  %v2469_v5 = vor.u32 1.1754944e-38, %v2468_v23  ;;  %vm6595_vm0 = vmor %vm2417_vm7, %vm2418_vm8 }
 0xb26   :  { %v2383_v27 = vmul.f32 %v6525_v2, %v6497_v10  ;;  %v2414_v39 = vsub.f32 1.0, %v2413_v44  ;;  %v2430_v25 = vmul.f32 %v6509_v59, %v2429_v22  ;;  %v2461_v4 = vadd.f32 %v6500_v54, %v2460_v34 }
 0xb27   :  { %v2399_v61 = vsub.f32 1.0, %v2398_v17  ;;  %v2446_v19 = vadd.f32 %v6504_v7, %v2445_v38  ;;  %v2436_v41 = vand.u32 2147483647, %v6486_v1  ;;  %v2423_v22 = vand.u32 2147483648, %v6491_v6 }
 0xb28   :  { %v2384_v50 = vsub.f32 1.0, %v2383_v27  ;;  %v2415_v12 = vmul.f32 %v6515_v43, %v2414_v39  ;;  %v2431_v44 = vadd.f32 %v6509_v59, %v2430_v25  ;;  %v2465_v17 = vsel %vm6553_vm9, %v6500_v54, %v2461_v4 }
 0xb29   :  { %v2400_v13 = vmul.f32 %v6517_v52, %v2399_v61  ;;  %v2454_v27 = vor.u32 1.1754944e-38, %v2453_v63  ;;  %vm2403_vm13 = vweird.f32 %v6517_v52  ;;  %v2421_v54 = vand.u32 2147483647, %v6491_v6 }
 0xb2a   :  { %v2385_v55 = vmul.f32 %v6525_v2, %v2384_v50  ;;  %v2416_v39 = vadd.f32 %v6515_v43, %v2415_v12  ;;  %v2450_v38 = vsel %vm6565_vm4, %v6504_v7, %v2446_v19  ;;  %vm2388_vm9 = vweird.f32 %v6525_v2  ;;  %vm6612_vm7 = vmor %vm2402_vm14, %vm2403_vm13  ;;  %v6776_v19 = vld [vmem:[%s7408_s8 + $0x28] sm:$0xff] }
 0xb2b   :  { %v2439_v23 = vor.u32 1.1754944e-38, %v2438_v28  ;;  %v2470_v61 = vsel %vm2467_vm12, %v2469_v5, %v2465_v17  ;;  %v2408_v25 = vand.u32 2147483648, %v6494_v9  ;;  %v2435_v4 = vsel %vm6581_vm5, %v6509_v59, %v2431_v44  ;;  %vm6625_vm8 = vmor %vm2387_vm15, %vm2388_vm9 }
 0xb2c   :  { %vm2437_vm4 = vcmp.eq.f32.partialorder %v2436_v41, 8.507059e+37  ;;  %v2401_v7 = vadd.f32 %v6517_v52, %v2400_v13  ;;  %v2424_v6 = vor.u32 1.1754944e-38, %v2423_v22  ;;  %v2391_v63 = vand.u32 2147483647, %v6497_v10 }
 0xb2d   :  { %v2455_v12 = vsel %vm2452_vm1, %v2454_v27, %v2450_v38  ;;  %v2420_v59 = vsel %vm6595_vm0, %v6515_v43, %v2416_v39  ;;  %vm2422_vm10 = vcmp.eq.f32.partialorder %v2421_v54, 8.507059e+37  ;;  %v2386_v45 = vadd.f32 %v6525_v2, %v2385_v55 }
 0xb2e   :  { %v2471_v28 = vmul.f32 %v2470_v61, %v6236_v24  ;;  %v2440_v9 = vsel %vm2437_vm4, %v2439_v23, %v2435_v4  ;;  %v2409_v13 = vor.u32 1.1754944e-38, %v2408_v25  ;;  %v2370_v43 = vmul.f32 %v6511_v46, %v2369_v35 }
 0xb2f   :  { %v2456_v44 = vmul.f32 %v2455_v12, %v6227_v18  ;;  %v2405_v24 = vsel %vm6612_vm7, %v6517_v52, %v2401_v7  ;;  %vm2407_vm14 = vcmp.eq.f32.partialorder %v2406_v53, 8.507059e+37  ;;  %v2425_v10 = vsel %vm2422_vm10, %v2424_v6, %v2420_v59  ;;  %v6734_v53 = vld [vmem:[%s7408_s8 + $0x10] sm:$0xff]  ;;  %v6769_v12 = vld [vmem:[%s7409_s1 + $0x20] sm:$0xff]  ;;  %v6783_v59 = vld [vmem:[%s7409_s1 + $0x28] sm:$0xff] }
 0xb30   :  { %v2394_v17 = vor.u32 1.1754944e-38, %v2393_v60  ;;  %vm2372_vm15 = vweird.f32 %v6489_v11  ;;  %vm2373_vm12 = vweird.f32 %v6511_v46  ;;  %v2390_v47 = vsel %vm6625_vm8, %v6525_v2, %v2386_v45  ;;  %v6741_v6 = vld [vmem:[%s7409_s1 + $0x10] sm:$0xff]  ;;  %v6762_v60 = vld [vmem:[%s7408_s8 + $0x20] sm:$0xff] }
 0xb31   :  { %vm2392_vm5 = vcmp.eq.f32.partialorder %v2391_v63, 8.507059e+37  ;;  %v2441_v35 = vmul.f32 %v2440_v9, %v6218_v31  ;;  %v2410_v22 = vsel %vm2407_vm14, %v2409_v13, %v2405_v24  ;;  %v2378_v55 = vand.u32 2147483648, %v6489_v11  ;;  %vm2374_vm13 = vmor %vm2372_vm15, %vm2373_vm12  ;;  %v6755_v63 = vld [vmem:[%s7409_s1 + $0x18] sm:$0xff]  ;;  %v6790_v45 = vld [vmem:[%s7408_s8 + $0x30] sm:$0xff] }
 0xb32   :  { %v2426_v52 = vmul.f32 %v2425_v10, %v6204_v26  ;;  %v2371_v27 = vadd.f32 %v6511_v46, %v2370_v43  ;;  %v2376_v39 = vand.u32 2147483647, %v6489_v11  ;;  %v2395_v54 = vsel %vm2392_vm5, %v2394_v17, %v2390_v47  ;;  %v4413_v9 = vld [vmem:[%s7370_s24 + $0x50] sm:$0xff]  ;;  %v4411_v13 = vld [vmem:[%s7370_s24 + $0x40] sm:$0xff] }
 0xb33   :  { %v2411_v31 = vmul.f32 %v2410_v22, %v6185_v16  ;;  %v2379_v1 = vor.u32 1.1754944e-38, %v2378_v55  ;;  %v2396_v26 = vmul.f32 %v2395_v54, %v6178_v32  ;;  %v4403_v32 = vld [vmem:[%s7367_s21 + $0x58] sm:$0xff]  ;;  %v7471_v16 = vmax.f32 %v6372_v40, 0.0  ;;  %v4551_v43 = vld [vmem:[%s7369_s23 + $0x2] ss:$0 sm:$0xff] }
 0xb34   :  { %vm2377_vm1 = vcmp.eq.f32.partialorder %v2376_v39, 8.507059e+37  ;;  %v4407_v40 = vld [vmem:[%s7368_s22 + $0x58] sm:$0xff]  ;;  %vm7473_vm0 = vcmask 15360  }
 0xb35   :  { %3022 = vmatpush.msra.mxu1 %v4407_v40  ;;  %vm7474_vm9 = vmmov %vm7473_vm0 }
 0xb36   :  { %vm7475_vm4 = vmmov %vm7473_vm0 }
 0xb37   :  { %vm7476_vm7 = vmmov %vm7473_vm0 }
 0xb38   :  { %vm7477_vm10 = vmmov %vm7473_vm0 }
 0xb39   :  { %vm7478_vm8 = vmmov %vm7473_vm0 }
 0xb3a   :  { %vm7479_vm14 = vmmov %vm7473_vm0 }
 0xb5c   :  { %v2939_v50 = vpop.xlane.xlu1 %2938 }
 0xb5d   :  { %v2952_v2 = vmul.f32 %v2939_v50, %v2426_v52  ;;  %v6748_v50 = vld [vmem:[%s7408_s8 + $0x18] sm:$0xff] }
 0xb64   :  { %v6529_v21 = vpop.xlane.xlu2 %2941 }
 0xb65   :  { %v2953_v34 = vmul.f32 %v6529_v21, %v2441_v35  ;;  %v2375_v21 = vsel %vm2374_vm13, %v6511_v46, %v2371_v27 }
 0xb66   :  { %v2380_v25 = vsel %vm2377_vm1, %v2379_v1, %v2375_v21 }
 0xb67   :  { %v2381_v11 = vmul.f32 %v2380_v25, %v6171_v49  ;;  %v7470_v49 = vmax.f32 %v6378_v58, 0.0  ;;  %v4401_v58 = vld [vmem:[%s7367_s21 + $0x48] sm:$0xff] }
 0xb6c   :  { %v2945_v29 = vpop.xlane.xlu2 %2944 }
 0xb6d   :  { %v2954_v18 = vmul.f32 %v2945_v29, %v2456_v44  ;;  %v2933_v29 = vpop.xlane.xlu1 %2932 }
 0xb6e   :  { %v2950_v61 = vmul.f32 %v2933_v29, %v2396_v26 }
 0xb74   :  { %v2948_v5 = vpop.xlane.xlu2 %2947 }
 0xb75   :  { %v2955_v41 = vmul.f32 %v2948_v5, %v2471_v28  ;;  %v6797_v28 = vld [vmem:[%s7409_s1 + $0x30] sm:$0xff]  ;;  %v4412_v5 = vld [vmem:[%s7370_s24 + $0x48] sm:$0xff] }
 0xb77   :  { %2965 = vmatpush.msrb.mxu2 %v2955_v41 }
 0xb79   :  { %2966 = vmatpush.msrb.mxu2 %v2954_v18 }
 0xb7b   :  { %2967 = vmatpush.msrb.mxu2 %v2953_v34 }
 0xb7c   :  { %v2936_v38 = vpop.xlane.xlu2 %2935 }
 0xb7d   :  { %v2951_v23 = vmul.f32 %v2936_v38, %v2411_v31  ;;  %2968 = vmatpush.msrb.mxu2 %v2952_v2 }
 0xb7f   :  { %2969 = vmatpush.msrb.mxu2 %v2951_v23 }
 0xb81   :  { %2970 = vmatpush.msrb.mxu2 %v2950_v61 }
 0xb84   :  { %v2930_v4 = vpop.xlane.xlu2 %2929 }
 0xb85   :  { %v2949_v7 = vmul.f32 %v2930_v4, %v2381_v11 }
 0xb87   :  { %2971 = vmatpush.msrb.mxu2 %v2949_v7 }
 0xb88   :  { %4398 = vmatmul.msk.f32.vlgmr.msrb.gmra.mxu2 %vm1062_vm11, %v5487_v62 }
 0xb89   :  { %2986 = vmatpush.msra.mxu2 %v2839_v15  ;;  %v6726_v15 = vld [vmem:[%s7409_s1 + $0x8] sm:$0xff] }
 0xb8b   :  { %2987 = vmatpush.msra.mxu2 %v2838_v42  ;;  %v6705_v42 = vld [vmem:[%s7408_s8] sm:$0xff] }
 0xb8d   :  { %2988 = vmatpush.msra.mxu2 %v2837_v33 }
 0xb8f   :  { %2989 = vmatpush.msra.mxu2 %v2836_v56  ;;  %v4405_v56 = vld [vmem:[%s7368_s22 + $0x48] sm:$0xff] }
 0xb91   :  { %2990 = vmatpush.msra.mxu2 %v2835_v8  ;;  %v4406_v8 = vld [vmem:[%s7368_s22 + $0x50] sm:$0xff] }
 0xb92   :  { %3023 = vmatpush.msra.mxu1 %v4406_v8 }
 0xb93   :  { %2991 = vmatpush.msra.mxu2 %v7470_v49 }
 0xb94   :  { %3024 = vmatpush.msra.mxu1 %v4405_v56 }
 0xb95   :  { %2992 = vmatpush.msra.mxu2 %v7471_v16 }
 0xb96   :  { %4399 = vmatmul.msk.f32.vlgmr.msra.gmra.mxu2 %vm1062_vm11, %v5235_v3  ;;  %3025 = vmatpush.msra.mxu1 %v4404_v30 }
 0xb97   :  { %3045 = vmatpush.msrb.mxu2 %v4403_v32  ;;  %v4552_v32 = vld [vmem:[%s7371_s25 + $0x2] ss:$0 sm:$0xff] }
 0xb98   :  { %3080 = vmatpush.msrb.mxu1 %v4414_v0 }
 0xb99   :  { %3046 = vmatpush.msrb.mxu2 %v4402_v37 }
 0xb9a   :  { %3081 = vmatpush.msrb.mxu1 %v4413_v9 }
 0xb9b   :  { %3047 = vmatpush.msrb.mxu2 %v4401_v58 }
 0xb9c   :  { %3082 = vmatpush.msrb.mxu1 %v4412_v5 }
 0xb9d   :  { %3048 = vmatpush.msrb.mxu2 %v4400_v36 }
 0xb9e   :  { %4409 = vmatmul.msk.f32.vlgmr.msrb.gmra.mxu2 %vm616_vm6, %v6165_v51  ;;  %3083 = vmatpush.msrb.mxu1 %v4411_v13 }
 0xc0b   :  { %v2973_v33 = vpop.f32.mrf.mxu2 }
 0xc0c   :  { %v6698_v14 = vadd.f32 %v2973_v33, %v6082_v57  ;;  %v6719_v57 = vld [vmem:[%s7408_s8 + $0x8] sm:$0xff] }
 0xc0e   :  { %3110 = vmatpush.msra.mxu2 %v6698_v14  ;;  %3148 = vmatpush.msrb.mxu0 %v6698_v14 }
 0xc0f   :  { %4417 = vmatmul.msk.f32.vlgmr.msra.gmra.mxu2 %vm105_vm2, %v6705_v42  ;;  %4424 = vmatmul.msk.f32.vlgmr.msrb.gmra.mxu0 %vm105_vm2, %v6712_v48 }
 0xc17   :  { %4418 = vmatmul.msk.f32.gmra.mxu2 %vm105_vm2, %v6719_v57  ;;  %4425 = vmatmul.msk.f32.gmra.mxu0 %vm105_vm2, %v6726_v15 }
 0xc19   :  { %v2994_v46 = vpop.f32.mrf.mxu2 }
 0xc1a   :  { %4408 = vmatmul.msk.f32.vlgmr.msra.gmra.mxu1 %vm616_vm6, %v2994_v46 }
 0xc1f   :  { %4419 = vmatmul.msk.f32.gmra.mxu2 %vm105_vm2, %v6734_v53  ;;  %4426 = vmatmul.msk.f32.gmra.mxu0 %vm105_vm2, %v6741_v6 }
 0xc21   :  { %v3050_v44 = vpop.f32.mrf.mxu2 }
 0xc27   :  { %4420 = vmatmul.msk.f32.gmra.mxu2 %vm105_vm2, %v6748_v50  ;;  %4427 = vmatmul.msk.f32.gmra.mxu0 %vm105_vm2, %v6755_v63 }
 0xc2f   :  { %4421 = vmatmul.msk.f32.gmra.mxu2 %vm105_vm2, %v6762_v60  ;;  %4428 = vmatmul.msk.f32.gmra.mxu0 %vm105_vm2, %v6769_v12 }
 0xc37   :  { %4422 = vmatmul.msk.f32.gmra.mxu2 %vm105_vm2, %v6776_v19  ;;  %4429 = vmatmul.msk.f32.gmra.mxu0 %vm105_vm2, %v6783_v59 }
 0xc3f   :  { %4423 = vmatmul.msk.f32.gmra.mxu2 %vm105_vm2, %v6790_v45  ;;  %4430 = vmatmul.msk.f32.gmra.mxu0 %vm105_vm2, %v6797_v28 }
 0xc8c   :  { %v3150_v35 = vpop.f32.mrf.mxu0 }
 0xc92   :  { %v3112_v47 = vpop.f32.mrf.mxu2 }
 0xc93   :  { %v6817_v18 = vsub.f32 %v3112_v47, %v3150_v35  ;;  %v4741_v47 = vld [vmem:[%s7414_s13 + $0x28] sm:$0xff] }
 0xc94   :  { %v3153_v34 = vpop.f32.mrf.mxu0 }
 0xc95   :  { %v3178_v22 = vmul.f32 %v6817_v18, %v6817_v18 }
 0xc97   :  { %v3027_v41 = vpop.f32.mrf.mxu1  ;;  %v3185_v55 = vsel %vm314_vm3, %v3178_v22, 0.0 }
 0xc98   :  { %v3051_v24 = vadd.f32 %v3050_v44, %v3027_v41  ;;  %3186 = vadd.xlane.f32.xlu1 %v3185_v55  ;;  %v4742_v55 = vld [vmem:[%s7414_s13 + $0x30] sm:$0xff] }
 0xc9a   :  { %v3058_v10 = vadd.f32 %v4551_v43, %v3051_v24  ;;  %v3115_v52 = vpop.f32.mrf.mxu2  ;;  %v4739_v43 = vld [vmem:[%s7414_s13 + $0x18] sm:$0xff]  ;;  %v4740_v24 = vld [vmem:[%s7414_s13 + $0x20] sm:$0xff] }
 0xc9b   :  { %v6822_v27 = vsub.f32 %v3115_v52, %v3153_v34 }
 0xc9c   :  { %v3059_v17 = vmax.f32 %v3058_v10, 0.0  ;;  %v3156_v31 = vpop.f32.mrf.mxu0 }
 0xc9d   :  { %v3179_v39 = vmul.f32 %v6822_v27, %v6822_v27 }
 0xc9e   :  { %4415 = vmatmul.msk.f32.vlgmr.msrb.gmra.mxu1 %vm616_vm6, %v3059_v17 }
 0xc9f   :  { %v3188_v54 = vsel %vm314_vm3, %v3179_v39, 0.0 }
 0xca0   :  { %3189 = vadd.xlane.f32.xlu2 %v3188_v54 }
 0xca2   :  { %v3118_v2 = vpop.f32.mrf.mxu2 }
 0xca3   :  { %v6827_v29 = vsub.f32 %v3118_v2, %v3156_v31  ;;  %v4481_v31 = vld [vmem:[%s7363_s16 + $0x78] sm:$0xff] }
 0xca4   :  { %v3159_v23 = vpop.f32.mrf.mxu0 }
 0xca5   :  { %v3180_v38 = vmul.f32 %v6827_v29, %v6827_v29 }
 0xca7   :  { %v3191_v1 = vsel %vm314_vm3, %v3180_v38, 0.0  ;;  %v4480_v38 = vld [vmem:[%s7363_s16 + $0x70] sm:$0xff] }
 0xca8   :  { %3192 = vadd.xlane.f32.xlu1 %v3191_v1  ;;  %v4479_v1 = vld [vmem:[%s7363_s16 + $0x68] sm:$0xff] }
 0xcaa   :  { %v3121_v26 = vpop.f32.mrf.mxu2 }
 0xcab   :  { %v6832_v21 = vsub.f32 %v3121_v26, %v3159_v23  ;;  %v4478_v26 = vld [vmem:[%s7363_s16 + $0x60] sm:$0xff] }
 0xcac   :  { %v3162_v4 = vpop.f32.mrf.mxu0 }
 0xcad   :  { %v3181_v61 = vmul.f32 %v6832_v21, %v6832_v21 }
 0xcaf   :  { %v3194_v25 = vsel %vm314_vm3, %v3181_v61, 0.0 }
 0xcb0   :  { %3195 = vadd.xlane.f32.xlu2 %v3194_v25  ;;  %v6973_v25 = vld [vmem:[%s7415_s26 + $0x3] ss:$0 sm:$0xff] }
 0xcb2   :  { %v3124_v11 = vpop.f32.mrf.mxu2 }
 0xcb3   :  { %v6837_v7 = vsub.f32 %v3124_v11, %v3162_v4 }
 0xcb4   :  { %v3165_v40 = vpop.f32.mrf.mxu0 }
 0xcb5   :  { %v3182_v49 = vmul.f32 %v6837_v7, %v6837_v7 }
 0xcb7   :  { %v3197_v16 = vsel %vm314_vm3, %v3182_v49, 0.0 }
 0xcb8   :  { %3198 = vadd.xlane.f32.xlu0 %v3197_v16 }
 0xcba   :  { %v3127_v36 = vpop.f32.mrf.mxu2 }
 0xcbb   :  { %v6848_v56 = vsub.f32 %v3127_v36, %v3165_v40  ;;  %v6982_v36 = vld [vmem:[%s7361_s15 + $0x3] ss:$0 sm:$0xff]  ;;  %s7494_s15 = sld [smem:[#allocation14_spill]] }
 0xcbc   :  { %v3168_v46 = vpop.f32.mrf.mxu0 }
 0xcbd   :  { %v3183_v30 = vmul.f32 %v6848_v56, %v6848_v56 }
 0xcc2   :  { %v3130_v33 = vpop.f32.mrf.mxu2 }
 0xcc3   :  { %v6859_v0 = vsub.f32 %v3130_v33, %v3168_v46 }
 0xcc5   :  { %v3184_v9 = vmul.f32 %v6859_v0, %v6859_v0 }
 0xd0b   :  { %v6975_v4 = vpop.xlane.xlu1 %3186 }
 0xd0c   :  { %v3611_v49 = vmul.f32 %v6973_v25, %v6975_v4  ;;  %vm3213_vm1 = vcmp.eq.f32.partialorder %v6975_v4, inf }
 0xd1b   :  { %v3085_v37 = vpop.f32.mrf.mxu1 }
 0xd1c   :  { %v3088_v58 = vadd.f32 %v3085_v37, %v6165_v51  ;;  %v3200_v51 = vsel %vm314_vm3, %v3183_v30, 0.0  ;;  %v6984_v30 = vpop.xlane.xlu2 %3189 }
 0xd1d   :  { %3201 = vadd.xlane.f32.xlu1 %v3200_v51  ;;  %v3612_v46 = vmul.f32 %v6973_v25, %v6984_v30 }
 0xd1e   :  { %v6846_v8 = vadd.f32 %v4552_v32, %v3088_v58 }
 0xd20   :  { %3417 = vmatpush.msra.mxu1 %v6846_v8  ;;  %3455 = vmatpush.msra.mxu3 %v6846_v8 }
 0xd21   :  { %4438 = vmatmul.msk.f32.vlgmr.msra.gmra.mxu3 %vm105_vm2, %v6712_v48  ;;  %4431 = vmatmul.msk.f32.vlgmr.msra.gmra.mxu1 %vm105_vm2, %v6705_v42  ;;  %v3203_v48 = vsel %vm314_vm3, %v3184_v9, 0.0  ;;  %v4452_v42 = vld [vmem:[%s7412_s27 + $0x78] sm:$0xff] }
 0xd22   :  { %3204 = vadd.xlane.f32.xlu2 %v3203_v48  ;;  %3521 = vmatpush.msrb.mxu2 %v4452_v42 }
 0xd23   :  { %3737 = vmatpush.msrb.mxu3 %v4481_v31 }
 0xd25   :  { %3738 = vmatpush.msrb.mxu3 %v4480_v38 }
 0xd27   :  { %3739 = vmatpush.msrb.mxu3 %v4479_v1 }
 0xd29   :  { %4439 = vmatmul.msk.f32.gmra.mxu3 %vm105_vm2, %v6726_v15  ;;  %4432 = vmatmul.msk.f32.gmra.mxu1 %vm105_vm2, %v6719_v57  ;;  %v4451_v57 = vld [vmem:[%s7412_s27 + $0x70] sm:$0xff]  ;;  %v4450_v15 = vld [vmem:[%s7412_s27 + $0x68] sm:$0xff] }
 0xd2a   :  { %3522 = vmatpush.msrb.mxu2 %v4451_v57  ;;  %3740 = vmatpush.msrb.mxu3 %v4478_v26 }
 0xd2c   :  { %3523 = vmatpush.msrb.mxu2 %v4450_v15 }
 0xd31   :  { %4440 = vmatmul.msk.f32.gmra.mxu3 %vm105_vm2, %v6741_v6  ;;  %4433 = vmatmul.msk.f32.gmra.mxu1 %vm105_vm2, %v6734_v53  ;;  %v4449_v53 = vld [vmem:[%s7412_s27 + $0x60] sm:$0xff]  ;;  %v4448_v6 = vld [vmem:[%s7411_s29 + $0x78] sm:$0xff] }
 0xd32   :  { %3524 = vmatpush.msrb.mxu2 %v4449_v53  ;;  %3580 = vmatpush.msra.mxu0 %v4448_v6  ;;  %v6990_v6 = vpop.xlane.xlu1 %3192 }
 0xd39   :  { %4441 = vmatmul.msk.f32.gmra.mxu3 %vm105_vm2, %v6755_v63  ;;  %4434 = vmatmul.msk.f32.gmra.mxu1 %vm105_vm2, %v6748_v50  ;;  %v4447_v50 = vld [vmem:[%s7411_s29 + $0x70] sm:$0xff]  ;;  %v4446_v63 = vld [vmem:[%s7411_s29 + $0x68] sm:$0xff] }
 0xd3a   :  { %3581 = vmatpush.msra.mxu0 %v4447_v50 }
 0xd3c   :  { %3582 = vmatpush.msra.mxu0 %v4446_v63  ;;  %v3613_v63 = vmul.f32 %v6973_v25, %v6990_v6 }
 0xd41   :  { %4442 = vmatmul.msk.f32.gmra.mxu3 %vm105_vm2, %v6769_v12  ;;  %4435 = vmatmul.msk.f32.gmra.mxu1 %vm105_vm2, %v6762_v60  ;;  %v4445_v60 = vld [vmem:[%s7411_s29 + $0x60] sm:$0xff] }
 0xd42   :  { %3583 = vmatpush.msra.mxu0 %v4445_v60  ;;  %v4468_v12 = vld [vmem:[%s7413_s7 + $0x6] sm:$0x3] }
 0xd49   :  { %4443 = vmatmul.msk.f32.gmra.mxu3 %vm105_vm2, %v6783_v59  ;;  %4436 = vmatmul.msk.f32.gmra.mxu1 %vm105_vm2, %v6776_v19  ;;  %v4736_v19 = vld [vmem:[%s7414_s13] sm:$0xff]  ;;  %v4737_v59 = vld [vmem:[%s7414_s13 + $0x8] sm:$0xff] }
 0xd51   :  { %4444 = vmatmul.msk.f32.gmra.mxu3 %vm105_vm2, %v6797_v28  ;;  %4437 = vmatmul.msk.f32.gmra.mxu1 %vm105_vm2, %v6790_v45  ;;  %vm7472_vm2 = vcmask 1041408   ;;  %v4738_v28 = vld [vmem:[%s7414_s13 + $0x10] sm:$0xff] }
 0xd52   :  { %4469 = vmatpush.msk.msrb.mxu1 %vm7472_vm2, %v4468_v12 }
 0xd59   :  { %4470 = vmatmul.msk.f32.vlgmr.msrb.gmra.mxu1 %vm7473_vm0, %v4736_v19 }
 0xd61   :  { %4471 = vmatmul.msk.f32.gmra.mxu1 %vm7474_vm9, %v4737_v59  ;;  %vm3215_vm9 = vcmp.eq.f32.partialorder %v6975_v4, 0.0 }
 0xd69   :  { %4472 = vmatmul.msk.f32.gmra.mxu1 %vm7475_vm4, %v4738_v28 }
 0xd71   :  { %4473 = vmatmul.msk.f32.gmra.mxu1 %vm7476_vm7, %v4739_v43  ;;  %vm3225_vm7 = vcmp.eq.f32.partialorder %v6984_v30, inf }
 0xd79   :  { %4474 = vmatmul.msk.f32.gmra.mxu1 %vm7477_vm10, %v4740_v24  ;;  %vm3237_vm10 = vcmp.eq.f32.partialorder %v6990_v6, inf }
 0xd81   :  { %4475 = vmatmul.msk.f32.gmra.mxu1 %vm7478_vm8, %v4741_v47 }
 0xd89   :  { %4476 = vmatmul.msk.f32.gmra.mxu1 %vm7479_vm14, %v4742_v55  ;;  %v7005_v55 = vpop.xlane.xlu0 %3198  ;;  %vm3227_vm14 = vcmp.eq.f32.partialorder %v6984_v30, 0.0 }
 0xd8a   :  { %vm3261_vm5 = vcmp.eq.f32.partialorder %v7005_v55, inf  ;;  %vm3263_vm0 = vcmp.eq.f32.partialorder %v7005_v55, 0.0 }
 0xd9e   :  { %v3419_v45 = vpop.f32.mrf.mxu1 }
 0xd9f   :  { %4460 = vmatmul.msk.f32.vlgmr.msra.gmra.mxu0 %vm616_vm6, %v3419_v45 }
 0xda4   :  { %v3457_v5 = vpop.f32.mrf.mxu3 }
 0xda5   :  { %4453 = vmatmul.msk.f32.vlgmr.msrb.gmra.mxu2 %vm616_vm6, %v3457_v5 }
 0xda6   :  { %v3422_v13 = vpop.f32.mrf.mxu1 }
 0xda7   :  { %4461 = vmatmul.msk.f32.gmra.mxu0 %vm616_vm6, %v3422_v13  ;;  %v6996_v13 = vpop.xlane.xlu2 %3195 }
 0xda8   :  { %vm3249_vm4 = vcmp.eq.f32.partialorder %v6996_v13, inf  ;;  %vm3251_vm8 = vcmp.eq.f32.partialorder %v6996_v13, 0.0 }
 0xdac   :  { %v3460_v44 = vpop.f32.mrf.mxu3 }
 0xdad   :  { %4454 = vmatmul.msk.f32.gmra.mxu2 %vm616_vm6, %v3460_v44  ;;  %v3614_v44 = vmul.f32 %v6973_v25, %v6996_v13 }
 0xdae   :  { %v3425_v41 = vpop.f32.mrf.mxu1 }
 0xdaf   :  { %4462 = vmatmul.msk.f32.gmra.mxu0 %vm616_vm6, %v3425_v41 }
 0xdb4   :  { %v3463_v10 = vpop.f32.mrf.mxu3 }
 0xdb5   :  { %4455 = vmatmul.msk.f32.gmra.mxu2 %vm616_vm6, %v3463_v10 }
 0xdb6   :  { %v3428_v17 = vpop.f32.mrf.mxu1 }
 0xdb7   :  { %4463 = vmatmul.msk.f32.gmra.mxu0 %vm616_vm6, %v3428_v17 }
 0xdbc   :  { %v3466_v35 = vpop.f32.mrf.mxu3 }
 0xdbd   :  { %4456 = vmatmul.msk.f32.gmra.mxu2 %vm616_vm6, %v3466_v35  ;;  %v4493_v35 = vld [vmem:[%s7364_s18 + $0x78] sm:$0xff] }
 0xdbe   :  { %v3431_v22 = vpop.f32.mrf.mxu1  ;;  %3813 = vmatpush.msra.mxu2 %v4493_v35 }
 0xdbf   :  { %4464 = vmatmul.msk.f32.gmra.mxu0 %vm616_vm6, %v3431_v22 }
 0xdc4   :  { %v3469_v52 = vpop.f32.mrf.mxu3 }
 0xdc5   :  { %4457 = vmatmul.msk.f32.gmra.mxu2 %vm616_vm6, %v3469_v52 }
 0xdc6   :  { %v3434_v34 = vpop.f32.mrf.mxu1 }
 0xdc7   :  { %4465 = vmatmul.msk.f32.gmra.mxu0 %vm616_vm6, %v3434_v34 }
 0xdcc   :  { %v3472_v39 = vpop.f32.mrf.mxu3 }
 0xdcd   :  { %4458 = vmatmul.msk.f32.gmra.mxu2 %vm616_vm6, %v3472_v39  ;;  %v3615_v39 = vmul.f32 %v6973_v25, %v7005_v55 }
 0xdce   :  { %v3437_v54 = vpop.f32.mrf.mxu1 }
 0xdcf   :  { %4466 = vmatmul.msk.f32.gmra.mxu0 %vm616_vm6, %v3437_v54 }
 0xdd4   :  { %v3475_v2 = vpop.f32.mrf.mxu3 }
 0xdd5   :  { %4459 = vmatmul.msk.f32.gmra.mxu2 %vm616_vm6, %v3475_v2 }
 0xdd6   :  { %v3647_v61 = vpop.f32.mrf.mxu1 }
 0xdde   :  { %v3650_v16 = vpop.f32.mrf.mxu1 }
 0xde6   :  { %v3653_v57 = vpop.f32.mrf.mxu1 }
 0xdee   :  { %v3656_v28 = vpop.f32.mrf.mxu1 }
 0xdf6   :  { %v3659_v52 = vpop.f32.mrf.mxu1 }
 0xe1c   :  { %v3585_v23 = vpop.f32.mrf.mxu0 }
 0xe24   :  { %v3588_v11 = vpop.f32.mrf.mxu0 }
 0xe28   :  { %v3526_v32 = vpop.f32.mrf.mxu2 }
 0xe29   :  { %v3586_v37 = vadd.f32 %v3585_v23, %v3526_v32  ;;  %v7011_v23 = vpop.xlane.xlu1 %3201  ;;  %v3662_v32 = vpop.f32.mrf.mxu1 }
 0xe2a   :  { %vm3273_vm12 = vcmp.eq.f32.partialorder %v7011_v23, inf  ;;  %vm3275_vm2 = vcmp.eq.f32.partialorder %v7011_v23, 0.0 }
 0xe2b   :  { %v3618_v58 = vadd.f32 %v3611_v49, %v3586_v37 }
 0xe2c   :  { %v3591_v51 = vpop.f32.mrf.mxu0 }
 0xe2d   :  { %v3668_v40 = vadd.f32 %v3647_v61, %v3618_v58 }
 0xe2f   :  { %v3680_v33 = vadd.f32 %v6982_v36, %v3668_v40 }
 0xe30   :  { %v3529_v9 = vpop.f32.mrf.mxu2 }
 0xe31   :  { %v3687_v48 = vmax.f32 %v3680_v33, 0.0  ;;  %v3589_v42 = vadd.f32 %v3588_v11, %v3529_v9  ;;  %v3616_v11 = vmul.f32 %v6973_v25, %v7011_v23 }
 0xe33   :  { %4483 = vmatmul.msk.f32.vlgmr.msrb.gmra.mxu3 %vm616_vm6, %v3687_v48  ;;  %v3619_v15 = vadd.f32 %v3612_v46, %v3589_v42 }
 0xe34   :  { %v3594_v12 = vpop.f32.mrf.mxu0 }
 0xe35   :  { %v3669_v53 = vadd.f32 %v3650_v16, %v3619_v15  ;;  %v3665_v15 = vpop.f32.mrf.mxu1 }
 0xe37   :  { %v3681_v50 = vadd.f32 %v6982_v36, %v3669_v53 }
 0xe38   :  { %v3532_v60 = vpop.f32.mrf.mxu2 }
 0xe39   :  { %v3688_v19 = vmax.f32 %v3681_v50, 0.0  ;;  %v3592_v59 = vadd.f32 %v3591_v51, %v3532_v60  ;;  %v7017_v51 = vpop.xlane.xlu2 %3204 }
 0xe3a   :  { %v3617_v9 = vmul.f32 %v6973_v25, %v7017_v51  ;;  %v4491_v25 = vld [vmem:[%s7364_s18 + $0x68] sm:$0xff]  ;;  %4647 = vrsqrt.f32 %v7017_v51  ;;  %vm3285_vm15 = vcmp.eq.f32.partialorder %v7017_v51, inf  ;;  %vm3287_vm13 = vcmp.eq.f32.partialorder %v7017_v51, 0.0 }
 0xe3b   :  { %4484 = vmatmul.msk.f32.gmra.mxu3 %vm616_vm6, %v3688_v19  ;;  %v3620_v45 = vadd.f32 %v3613_v63, %v3592_v59  ;;  %v4490_v19 = vld [vmem:[%s7364_s18 + $0x60] sm:$0xff]  ;;  %4649 = vrsqrt.f32 %v7011_v23 }
 0xe3c   :  { %v3597_v17 = vpop.f32.mrf.mxu0  ;;  %4651 = vrsqrt.f32 %v7005_v55 }
 0xe3d   :  { %v3670_v5 = vadd.f32 %v3653_v57, %v3620_v45  ;;  %4653 = vrsqrt.f32 %v6975_v4 }
 0xe3e   :  { %4655 = vrsqrt.f32 %v6996_v13 }
 0xe3f   :  { %v3682_v43 = vadd.f32 %v6982_v36, %v3670_v5  ;;  %4657 = vrsqrt.f32 %v6984_v30 }
 0xe40   :  { %v3535_v41 = vpop.f32.mrf.mxu2  ;;  %4659 = vrsqrt.f32 %v6990_v6 }
 0xe41   :  { %v3689_v24 = vmax.f32 %v3682_v43, 0.0  ;;  %v3595_v10 = vadd.f32 %v3594_v12, %v3535_v41  ;;  %v4492_v12 = vld [vmem:[%s7364_s18 + $0x70] sm:$0xff] }
 0xe42   :  { %3814 = vmatpush.msra.mxu2 %v4492_v12 }
 0xe43   :  { %4485 = vmatmul.msk.f32.gmra.mxu3 %vm616_vm6, %v3689_v24  ;;  %v3621_v47 = vadd.f32 %v3614_v44, %v3595_v10 }
 0xe44   :  { %v3600_v1 = vpop.f32.mrf.mxu0  ;;  %3815 = vmatpush.msra.mxu2 %v4491_v25 }
 0xe45   :  { %v3671_v22 = vadd.f32 %v3656_v28, %v3621_v47 }
 0xe46   :  { %3816 = vmatpush.msra.mxu2 %v4490_v19 }
 0xe47   :  { %v3683_v34 = vadd.f32 %v6982_v36, %v3671_v22 }
 0xe48   :  { %v3538_v54 = vpop.f32.mrf.mxu2 }
 0xe49   :  { %v3690_v2 = vmax.f32 %v3683_v34, 0.0  ;;  %v3598_v31 = vadd.f32 %v3597_v17, %v3538_v54 }
 0xe4b   :  { %4486 = vmatmul.msk.f32.gmra.mxu3 %vm616_vm6, %v3690_v2  ;;  %v3622_v38 = vadd.f32 %v3615_v39, %v3598_v31 }
 0xe4c   :  { %v3603_v33 = vpop.f32.mrf.mxu0 }
 0xe4d   :  { %v3672_v26 = vadd.f32 %v3659_v52, %v3622_v38 }
 0xe4f   :  { %v3684_v61 = vadd.f32 %v6982_v36, %v3672_v26  ;;  %v4508_v26 = vld [vmem:[%s7367_s21 + $0x78] sm:$0xff] }
 0xe50   :  { %v3541_v49 = vpop.f32.mrf.mxu2 }
 0xe51   :  { %v3691_v16 = vmax.f32 %v3684_v61, 0.0  ;;  %v3601_v37 = vadd.f32 %v3600_v1, %v3541_v49  ;;  %v4507_v61 = vld [vmem:[%s7367_s21 + $0x70] sm:$0xff]  ;;  %v4505_v49 = vld [vmem:[%s7367_s21 + $0x60] sm:$0xff] }
 0xe53   :  { %4487 = vmatmul.msk.f32.gmra.mxu3 %vm616_vm6, %v3691_v16  ;;  %v3623_v58 = vadd.f32 %v3616_v11, %v3601_v37  ;;  %v4506_v11 = vld [vmem:[%s7367_s21 + $0x68] sm:$0xff] }
 0xe55   :  { %v3673_v40 = vadd.f32 %v3662_v32, %v3623_v58  ;;  %v4556_v58 = vld [vmem:[%s7365_s19 + $0x3] ss:$0 sm:$0xff] }
 0xe57   :  { %v3685_v46 = vadd.f32 %v6982_v36, %v3673_v40 }
 0xe58   :  { %v3544_v48 = vpop.f32.mrf.mxu2 }
 0xe59   :  { %v3692_v42 = vmax.f32 %v3685_v46, 0.0  ;;  %v3604_v57 = vadd.f32 %v3603_v33, %v3544_v48  ;;  %v4557_v48 = vld [vmem:[%s7366_s20 + $0x3] ss:$0 sm:$0xff] }
 0xe5b   :  { %4488 = vmatmul.msk.f32.gmra.mxu3 %vm616_vm6, %v3692_v42  ;;  %v3624_v53 = vadd.f32 %v3617_v9, %v3604_v57 }
 0xe5d   :  { %v3674_v50 = vadd.f32 %v3665_v15, %v3624_v53 }
 0xe5f   :  { %v3686_v63 = vadd.f32 %v6982_v36, %v3674_v50  ;;  %v4555_v36 = vld [vmem:[%s7362_s17 + $0x3] ss:$0 sm:$0xff] }
 0xe61   :  { %v3693_v60 = vmax.f32 %v3686_v63, 0.0 }
 0xe63   :  { %4489 = vmatmul.msk.f32.gmra.mxu3 %vm616_vm6, %v3693_v60 }
 0xeb6   :  { %v3742_v59 = vpop.f32.mrf.mxu3 }
 0xeb7   :  { %v3743_v45 = vadd.f32 %v4555_v36, %v3742_v59 }
 0xeb9   :  { %v3763_v28 = vmax.f32 %v3743_v45, 0.0 }
 0xebb   :  { %4495 = vmatmul.msk.f32.vlgmr.msra.gmra.mxu2 %vm616_vm6, %v3763_v28 }
 0xebe   :  { %v3745_v5 = vpop.f32.mrf.mxu3 }
 0xebf   :  { %v3746_v43 = vadd.f32 %v4555_v36, %v3745_v5 }
 0xec1   :  { %v3764_v44 = vmax.f32 %v3746_v43, 0.0 }
 0xec3   :  { %4496 = vmatmul.msk.f32.gmra.mxu2 %vm616_vm6, %v3764_v44 }
 0xec6   :  { %v3748_v41 = vpop.f32.mrf.mxu3 }
 0xec7   :  { %v3749_v24 = vadd.f32 %v4555_v36, %v3748_v41 }
 0xec9   :  { %v3765_v10 = vmax.f32 %v3749_v24, 0.0 }
 0xecb   :  { %4497 = vmatmul.msk.f32.gmra.mxu2 %vm616_vm6, %v3765_v10 }
 0xece   :  { %v3751_v17 = vpop.f32.mrf.mxu3 }
 0xecf   :  { %v3752_v47 = vadd.f32 %v4555_v36, %v3751_v17 }
 0xed1   :  { %v3766_v35 = vmax.f32 %v3752_v47, 0.0 }
 0xed3   :  { %4498 = vmatmul.msk.f32.gmra.mxu2 %vm616_vm6, %v3766_v35 }
 0xed6   :  { %v3754_v22 = vpop.f32.mrf.mxu3 }
 0xed7   :  { %v3755_v52 = vadd.f32 %v4555_v36, %v3754_v22 }
 0xed9   :  { %v3767_v34 = vmax.f32 %v3755_v52, 0.0 }
 0xedb   :  { %4499 = vmatmul.msk.f32.gmra.mxu2 %vm616_vm6, %v3767_v34 }
 0xede   :  { %v3757_v39 = vpop.f32.mrf.mxu3 }
 0xedf   :  { %v3758_v54 = vadd.f32 %v4555_v36, %v3757_v39 }
 0xee1   :  { %v3768_v2 = vmax.f32 %v3758_v54, 0.0  ;;  %v4648_v54 = vpop.eup %4647 }
 0xee3   :  { %4500 = vmatmul.msk.f32.gmra.mxu2 %vm616_vm6, %v3768_v2 }
 0xee6   :  { %v3760_v31 = vpop.f32.mrf.mxu3 }
 0xee7   :  { %v3761_v38 = vadd.f32 %v4555_v36, %v3760_v31 }
 0xee9   :  { %v3769_v1 = vmax.f32 %v3761_v38, 0.0  ;;  %v3279_v38 = vmul.f32 %v4648_v54, %v7017_v51 }
 0xeeb   :  { %4501 = vmatmul.msk.f32.gmra.mxu2 %vm616_vm6, %v3769_v1  ;;  %3916 = vmatpush.msra.mxu1 %v3769_v1 }
 0xeed   :  { %3917 = vmatpush.msra.mxu1 %v3768_v2  ;;  %v4650_v2 = vpop.eup %4649 }
 0xeee   :  { %v4652_v31 = vpop.eup %4651 }
 0xeef   :  { %3918 = vmatpush.msra.mxu1 %v3767_v34  ;;  %v4654_v1 = vpop.eup %4653 }
 0xef1   :  { %3919 = vmatpush.msra.mxu1 %v3766_v35 }
 0xef3   :  { %3920 = vmatpush.msra.mxu1 %v3765_v10 }
 0xef5   :  { %3921 = vmatpush.msra.mxu1 %v3764_v44 }
 0xef7   :  { %3922 = vmatpush.msra.mxu1 %v3763_v28 }
 0xef8   :  { %4504 = vmatmul.msk.f32.vlgmr.msra.gmra.mxu1 %vm1062_vm11, %v5235_v3 }
 0xef9   :  { %3975 = vmatpush.msrb.mxu1 %v4508_v26  ;;  %v3267_v26 = vmul.f32 %v4650_v2, %v7011_v23 }
 0xefb   :  { %3976 = vmatpush.msrb.mxu1 %v4507_v61  ;;  %v3255_v61 = vmul.f32 %v4652_v31, %v7005_v55 }
 0xefd   :  { %3977 = vmatpush.msrb.mxu1 %v4506_v11  ;;  %v4656_v11 = vpop.eup %4655 }
 0xeff   :  { %3978 = vmatpush.msrb.mxu1 %v4505_v49  ;;  %v3280_v49 = vmul.f32 %v4648_v54, %v3279_v38  ;;  %v3264_v38 = vand.u32 2147483648, %v7005_v55 }
 0xf00   :  { %4514 = vmatmul.msk.f32.vlgmr.msrb.gmra.mxu1 %vm616_vm6, %v6846_v8 }
 0xf3e   :  { %v3818_v3 = vpop.f32.mrf.mxu2 }
 0xf3f   :  { %v3819_v47 = vadd.f32 %v4556_v58, %v3818_v3  ;;  %v4658_v3 = vpop.eup %4657 }
 0xf41   :  { %v3839_v22 = vmax.f32 %v3819_v47, 0.0 }
 0xf43   :  { %v3851_v34 = vmul.f32 %v4557_v48, %v3839_v22 }
 0xf45   :  { %v3858_v39 = vsel %vm616_vm6, %v3851_v34, 0.0 }
 0xf46   :  { %v3821_v32 = vpop.f32.mrf.mxu2 }
 0xf47   :  { %v3822_v46 = vadd.f32 %v4556_v58, %v3821_v32  ;;  %v3207_v32 = vmul.f32 %v4654_v1, %v6975_v4 }
 0xf49   :  { %v3840_v57 = vmax.f32 %v3822_v46, 0.0  ;;  %v3281_v46 = vmul.f32 0.5, %v3280_v49 }
 0xf4b   :  { %v3852_v12 = vmul.f32 %v4557_v48, %v3840_v57 }
 0xf4d   :  { %v3861_v59 = vsel %vm616_vm6, %v3852_v12, 0.0 }
 0xf4e   :  { %v3824_v16 = vpop.f32.mrf.mxu2 }
 0xf4f   :  { %v3825_v63 = vadd.f32 %v4556_v58, %v3824_v16  ;;  %v4660_v16 = vpop.eup %4659 }
 0xf51   :  { %v3841_v19 = vmax.f32 %v3825_v63, 0.0 }
 0xf53   :  { %v3853_v44 = vmul.f32 %v4557_v48, %v3841_v19 }
 0xf55   :  { %v3864_v10 = vsel %vm616_vm6, %v3853_v44, 0.0 }
 0xf56   :  { %v3827_v37 = vpop.f32.mrf.mxu2 }
 0xf57   :  { %v3828_v5 = vadd.f32 %v4556_v58, %v3827_v37  ;;  %v3268_v37 = vmul.f32 %v4650_v2, %v3267_v26 }
 0xf59   :  { %v3842_v24 = vmax.f32 %v3828_v5, 0.0 }
 0xf5b   :  { %v3854_v35 = vmul.f32 %v4557_v48, %v3842_v24 }
 0xf5d   :  { %v3867_v52 = vsel %vm616_vm6, %v3854_v35, 0.0 }
 0xf5e   :  { %v3830_v40 = vpop.f32.mrf.mxu2 }
 0xf5f   :  { %v3831_v33 = vadd.f32 %v4556_v58, %v3830_v40  ;;  %v3256_v40 = vmul.f32 %v4652_v31, %v3255_v61 }
 0xf61   :  { %v3843_v9 = vmax.f32 %v3831_v33, 0.0  ;;  %v3219_v33 = vmul.f32 %v4658_v3, %v6984_v30 }
 0xf63   :  { %v3855_v42 = vmul.f32 %v4557_v48, %v3843_v9  ;;  %v3208_v9 = vmul.f32 %v4654_v1, %v3207_v32 }
 0xf65   :  { %v3870_v15 = vsel %vm616_vm6, %v3855_v42, 0.0  ;;  %v3269_v42 = vmul.f32 0.5, %v3268_v37  ;;  %v3209_v63 = vmul.f32 0.5, %v3208_v9 }
 0xf66   :  { %v3833_v53 = vpop.f32.mrf.mxu2  ;;  %3871 = vadd.xlane.f32.xlu2 %v3870_v15  ;;  %v3257_v15 = vmul.f32 0.5, %v3256_v40 }
 0xf67   :  { %v3834_v50 = vadd.f32 %v4556_v58, %v3833_v53  ;;  %v3220_v53 = vmul.f32 %v4658_v3, %v3219_v33  ;;  %v3270_v12 = vsub.f32 1.5, %v3269_v42 }
 0xf68   :  { %v3258_v19 = vsub.f32 1.5, %v3257_v15 }
 0xf69   :  { %v3844_v60 = vmax.f32 %v3834_v50, 0.0  ;;  %v3282_v50 = vsub.f32 1.5, %v3281_v46  ;;  %v3271_v5 = vmul.f32 %v4650_v2, %v3270_v12  ;;  %v3240_v46 = vand.u32 2147483648, %v6990_v6 }
 0xf6a   :  { %v3259_v44 = vmul.f32 %v4652_v31, %v3258_v19  ;;  %v3276_v31 = vand.u32 2147483648, %v7011_v23 }
 0xf6b   :  { %v3856_v25 = vmul.f32 %v4557_v48, %v3844_v60  ;;  %v3272_v47 = vmul.f32 %v3271_v5, %v7011_v23 }
 0xf6c   :  { %v3260_v22 = vmul.f32 %v3259_v44, %v7005_v55 }
 0xf6d   :  { %v3873_v36 = vsel %vm616_vm6, %v3856_v25, 0.0 }
 0xf6e   :  { %3874 = vadd.xlane.f32.xlu1 %v3873_v36  ;;  %3862 = vadd.xlane.f32.xlu2 %v3861_v59  ;;  %v3836_v45 = vpop.f32.mrf.mxu2  ;;  %v3221_v36 = vmul.f32 0.5, %v3220_v53  ;;  %v3283_v59 = vmul.f32 %v4648_v54, %v3282_v50  ;;  %v3262_v61 = vsel %vm3261_vm5, %v7005_v55, %v3260_v22  ;;  %v3252_v55 = vand.u32 2147483648, %v6996_v13 }
 0xf6f   :  { %v3837_v28 = vadd.f32 %v4556_v58, %v3836_v45  ;;  %v3243_v58 = vmul.f32 %v4656_v11, %v6996_v13  ;;  %v3210_v45 = vsub.f32 1.5, %v3209_v63 }
 0xf70   :  { %v3284_v24 = vmul.f32 %v3283_v59, %v7017_v51 }
 0xf71   :  { %v3845_v43 = vmax.f32 %v3837_v28, 0.0  ;;  %v3244_v57 = vmul.f32 %v4656_v11, %v3243_v58  ;;  %v3228_v58 = vand.u32 2147483648, %v6984_v30 }
 0xf73   :  { %v3857_v41 = vmul.f32 %v4557_v48, %v3845_v43  ;;  %v3231_v48 = vmul.f32 %v4660_v16, %v6990_v6  ;;  %v3245_v25 = vmul.f32 0.5, %v3244_v57 }
 0xf75   :  { %v3876_v17 = vsel %vm616_vm6, %v3857_v41, 0.0  ;;  %v3232_v60 = vmul.f32 %v4660_v16, %v3231_v48  ;;  %v3246_v43 = vsub.f32 1.5, %v3245_v25  ;;  %v3222_v41 = vsub.f32 1.5, %v3221_v36 }
 0xf76   :  { %3865 = vadd.xlane.f32.xlu1 %v3864_v10  ;;  %3877 = vadd.xlane.f32.xlu0 %v3876_v17  ;;  %v3211_v10 = vmul.f32 %v4654_v1, %v3210_v45  ;;  %v3274_v1 = vsel %vm3273_vm12, %v7011_v23, %v3272_v47 }
 0xf77   :  { %v3233_v28 = vmul.f32 0.5, %v3232_v60  ;;  %v3247_v35 = vmul.f32 %v4656_v11, %v3246_v43  ;;  %v3223_v34 = vmul.f32 %v4658_v3, %v3222_v41  ;;  %v3216_v11 = vand.u32 2147483648, %v6975_v4 }
 0xf78   :  { %v3212_v54 = vmul.f32 %v3211_v10, %v6975_v4  ;;  %v3277_v32 = vsel %vm3275_vm2, %v3276_v31, %v3274_v1 }
 0xf79   :  { %v3234_v17 = vsub.f32 1.5, %v3233_v28  ;;  %v3248_v26 = vmul.f32 %v3247_v35, %v6996_v13  ;;  %v3224_v49 = vmul.f32 %v3223_v34, %v6984_v30  ;;  %v7122_v9 = vadd.f32 1e-08, %v3277_v32 }
 0xf7a   :  { %v3214_v3 = vsel %vm3213_vm1, %v6975_v4, %v3212_v54 }
 0xf7b   :  { %v3235_v2 = vmul.f32 %v4660_v16, %v3234_v17  ;;  %v3265_v16 = vsel %vm3263_vm0, %v3264_v38, %v3262_v61  ;;  %v3250_v40 = vsel %vm3249_vm4, %v6996_v13, %v3248_v26  ;;  %v3226_v33 = vsel %vm3225_vm7, %v6984_v30, %v3224_v49 }
 0xf7c   :  { %v7126_v42 = vadd.f32 1e-08, %v3265_v16  ;;  %v3217_v57 = vsel %vm3215_vm9, %v3216_v11, %v3214_v3  ;;  %v3253_v13 = vsel %vm3251_vm8, %v3252_v55, %v3250_v40  ;;  %v3229_v15 = vsel %vm3227_vm14, %v3228_v58, %v3226_v33 }
 0xf7d   :  { %v3236_v23 = vmul.f32 %v3235_v2, %v6990_v6  ;;  %v7132_v53 = vadd.f32 1e-08, %v3217_v57  ;;  %v7135_v50 = vadd.f32 1e-08, %v3253_v13  ;;  %v7137_v63 = vadd.f32 1e-08, %v3229_v15 }
 0xf7e   :  { %3868 = vadd.xlane.f32.xlu0 %v3867_v52  ;;  %v3288_v52 = vand.u32 2147483648, %v7017_v51  ;;  %v3383_v38 = vand.u32 2147483648, %v7122_v9  ;;  %vm3362_vm0 = vweird.f32 %v7126_v42  ;;  %v3381_v11 = vand.u32 2147483647, %v7122_v9 }
 0xf7f   :  { %v3238_v48 = vsel %vm3237_vm10, %v6990_v6, %v3236_v23  ;;  %v3368_v49 = vand.u32 2147483648, %v7126_v42  ;;  %v3353_v13 = vand.u32 2147483648, %v7135_v50 }
 0xf80   :  { %v3384_v33 = vor.u32 1.1754944e-38, %v3383_v38  ;;  %vm3382_vm14 = vcmp.eq.f32.partialorder %v3381_v11, 8.507059e+37  ;;  %v3308_v38 = vand.u32 2147483648, %v7132_v53 }
 0xf86   :  { %3859 = vadd.xlane.f32.xlu0 %v3858_v39  ;;  %v3286_v39 = vsel %vm3285_vm15, %v7017_v51, %v3284_v24  ;;  %vm3239_vm15 = vcmp.eq.f32.partialorder %v6990_v6, 0.0 }
 0xf87   :  { %v3289_v51 = vsel %vm3287_vm13, %v3288_v52, %v3286_v39  ;;  %v3241_v30 = vsel %vm3239_vm15, %v3240_v46, %v3238_v48  ;;  %vm3377_vm13 = vweird.f32 %v7122_v9  ;;  %vm3347_vm15 = vweird.f32 %v7135_v50 }
 0xf88   :  { %v7114_v37 = vadd.f32 1e-08, %v3289_v51  ;;  %v7139_v6 = vadd.f32 1e-08, %v3241_v30 }
 0xf8a   :  { %4661 = vrcp.f32 %v7114_v37  ;;  %vm3392_vm12 = vweird.f32 %v7114_v37  ;;  %v3398_v34 = vand.u32 2147483648, %v7114_v37  ;;  %v3396_v31 = vand.u32 2147483647, %v7114_v37 }
 0xf8b   :  { %4663 = vrcp.f32 %v7122_v9  ;;  %vm3332_vm8 = vweird.f32 %v7139_v6 }
 0xf8c   :  { %4665 = vrcp.f32 %v7126_v42  ;;  %v3399_v23 = vor.u32 1.1754944e-38, %v3398_v34  ;;  %vm3397_vm7 = vcmp.eq.f32.partialorder %v3396_v31, 8.507059e+37 }
 0xf8d   :  { %4667 = vrcp.f32 %v7132_v53 }
 0xf8e   :  { %4669 = vrcp.f32 %v7135_v50 }
 0xf8f   :  { %4671 = vrcp.f32 %v7137_v63 }
 0xf90   :  { %v7141_v60 = vpop.eup %4661  ;;  %4673 = vrcp.f32 %v7139_v6 }
 0xf91   :  { %v7145_v4 = vpop.eup %4663  ;;  %v3388_v25 = vmul.f32 %v7141_v60, %v7114_v37  ;;  %vm3393_vm5 = vweird.f32 %v7141_v60  ;;  %v3366_v37 = vand.u32 2147483647, %v7126_v42 }
 0xf92   :  { %v7148_v12 = vpop.eup %4665  ;;  %v3373_v19 = vmul.f32 %v7145_v4, %v7122_v9  ;;  %vm3378_vm1 = vweird.f32 %v7145_v4  ;;  %vm7184_vm2 = vmor %vm3392_vm12, %vm3393_vm5 }
 0xf93   :  { %v7155_v36 = vpop.eup %4667  ;;  %v3358_v59 = vmul.f32 %v7148_v12, %v7126_v42  ;;  %v3389_v28 = vsub.f32 1.0, %v3388_v25  ;;  %vm3363_vm9 = vweird.f32 %v7148_v12  ;;  %vm7193_vm4 = vmor %vm3377_vm13, %vm3378_vm1  ;;  %v3369_v42 = vor.u32 1.1754944e-38, %v3368_v49 }
 0xf94   :  { %v7159_v45 = vpop.eup %4669  ;;  %v3374_v44 = vsub.f32 1.0, %v3373_v19  ;;  %v3298_v10 = vmul.f32 %v7155_v36, %v7132_v53  ;;  %vm7204_vm10 = vmor %vm3362_vm0, %vm3363_vm9  ;;  %vm3367_vm13 = vcmp.eq.f32.partialorder %v3366_v37, 8.507059e+37  ;;  %vm3317_vm1 = vweird.f32 %v7137_v63 }
 0xf95   :  { %v7161_v5 = vpop.eup %4671  ;;  %v3359_v41 = vsub.f32 1.0, %v3358_v59  ;;  %v3343_v24 = vmul.f32 %v7159_v45, %v7135_v50  ;;  %v3390_v17 = vmul.f32 %v7141_v60, %v3389_v28  ;;  %vm3348_vm12 = vweird.f32 %v7159_v45 }
 0xf96   :  { %v7163_v43 = vpop.eup %4673  ;;  %v3313_v47 = vmul.f32 %v7161_v5, %v7137_v63  ;;  %v3375_v22 = vmul.f32 %v7145_v4, %v3374_v44  ;;  %v3299_v54 = vsub.f32 1.0, %v3298_v10  ;;  %v3323_v19 = vand.u32 2147483648, %v7137_v63 }
 0xf97   :  { %v3328_v35 = vmul.f32 %v7163_v43, %v7139_v6  ;;  %v3360_v52 = vmul.f32 %v7148_v12, %v3359_v41  ;;  %v3344_v39 = vsub.f32 1.0, %v3343_v24  ;;  %v3391_v2 = vadd.f32 %v7141_v60, %v3390_v17 }
 0xf98   :  { %v3314_v1 = vsub.f32 1.0, %v3313_v47  ;;  %v3376_v51 = vadd.f32 %v7145_v4, %v3375_v22  ;;  %v3300_v55 = vmul.f32 %v7155_v36, %v3299_v54  ;;  %vm3333_vm5 = vweird.f32 %v7163_v43 }
 0xf99   :  { %v3329_v26 = vsub.f32 1.0, %v3328_v35  ;;  %v3345_v32 = vmul.f32 %v7159_v45, %v3344_v39  ;;  %v3361_v16 = vadd.f32 %v7148_v12, %v3360_v52  ;;  %v3395_v58 = vsel %vm7184_vm2, %v7141_v60, %v3391_v2  ;;  %vm7228_vm2 = vmor %vm3347_vm15, %vm3348_vm12 }
 0xf9a   :  { %v3315_v46 = vmul.f32 %v7161_v5, %v3314_v1  ;;  %v3380_v48 = vsel %vm7193_vm4, %v7145_v4, %v3376_v51  ;;  %v3400_v57 = vsel %vm3397_vm7, %v3399_v23, %v3395_v58  ;;  %v3351_v60 = vand.u32 2147483647, %v7135_v50  ;;  %vm7242_vm9 = vmor %vm3332_vm8, %vm3333_vm5 }
 0xf9b   :  { %v3330_v9 = vmul.f32 %v7163_v43, %v3329_v26  ;;  %v3365_v15 = vsel %vm7204_vm10, %v7148_v12, %v3361_v16  ;;  %v3346_v30 = vadd.f32 %v7159_v45, %v3345_v32  ;;  %v3385_v4 = vsel %vm3382_vm14, %v3384_v33, %v3380_v48  ;;  %v4519_v48 = vld [vmem:[%s7370_s24 + $0x78] sm:$0xff] }
 0xf9c   :  { %v3338_v59 = vand.u32 2147483648, %v7139_v6  ;;  %vm3318_vm0 = vweird.f32 %v7161_v5  ;;  %v3336_v44 = vand.u32 2147483647, %v7139_v6  ;;  %v3401_v41 = vmul.f32 %v3400_v57, %v6859_v0  ;;  %v4517_v57 = vld [vmem:[%s7370_s24 + $0x68] sm:$0xff] }
 0xf9d   :  { %v3331_v12 = vadd.f32 %v7163_v43, %v3330_v9  ;;  %v3370_v24 = vsel %vm3367_vm13, %v3369_v42, %v3365_v15  ;;  %v3316_v17 = vadd.f32 %v7161_v5, %v3315_v46  ;;  %v3321_v47 = vand.u32 2147483647, %v7137_v63  ;;  %vm7254_vm7 = vmor %vm3317_vm1, %vm3318_vm0  ;;  %v3924_v9 = vpop.f32.mrf.mxu1  ;;  %v4518_v42 = vld [vmem:[%s7370_s24 + $0x70] sm:$0xff] }
 0xf9e   :  { %v3354_v22 = vor.u32 1.1754944e-38, %v3353_v13  ;;  %v3386_v52 = vmul.f32 %v3385_v4, %v6848_v56  ;;  %v3350_v0 = vsel %vm7228_vm2, %v7159_v45, %v3346_v30  ;;  %vm3352_vm4 = vcmp.eq.f32.partialorder %v3351_v60, 8.507059e+37  ;;  %v4516_v13 = vld [vmem:[%s7370_s24 + $0x60] sm:$0xff] }
 0xf9f   :  { %v3339_v39 = vor.u32 1.1754944e-38, %v3338_v59  ;;  %vm3302_vm10 = vweird.f32 %v7132_v53  ;;  %vm3303_vm8 = vweird.f32 %v7155_v36  ;;  %v3371_v56 = vmul.f32 %v3370_v24, %v6837_v7  ;;  %v4558_v60 = vld [vmem:[%s7369_s23 + $0x3] ss:$0 sm:$0xff] }
 0xfa0   :  { %v3335_v45 = vsel %vm7242_vm9, %v7163_v43, %v3331_v12  ;;  %vm3337_vm14 = vcmp.eq.f32.partialorder %v3336_v44, 8.507059e+37  ;;  %v3324_v2 = vor.u32 1.1754944e-38, %v3323_v19  ;;  %v3355_v63 = vsel %vm3352_vm4, %v3354_v22, %v3350_v0  ;;  %vm7274_vm12 = vmor %vm3302_vm10, %vm3303_vm8  ;;  %v4029_v12 = vld [vmem:[%s7374_s9 + $0x18] sm:$0xff]  ;;  %v4027_v44 = vld [vmem:[%s7374_s9 + $0x8] sm:$0xff] }
 0xfa1   :  { %v3301_v31 = vadd.f32 %v7155_v36, %v3300_v55  ;;  %v3320_v26 = vsel %vm7254_vm7, %v7161_v5, %v3316_v17  ;;  %vm3322_vm15 = vcmp.eq.f32.partialorder %v3321_v47, 8.507059e+37  ;;  %v3306_v7 = vand.u32 2147483647, %v7132_v53  ;;  %4049 = vmatpush.msra.mxu1 %v4029_v12  ;;  %v4559_v24 = vld [vmem:[%s7371_s25 + $0x3] ss:$0 sm:$0xff] }
 0xfa2   :  { %v3340_v61 = vsel %vm3337_vm14, %v3339_v39, %v3335_v45  ;;  %v3356_v51 = vmul.f32 %v3355_v63, %v6832_v21  ;;  %v3325_v11 = vsel %vm3322_vm15, %v3324_v2, %v3320_v26  ;;  %v3309_v5 = vor.u32 1.1754944e-38, %v3308_v38  ;;  %v4560_v22 = vld [vmem:[%s7496_s11] ss:$0 sm:$0xff] }
 0xfa3   :  { %v3341_v23 = vmul.f32 %v3340_v61, %v6827_v29  ;;  %v3305_v55 = vsel %vm7274_vm12, %v7155_v36, %v3301_v31  ;;  %vm3307_vm5 = vcmp.eq.f32.partialorder %v3306_v7, 8.507059e+37  ;;  %v3326_v16 = vmul.f32 %v3325_v11, %v6822_v27  ;;  %v4512_v29 = vld [vmem:[%s7368_s22 + $0x78] sm:$0xff]  ;;  %v4511_v27 = vld [vmem:[%s7368_s22 + $0x70] sm:$0xff]  ;;  %v4510_v36 = vld [vmem:[%s7368_s22 + $0x68] sm:$0xff] }
 0xfa4   :  { %v3310_v58 = vsel %vm3307_vm5, %v3309_v5, %v3305_v55  ;;  %vm7497_vm0 = vcmask 31744  }
 0xfa5   :  { %v3311_v21 = vmul.f32 %v3310_v58, %v6817_v18  ;;  %v4509_v18 = vld [vmem:[%s7368_s22 + $0x60] sm:$0xff]  ;;  %v3980_v4 = vpop.f32.mrf.mxu1 }
 0xfd9   :  { %v3872_v10 = vpop.xlane.xlu2 %3871 }
 0xfda   :  { %v3883_v1 = vmul.f32 %v3872_v10, %v3371_v56 }
 0xfe1   :  { %v3875_v25 = vpop.xlane.xlu1 %3874  ;;  %v3863_v53 = vpop.xlane.xlu2 %3862 }
 0xfe2   :  { %v3884_v54 = vmul.f32 %v3875_v25, %v3386_v52  ;;  %v3880_v40 = vmul.f32 %v3863_v53, %v3326_v16 }
 0xfe9   :  { %v3878_v35 = vpop.xlane.xlu0 %3877  ;;  %v3866_v49 = vpop.xlane.xlu1 %3865 }
 0xfea   :  { %v3885_v34 = vmul.f32 %v3878_v35, %v3401_v41  ;;  %v3881_v37 = vmul.f32 %v3866_v49, %v3341_v23  ;;  %v4026_v41 = vld [vmem:[%s7374_s9] sm:$0xff] }
 0xfeb   :  { %v4076_v35 = vld [vmem:[%s7494_s15] sm:$0xf] }
 0xfec   :  { %3895 = vmatpush.msrb.mxu0 %v3885_v34 }
 0xfee   :  { %3896 = vmatpush.msrb.mxu0 %v3884_v54 }
 0xff0   :  { %3897 = vmatpush.msrb.mxu0 %v3883_v1 }
 0xff1   :  { %v3869_v3 = vpop.xlane.xlu0 %3868 }
 0xff2   :  { %v3882_v32 = vmul.f32 %v3869_v3, %v3356_v51 }
 0xff4   :  { %3898 = vmatpush.msrb.mxu0 %v3882_v32 }
 0xff6   :  { %3899 = vmatpush.msrb.mxu0 %v3881_v37 }
 0xff8   :  { %3900 = vmatpush.msrb.mxu0 %v3880_v40 }
 0xff9   :  { %v3860_v33 = vpop.xlane.xlu0 %3859 }
 0xffa   :  { %v3879_v46 = vmul.f32 %v3860_v33, %v3311_v21 }
 0xffc   :  { %3901 = vmatpush.msrb.mxu0 %v3879_v46 }
 0xffd   :  { %4503 = vmatmul.msk.f32.vlgmr.msrb.gmra.mxu0 %vm1062_vm11, %v5487_v62  ;;  %v4077_v62 = vld [vmem:[%s7372_s6] sm:$0x7]  ;;  %vm4081_vm11 = vcmask 1042432  }
 0xffe   :  { %3952 = vmatpush.msra.mxu0 %v4512_v29  ;;  %4524 = vmatpush.msk.msra.mxu3 %vm4081_vm11, %v4077_v62 }
0x1000   :  { %3953 = vmatpush.msra.mxu0 %v4511_v27 }
0x1002   :  { %3954 = vmatpush.msra.mxu0 %v4510_v36 }
0x1004   :  { %3955 = vmatpush.msra.mxu0 %v4509_v18 }
0x1005   :  { %4513 = vmatmul.msk.f32.vlgmr.msra.gmra.mxu0 %vm616_vm6, %v3924_v9 }
0x1006   :  { %4010 = vmatpush.msrb.mxu0 %v4519_v48 }
0x1008   :  { %4011 = vmatpush.msrb.mxu0 %v4518_v42 }
0x100a   :  { %4012 = vmatpush.msrb.mxu0 %v4517_v57 }
0x100c   :  { %4013 = vmatpush.msrb.mxu0 %v4516_v13 }
0x107a   :  { %v3903_v15 = vpop.f32.mrf.mxu0 }
0x107b   :  { %v3906_v30 = vadd.f32 %v3903_v15, %v6698_v14  ;;  %v4028_v14 = vld [vmem:[%s7374_s9 + $0x10] sm:$0xff] }
0x107c   :  { %4050 = vmatpush.msra.mxu1 %v4028_v14 }
0x107d   :  { %4525 = vmatmul.msk.f32.vlgmr.msra.gmra.mxu3 %vm314_vm3, %v3906_v30  ;;  %vm7495_vm3 = vcmask 1043456  }
0x107e   :  { %4051 = vmatpush.msra.mxu1 %v4027_v44  ;;  %4526 = vmatpush.msk.msra.mxu0 %vm7495_vm3, %v4076_v35 }
0x1080   :  { %4052 = vmatpush.msra.mxu1 %v4026_v41 }
0x1082   :  { %v3957_v25 = vpop.f32.mrf.mxu0 }
0x1083   :  { %v3981_v19 = vadd.f32 %v3980_v4, %v3957_v25 }
0x1085   :  { %v3988_v59 = vadd.f32 %v4558_v60, %v3981_v19 }
0x1087   :  { %v3989_v28 = vmax.f32 %v3988_v59, 0.0 }
0x1089   :  { %4520 = vmatmul.msk.f32.vlgmr.msrb.gmra.mxu0 %vm616_vm6, %v3989_v28 }
0x1100   :  { %v4102_v26 = vpop.f32.mrf.mxu3 }
0x1106   :  { %v4015_v10 = vpop.f32.mrf.mxu0 }
0x1107   :  { %v4018_v17 = vadd.f32 %v4015_v10, %v6846_v8 }
0x1109   :  { %v4024_v47 = vadd.f32 %v4559_v24, %v4018_v17 }
0x110b   :  { %v4025_v50 = vadd.f32 %v4024_v47, %v4972_v20 }
0x110d   :  { %4522 = vmatmul.msk.f32.vlgmr.msra.gmra.mxu1 %vm616_vm6, %v4025_v50 }
0x118a   :  { %v4054_v52 = vpop.f32.mrf.mxu1 }
0x118b   :  { %v4055_v34 = vadd.f32 %v4560_v22, %v4054_v52 }
0x118d   :  { %v4523_v0 = vmul.f32 -1.442695, %v4055_v34 }
0x118f   :  { %4675 = vpow2.f32 %v4523_v0 }
0x1195   :  { %v4676_v8 = vpop.eup %4675 }
0x1196   :  { %v4060_v6 = vadd.f32 1.0, %v4676_v8 }
0x1198   :  { %4677 = vrcp.f32 %v4060_v6  ;;  %v4072_v54 = vand.u32 2147483648, %v4060_v6  ;;  %v4070_v2 = vand.u32 2147483647, %v4060_v6  ;;  %vm4066_vm13 = vweird.f32 %v4060_v6 }
0x119a   :  { %v4073_v31 = vor.u32 1.1754944e-38, %v4072_v54  ;;  %vm4071_vm2 = vcmp.eq.f32.partialorder %v4070_v2, 8.507059e+37 }
0x119e   :  { %v4678_v20 = vpop.eup %4677 }
0x119f   :  { %v4062_v39 = vmul.f32 %v4678_v20, %v4060_v6  ;;  %vm4067_vm6 = vweird.f32 %v4678_v20 }
0x11a0   :  { %vm4068_vm1 = vmor %vm4066_vm13, %vm4067_vm6 }
0x11a1   :  { %v4063_v56 = vsub.f32 1.0, %v4062_v39 }
0x11a3   :  { %v4064_v45 = vmul.f32 %v4678_v20, %v4063_v56 }
0x11a5   :  { %v4065_v63 = vadd.f32 %v4678_v20, %v4064_v45 }
0x11a7   :  { %v4069_v38 = vsel %vm4068_vm1, %v4678_v20, %v4065_v63 }
0x11a8   :  { %v4074_v1 = vsel %vm4071_vm2, %v4073_v31, %v4069_v38 }
0x11a9   :  { %4527 = vmatmul.msk.f32.vlgmr.msra.gmra.mxu0 %vm7497_vm0, %v4074_v1 }
0x1226   :  { %v4128_v7 = vpop.f32.mrf.mxu0 }
0x1227   :  { %v4129_v61 = vadd.f32 %v4128_v7, %v4102_v26 }
0x1229   :  { %4131 = vst [vmem:[%s7498_s4] sm:$0xff] %v4129_v61 }

</bundles_post_ra>
